<compile_context>
chip_gen: v5e
topology: v5e:2x2
jax: 0.10.0
libtpu: 0.0.40
codegen_flags: <defaults>
</compile_context>

<pallas_src>
import functools
import math

import jax
import jax.numpy as jnp
from jax import lax
from jax.experimental import pallas as pl
from jax.experimental.pallas import tpu as pltpu


# ---------------------------------------------------------------------------
# Vector-slab row layout (each row padded to 4*D lanes, f32)
# ---------------------------------------------------------------------------
_ROW_EMB_G, _ROW_EMB_B, _ROW_OUT_G, _ROW_OUT_B = 0, 1, 2, 3
_ROW_L0 = 4
(_R_LN1_G, _R_LN1_B, _R_LN2_G, _R_LN2_B,
 _R_QKV_B, _R_OP_B, _R_M1_B, _R_M2_B) = range(8)
_ROWS_PER_LAYER = 8


# ---------------------------------------------------------------------------
# Fused transformer-stack kernel (single invocation, batch folded into M)
# ---------------------------------------------------------------------------

def _dt_stack_kernel(seq_ref, vecs_ref, qkv_w_ref, op_w_ref, m1_w_ref, m2_w_ref,
                     o_ref, *, num_heads, num_layers, tokens_per_batch):
    BT, D = o_ref.shape                       # BT = batch * (3 * seq_len)
    T = tokens_per_batch
    nb = BT // T                              # number of batch elements (static)
    hd = D // num_heads
    scale = 1.0 / math.sqrt(hd)               # PyTorch MHA scales by head_dim**-0.5
    bf16 = jnp.bfloat16

    def vrow(r, width):                       # (1, width) f32 row from the packed slab
        return vecs_ref[r:r + 1, :width]

    def layer_norm(x, g_row, b_row):
        mean = jnp.mean(x, axis=-1, keepdims=True)
        xc = x - mean
        var = jnp.mean(xc * xc, axis=-1, keepdims=True)
        return xc * lax.rsqrt(var + 1e-5) * vrow(g_row, D) + vrow(b_row, D)

    # Block-diagonal (same batch element) AND causal additive bias, built once and
    # reused by every layer/head.  Division-free: OR of per-batch window tests.
    ridx = lax.broadcasted_iota(jnp.int32, (BT, BT), 0)
    cidx = lax.broadcasted_iota(jnp.int32, (BT, BT), 1)
    same_batch = None
    for b in range(nb):
        rb = jnp.logical_and(ridx >= b * T, ridx < (b + 1) * T)
        cb = jnp.logical_and(cidx >= b * T, cidx < (b + 1) * T)
        term = jnp.logical_and(rb, cb)
        same_batch = term if same_batch is None else jnp.logical_or(same_batch, term)
    keep = jnp.logical_and(same_batch, cidx <= ridx)
    bias = jnp.where(keep, jnp.float32(0.0), jnp.float32(-1e30))

    # emb_norm
    x = layer_norm(seq_ref[...].astype(jnp.float32), _ROW_EMB_G, _ROW_EMB_B)

    for l in range(num_layers):               # static unroll (num_layers is small)
        base = _ROW_L0 + l * _ROWS_PER_LAYER

        # ---------------- attention sublayer (pre-LN) ----------------
        nx = layer_norm(x, base + _R_LN1_G, base + _R_LN1_B)
        qkv = (jnp.dot(nx.astype(bf16), qkv_w_ref[l],
                       preferred_element_type=jnp.float32)
               + vrow(base + _R_QKV_B, 3 * D))          # (BT, 3D), packed [q | k | v]

        attn = jnp.zeros((BT, D), jnp.float32)
        for h in range(num_heads):                      # static per-head lane slices
            qh = qkv[:, h * hd:(h + 1) * hd].astype(bf16)
            kh = qkv[:, D + h * hd:D + (h + 1) * hd].astype(bf16)
            vh = qkv[:, 2 * D + h * hd:2 * D + (h + 1) * hd].astype(bf16)
            # q @ k^T over the merged batch block (no transpose materialized)
            s = lax.dot_general(qh, kh, (((1,), (1,)), ((), ())),
                                preferred_element_type=jnp.float32) * scale + bias
            m = jnp.max(s, axis=-1, keepdims=True)
            p = jnp.exp(s - m)
            p = p * pl.reciprocal(jnp.sum(p, axis=-1, keepdims=True), approx=True)
            pv = jnp.dot(p.astype(bf16), vh, preferred_element_type=jnp.float32)
            # fold the head-concat into out_proj: accumulate pv_h @ W_out[h-rows]
            attn = attn + jnp.dot(pv.astype(bf16), op_w_ref[l * num_heads + h],
                                  preferred_element_type=jnp.float32)
        x = x + attn + vrow(base + _R_OP_B, D)          # residual (dropout p=0)

        # ---------------- MLP sublayer (pre-LN) ----------------
        nx2 = layer_norm(x, base + _R_LN2_G, base + _R_LN2_B)
        h1 = (jnp.dot(nx2.astype(bf16), m1_w_ref[l],
                      preferred_element_type=jnp.float32)
              + vrow(base + _R_M1_B, 4 * D))
        h1 = 0.5 * h1 * (1.0 + lax.erf(h1 * (1.0 / math.sqrt(2.0))))   # exact GELU
        h2 = (jnp.dot(h1.astype(bf16), m2_w_ref[l],
                      preferred_element_type=jnp.float32)
              + vrow(base + _R_M2_B, D))
        x = x + h2

    # out_norm
    x = layer_norm(x, _ROW_OUT_G, _ROW_OUT_B)
    o_ref[...] = x.astype(o_ref.dtype)


def dt_transformer(seq, kparams, cfg):
    """seq: (B, 3L, D) interleaved [r,s,a] embeddings -> out_norm'ed features (B, 3L, D)."""
    B, T, D = seq.shape
    kernel = functools.partial(_dt_stack_kernel,
                               num_heads=cfg["num_heads"],
                               num_layers=cfg["num_layers"],
                               tokens_per_batch=T)
    vmem = pl.BlockSpec(memory_space=pltpu.MemorySpace.VMEM)
    out = pl.pallas_call(
        kernel,
        out_shape=jax.ShapeDtypeStruct((B * T, D), jnp.float32),
        in_specs=[vmem] * 6,
        out_specs=vmem,
    )(seq.reshape(B * T, D),
      kparams["vecs"], kparams["qkv_w"], kparams["op_w"],
      kparams["mlp_w1"], kparams["mlp_w2"])
    return out.reshape(B, T, D)


# ---------------------------------------------------------------------------
# Parameters: natural (PyTorch-like) layout + one-time packing for the kernel
# ---------------------------------------------------------------------------

def init_params(key, cfg):
    D = cfg["embedding_dim"]
    NL = cfg["num_layers"]

    def normal(k, shape):
        return 0.02 * jax.random.normal(k, shape, jnp.float32)

    keys = iter(jax.random.split(key, 32))
    p = {}
    p["timestep_emb"] = normal(next(keys), (cfg["episode_len"] + cfg["seq_len"], D))
    p["state_emb_w"] = normal(next(keys), (cfg["state_dim"], D))
    p["state_emb_b"] = jnp.zeros((D,), jnp.float32)
    p["action_emb_w"] = normal(next(keys), (cfg["action_dim"], D))
    p["action_emb_b"] = jnp.zeros((D,), jnp.float32)
    p["return_emb_w"] = normal(next(keys), (1, D))
    p["return_emb_b"] = jnp.zeros((D,), jnp.float32)
    p["emb_norm_g"] = jnp.ones((D,), jnp.float32)
    p["emb_norm_b"] = jnp.zeros((D,), jnp.float32)
    p["out_norm_g"] = jnp.ones((D,), jnp.float32)
    p["out_norm_b"] = jnp.zeros((D,), jnp.float32)
    # per-layer weights stacked with a leading layer axis, pre-transposed (in, out)
    p["ln1_g"] = jnp.ones((NL, D), jnp.float32)
    p["ln1_b"] = jnp.zeros((NL, D), jnp.float32)
    p["ln2_g"] = jnp.ones((NL, D), jnp.float32)
    p["ln2_b"] = jnp.zeros((NL, D), jnp.float32)
    p["in_proj_w"] = normal(next(keys), (NL, D, 3 * D))    # columns packed [q | k | v]
    p["in_proj_b"] = jnp.zeros((NL, 3 * D), jnp.float32)
    p["out_proj_w"] = normal(next(keys), (NL, D, D))
    p["out_proj_b"] = jnp.zeros((NL, D), jnp.float32)
    p["mlp_w1"] = normal(next(keys), (NL, D, 4 * D))
    p["mlp_b1"] = jnp.zeros((NL, 4 * D), jnp.float32)
    p["mlp_w2"] = normal(next(keys), (NL, 4 * D, D))
    p["mlp_b2"] = jnp.zeros((NL, D), jnp.float32)
    p["head_w"] = normal(next(keys), (D, cfg["action_dim"]))
    p["head_b"] = jnp.zeros((cfg["action_dim"],), jnp.float32)
    return p


def pack_params(p, cfg):
    """Pack the 17 transformer-stack tensors into 5 kernel inputs (done once)."""
    D = cfg["embedding_dim"]
    NL = cfg["num_layers"]
    H = cfg["num_heads"]
    hd = D // H

    def row(v):  # pad any gamma/beta/bias to a full 4*D-lane row
        v = v.reshape(-1).astype(jnp.float32)
        return jnp.zeros((4 * D,), jnp.float32).at[: v.shape[0]].set(v)

    rows = [row(p["emb_norm_g"]), row(p["emb_norm_b"]),
            row(p["out_norm_g"]), row(p["out_norm_b"])]
    for l in range(NL):   # must match _R_* offsets in the kernel
        rows += [row(p["ln1_g"][l]), row(p["ln1_b"][l]),
                 row(p["ln2_g"][l]), row(p["ln2_b"][l]),
                 row(p["in_proj_b"][l]), row(p["out_proj_b"][l]),
                 row(p["mlp_b1"][l]), row(p["mlp_b2"][l])]
    vecs = jnp.stack(rows, axis=0)                                   # (4 + 8*NL, 4D)

    return {
        "vecs": vecs,                                                # f32
        "qkv_w": p["in_proj_w"].astype(jnp.bfloat16),                # (NL, D, 3D)
        # out_proj rows split per head -> (NL*H, hd, D): head h of layer l at [l*H + h]
        "op_w": p["out_proj_w"].reshape(NL * H, hd, D).astype(jnp.bfloat16),
        "mlp_w1": p["mlp_w1"].astype(jnp.bfloat16),                  # (NL, D, 4D)
        "mlp_w2": p["mlp_w2"].astype(jnp.bfloat16),                  # (NL, 4D, D)
    }


# ---------------------------------------------------------------------------
# Forward (glue in plain XLA, transformer stack in the fused kernel)
# ---------------------------------------------------------------------------

def decision_transformer_forward(params, kparams, states, actions, returns_to_go,
                                 time_steps, cfg):
    B, L, _ = states.shape
    D = cfg["embedding_dim"]

    # Embedding path: tiny-K projections + gather; plain XLA fuses these.
    time_emb = params["timestep_emb"][time_steps]                              # (B, L, D)
    state_emb = states @ params["state_emb_w"] + params["state_emb_b"] + time_emb
    act_emb = actions @ params["action_emb_w"] + params["action_emb_b"] + time_emb
    ret_emb = (returns_to_go[..., None] * params["return_emb_w"][0]            # outer product
               + params["return_emb_b"] + time_emb)

    # interleave tokens per step: [return, state, action] -> (B, 3L, D)
    seq = jnp.stack([ret_emb, state_emb, act_emb], axis=1)                     # (B, 3, L, D)
    seq = seq.transpose(0, 2, 1, 3).reshape(B, 3 * L, D)

    # Fused emb_norm -> transformer blocks -> out_norm (single pallas_call, no grid).
    # TODO(synk): key_padding_mask path not implemented; forward matches padding_mask=None.
    out = dt_transformer(seq, kparams, cfg)                                    # (B, 3L, D)

    # Action head on state-token positions (D -> action_dim, stays in XLA).
    state_tok = out[:, 1::3]                                                   # (B, L, D)
    act_pred = jnp.tanh(state_tok @ params["head_w"] + params["head_b"])
    return act_pred * cfg["max_action"]


# ---------------------------------------------------------------------------

if __name__ == "__main__":
    cfg = dict(state_dim=6, action_dim=3, seq_len=8, episode_len=32,
               embedding_dim=32, num_layers=2, num_heads=2, max_action=1.0)

    key = jax.random.PRNGKey(0)
    kp, ks, ka, kr = jax.random.split(key, 4)
    params = init_params(kp, cfg)
    kparams = pack_params(params, cfg)          # one-time weight packing / bf16 cast

    B, L = 2, cfg["seq_len"]
    states = jax.random.normal(ks, (B, L, cfg["state_dim"]), jnp.float32)
    actions = jax.random.normal(ka, (B, L, cfg["action_dim"]), jnp.float32)
    returns_to_go = jax.random.normal(kr, (B, L), jnp.float32)
    time_steps = jnp.tile(jnp.arange(L, dtype=jnp.int32)[None, :], (B, 1))

    fwd = jax.jit(functools.partial(decision_transformer_forward, cfg=cfg))
    out = jax.block_until_ready(
        fwd(params, kparams, states, actions, returns_to_go, time_steps))
    assert out.shape == (B, L, cfg["action_dim"])
    assert bool(jnp.all(jnp.isfinite(out)))
    print("KERNEL_OK")
</pallas_src>

<mosaic_0001>
module attributes {stable_mosaic.version = 11 : i64} {
  func.func @_dt_stack_kernel(%arg0: memref<48x32xf32, #tpu.memory_space<vmem>>, %arg1: memref<20x128xf32, #tpu.memory_space<vmem>>, %arg2: memref<2x32x96xbf16, #tpu.memory_space<vmem>>, %arg3: memref<4x16x32xbf16, #tpu.memory_space<vmem>>, %arg4: memref<2x32x128xbf16, #tpu.memory_space<vmem>>, %arg5: memref<2x128x32xbf16, #tpu.memory_space<vmem>>, %arg6: memref<48x32xf32, #tpu.memory_space<vmem>>) attributes {dimension_semantics = [], scalar_prefetch = 0 : i64, scratch_operands = 0 : i64, tpu.core_type = #tpu.core_type<tc>} {
    %0 = tpu.iota {dimensions = array<i32: 0>} : vector<48x48xi32>
    %1 = tpu.iota {dimensions = array<i32: 1>} : vector<48x48xi32>
    %c0_i32 = arith.constant 0 : i32
    %2 = vector.broadcast %c0_i32 : i32 to vector<48x48xi32>
    %3 = arith.cmpi sge, %0, %2 : vector<48x48xi32>
    %c24_i32 = arith.constant 24 : i32
    %4 = vector.broadcast %c24_i32 : i32 to vector<48x48xi32>
    %5 = arith.cmpi slt, %0, %4 : vector<48x48xi32>
    %6 = arith.andi %3, %5 : vector<48x48xi1>
    %c0_i32_0 = arith.constant 0 : i32
    %7 = vector.broadcast %c0_i32_0 : i32 to vector<48x48xi32>
    %8 = arith.cmpi sge, %1, %7 : vector<48x48xi32>
    %c24_i32_1 = arith.constant 24 : i32
    %9 = vector.broadcast %c24_i32_1 : i32 to vector<48x48xi32>
    %10 = arith.cmpi slt, %1, %9 : vector<48x48xi32>
    %11 = arith.andi %8, %10 : vector<48x48xi1>
    %12 = arith.andi %6, %11 : vector<48x48xi1>
    %c24_i32_2 = arith.constant 24 : i32
    %13 = vector.broadcast %c24_i32_2 : i32 to vector<48x48xi32>
    %14 = arith.cmpi sge, %0, %13 : vector<48x48xi32>
    %c48_i32 = arith.constant 48 : i32
    %15 = vector.broadcast %c48_i32 : i32 to vector<48x48xi32>
    %16 = arith.cmpi slt, %0, %15 : vector<48x48xi32>
    %17 = arith.andi %14, %16 : vector<48x48xi1>
    %c24_i32_3 = arith.constant 24 : i32
    %18 = vector.broadcast %c24_i32_3 : i32 to vector<48x48xi32>
    %19 = arith.cmpi sge, %1, %18 : vector<48x48xi32>
    %c48_i32_4 = arith.constant 48 : i32
    %20 = vector.broadcast %c48_i32_4 : i32 to vector<48x48xi32>
    %21 = arith.cmpi slt, %1, %20 : vector<48x48xi32>
    %22 = arith.andi %19, %21 : vector<48x48xi1>
    %23 = arith.andi %17, %22 : vector<48x48xi1>
    %24 = arith.ori %12, %23 : vector<48x48xi1>
    %25 = arith.cmpi sle, %1, %0 : vector<48x48xi32>
    %26 = arith.andi %24, %25 : vector<48x48xi1>
    %cst = arith.constant 0.000000e+00 : f32
    %cst_5 = arith.constant -1.000000e+30 : f32
    %27 = vector.broadcast %cst : f32 to vector<48x48xf32>
    %28 = vector.broadcast %cst_5 : f32 to vector<48x48xf32>
    %29 = arith.select %26, %27, %28 : vector<48x48xi1>, vector<48x48xf32>
    %c0 = arith.constant 0 : index
    %c0_6 = arith.constant 0 : index
    %30 = vector.load %arg0[%c0, %c0_6] : memref<48x32xf32, #tpu.memory_space<vmem>>, vector<48x32xf32>
    %cst_7 = arith.constant dense<0.000000e+00> : vector<48xf32>
    %31 = vector.multi_reduction <add>, %30, %cst_7 [1] : vector<48x32xf32> to vector<48xf32>
    %32 = vector.shape_cast %31 : vector<48xf32> to vector<48x1xf32>
    %cst_8 = arith.constant 3.200000e+01 : f32
    %33 = vector.broadcast %cst_8 : f32 to vector<48x1xf32>
    %34 = arith.divf %32, %33 : vector<48x1xf32>
    %35 = vector.broadcast %34 : vector<48x1xf32> to vector<48x32xf32>
    %36 = arith.subf %30, %35 : vector<48x32xf32>
    %37 = arith.mulf %36, %36 : vector<48x32xf32>
    %cst_9 = arith.constant dense<0.000000e+00> : vector<48xf32>
    %38 = vector.multi_reduction <add>, %37, %cst_9 [1] : vector<48x32xf32> to vector<48xf32>
    %39 = vector.shape_cast %38 : vector<48xf32> to vector<48x1xf32>
    %cst_10 = arith.constant 3.200000e+01 : f32
    %40 = vector.broadcast %cst_10 : f32 to vector<48x1xf32>
    %41 = arith.divf %39, %40 : vector<48x1xf32>
    %cst_11 = arith.constant 9.99999974E-6 : f32
    %42 = vector.broadcast %cst_11 : f32 to vector<48x1xf32>
    %43 = arith.addf %41, %42 : vector<48x1xf32>
    %44 = math.rsqrt %43 : vector<48x1xf32>
    %45 = vector.broadcast %44 : vector<48x1xf32> to vector<48x32xf32>
    %46 = arith.mulf %36, %45 : vector<48x32xf32>
    %c0_12 = arith.constant 0 : index
    %c0_13 = arith.constant 0 : index
    %47 = vector.load %arg1[%c0_12, %c0_13] : memref<20x128xf32, #tpu.memory_space<vmem>>, vector<1x32xf32>
    %48 = vector.broadcast %47 : vector<1x32xf32> to vector<48x32xf32>
    %49 = arith.mulf %46, %48 : vector<48x32xf32>
    %c1 = arith.constant 1 : index
    %c0_14 = arith.constant 0 : index
    %50 = vector.load %arg1[%c1, %c0_14] : memref<20x128xf32, #tpu.memory_space<vmem>>, vector<1x32xf32>
    %51 = vector.broadcast %50 : vector<1x32xf32> to vector<48x32xf32>
    %52 = arith.addf %49, %51 : vector<48x32xf32>
    %cst_15 = arith.constant dense<0.000000e+00> : vector<48xf32>
    %53 = vector.multi_reduction <add>, %52, %cst_15 [1] : vector<48x32xf32> to vector<48xf32>
    %54 = vector.shape_cast %53 : vector<48xf32> to vector<48x1xf32>
    %cst_16 = arith.constant 3.200000e+01 : f32
    %55 = vector.broadcast %cst_16 : f32 to vector<48x1xf32>
    %56 = arith.divf %54, %55 : vector<48x1xf32>
    %57 = vector.broadcast %56 : vector<48x1xf32> to vector<48x32xf32>
    %58 = arith.subf %52, %57 : vector<48x32xf32>
    %59 = arith.mulf %58, %58 : vector<48x32xf32>
    %cst_17 = arith.constant dense<0.000000e+00> : vector<48xf32>
    %60 = vector.multi_reduction <add>, %59, %cst_17 [1] : vector<48x32xf32> to vector<48xf32>
    %61 = vector.shape_cast %60 : vector<48xf32> to vector<48x1xf32>
    %cst_18 = arith.constant 3.200000e+01 : f32
    %62 = vector.broadcast %cst_18 : f32 to vector<48x1xf32>
    %63 = arith.divf %61, %62 : vector<48x1xf32>
    %cst_19 = arith.constant 9.99999974E-6 : f32
    %64 = vector.broadcast %cst_19 : f32 to vector<48x1xf32>
    %65 = arith.addf %63, %64 : vector<48x1xf32>
    %66 = math.rsqrt %65 : vector<48x1xf32>
    %67 = vector.broadcast %66 : vector<48x1xf32> to vector<48x32xf32>
    %68 = arith.mulf %58, %67 : vector<48x32xf32>
    %c4 = arith.constant 4 : index
    %c0_20 = arith.constant 0 : index
    %69 = vector.load %arg1[%c4, %c0_20] : memref<20x128xf32, #tpu.memory_space<vmem>>, vector<1x32xf32>
    %70 = vector.broadcast %69 : vector<1x32xf32> to vector<48x32xf32>
    %71 = arith.mulf %68, %70 : vector<48x32xf32>
    %c5 = arith.constant 5 : index
    %c0_21 = arith.constant 0 : index
    %72 = vector.load %arg1[%c5, %c0_21] : memref<20x128xf32, #tpu.memory_space<vmem>>, vector<1x32xf32>
    %73 = vector.broadcast %72 : vector<1x32xf32> to vector<48x32xf32>
    %74 = arith.addf %71, %73 : vector<48x32xf32>
    %75 = arith.truncf %74 : vector<48x32xf32> to vector<48x32xbf16>
    %c0_22 = arith.constant 0 : index
    %c0_23 = arith.constant 0 : index
    %c0_24 = arith.constant 0 : index
    %76 = vector.load %arg2[%c0_22, %c0_23, %c0_24] : memref<2x32x96xbf16, #tpu.memory_space<vmem>>, vector<1x32x96xbf16>
    %77 = vector.shape_cast %76 : vector<1x32x96xbf16> to vector<32x96xbf16>
    %cst_25 = arith.constant dense<0.000000e+00> : vector<48x96xf32>
    %78 = tpu.matmul %75, %77, %cst_25 {dimension_numbers = #tpu.dot_dimension_numbers<[1], [0], [0], [1], [0, 0, 1, 1], [], []>} : vector<48x32xbf16>, vector<32x96xbf16>, vector<48x96xf32> -> vector<48x96xf32>
    %c8 = arith.constant 8 : index
    %c0_26 = arith.constant 0 : index
    %79 = vector.load %arg1[%c8, %c0_26] : memref<20x128xf32, #tpu.memory_space<vmem>>, vector<1x96xf32>
    %80 = vector.broadcast %79 : vector<1x96xf32> to vector<48x96xf32>
    %81 = arith.addf %78, %80 : vector<48x96xf32>
    %cst_27 = arith.constant 0.000000e+00 : f32
    %82 = vector.broadcast %cst_27 : f32 to vector<48x32xf32>
    %83 = vector.extract_strided_slice %81 {offsets = [0, 0], sizes = [48, 16], strides = [1, 1]} : vector<48x96xf32> to vector<48x16xf32>
    %84 = arith.truncf %83 : vector<48x16xf32> to vector<48x16xbf16>
    %85 = vector.extract_strided_slice %81 {offsets = [0, 32], sizes = [48, 16], strides = [1, 1]} : vector<48x96xf32> to vector<48x16xf32>
    %86 = arith.truncf %85 : vector<48x16xf32> to vector<48x16xbf16>
    %87 = vector.extract_strided_slice %81 {offsets = [0, 64], sizes = [48, 16], strides = [1, 1]} : vector<48x96xf32> to vector<48x16xf32>
    %88 = arith.truncf %87 : vector<48x16xf32> to vector<48x16xbf16>
    %cst_28 = arith.constant dense<0.000000e+00> : vector<48x48xf32>
    %89 = tpu.matmul %84, %86, %cst_28 {dimension_numbers = #tpu.dot_dimension_numbers<[1], [1], [0], [0], [0, 0, 1, 0], [], []>} : vector<48x16xbf16>, vector<48x16xbf16>, vector<48x48xf32> -> vector<48x48xf32>
    %cst_29 = arith.constant 2.500000e-01 : f32
    %90 = vector.broadcast %cst_29 : f32 to vector<48x48xf32>
    %91 = arith.mulf %89, %90 : vector<48x48xf32>
    %92 = arith.addf %91, %29 : vector<48x48xf32>
    %cst_30 = arith.constant dense<0xFF800000> : vector<48xf32>
    %93 = vector.multi_reduction <maximumf>, %92, %cst_30 [1] : vector<48x48xf32> to vector<48xf32>
    %94 = vector.shape_cast %93 : vector<48xf32> to vector<48x1xf32>
    %95 = vector.broadcast %94 : vector<48x1xf32> to vector<48x48xf32>
    %96 = arith.subf %92, %95 : vector<48x48xf32>
    %97 = math.exp %96 : vector<48x48xf32>
    %cst_31 = arith.constant dense<0.000000e+00> : vector<48xf32>
    %98 = vector.multi_reduction <add>, %97, %cst_31 [1] : vector<48x48xf32> to vector<48xf32>
    %99 = vector.shape_cast %98 : vector<48xf32> to vector<48x1xf32>
    %100 = tpu.reciprocal %99 {approx = true} : vector<48x1xf32> -> vector<48x1xf32>
    %101 = vector.broadcast %100 : vector<48x1xf32> to vector<48x48xf32>
    %102 = arith.mulf %97, %101 : vector<48x48xf32>
    %103 = arith.truncf %102 : vector<48x48xf32> to vector<48x48xbf16>
    %cst_32 = arith.constant dense<0.000000e+00> : vector<48x16xf32>
    %104 = tpu.matmul %103, %88, %cst_32 {dimension_numbers = #tpu.dot_dimension_numbers<[1], [0], [0], [1], [0, 0, 1, 1], [], []>} : vector<48x48xbf16>, vector<48x16xbf16>, vector<48x16xf32> -> vector<48x16xf32>
    %105 = arith.truncf %104 : vector<48x16xf32> to vector<48x16xbf16>
    %c0_33 = arith.constant 0 : index
    %c0_34 = arith.constant 0 : index
    %c0_35 = arith.constant 0 : index
    %106 = vector.load %arg3[%c0_33, %c0_34, %c0_35] : memref<4x16x32xbf16, #tpu.memory_space<vmem>>, vector<1x16x32xbf16>
    %107 = vector.shape_cast %106 : vector<1x16x32xbf16> to vector<16x32xbf16>
    %cst_36 = arith.constant dense<0.000000e+00> : vector<48x32xf32>
    %108 = tpu.matmul %105, %107, %cst_36 {dimension_numbers = #tpu.dot_dimension_numbers<[1], [0], [0], [1], [0, 0, 1, 1], [], []>} : vector<48x16xbf16>, vector<16x32xbf16>, vector<48x32xf32> -> vector<48x32xf32>
    %109 = arith.addf %82, %108 : vector<48x32xf32>
    %110 = vector.extract_strided_slice %81 {offsets = [0, 16], sizes = [48, 16], strides = [1, 1]} : vector<48x96xf32> to vector<48x16xf32>
    %111 = arith.truncf %110 : vector<48x16xf32> to vector<48x16xbf16>
    %112 = vector.extract_strided_slice %81 {offsets = [0, 48], sizes = [48, 16], strides = [1, 1]} : vector<48x96xf32> to vector<48x16xf32>
    %113 = arith.truncf %112 : vector<48x16xf32> to vector<48x16xbf16>
    %114 = vector.extract_strided_slice %81 {offsets = [0, 80], sizes = [48, 16], strides = [1, 1]} : vector<48x96xf32> to vector<48x16xf32>
    %115 = arith.truncf %114 : vector<48x16xf32> to vector<48x16xbf16>
    %cst_37 = arith.constant dense<0.000000e+00> : vector<48x48xf32>
    %116 = tpu.matmul %111, %113, %cst_37 {dimension_numbers = #tpu.dot_dimension_numbers<[1], [1], [0], [0], [0, 0, 1, 0], [], []>} : vector<48x16xbf16>, vector<48x16xbf16>, vector<48x48xf32> -> vector<48x48xf32>
    %cst_38 = arith.constant 2.500000e-01 : f32
    %117 = vector.broadcast %cst_38 : f32 to vector<48x48xf32>
    %118 = arith.mulf %116, %117 : vector<48x48xf32>
    %119 = arith.addf %118, %29 : vector<48x48xf32>
    %cst_39 = arith.constant dense<0xFF800000> : vector<48xf32>
    %120 = vector.multi_reduction <maximumf>, %119, %cst_39 [1] : vector<48x48xf32> to vector<48xf32>
    %121 = vector.shape_cast %120 : vector<48xf32> to vector<48x1xf32>
    %122 = vector.broadcast %121 : vector<48x1xf32> to vector<48x48xf32>
    %123 = arith.subf %119, %122 : vector<48x48xf32>
    %124 = math.exp %123 : vector<48x48xf32>
    %cst_40 = arith.constant dense<0.000000e+00> : vector<48xf32>
    %125 = vector.multi_reduction <add>, %124, %cst_40 [1] : vector<48x48xf32> to vector<48xf32>
    %126 = vector.shape_cast %125 : vector<48xf32> to vector<48x1xf32>
    %127 = tpu.reciprocal %126 {approx = true} : vector<48x1xf32> -> vector<48x1xf32>
    %128 = vector.broadcast %127 : vector<48x1xf32> to vector<48x48xf32>
    %129 = arith.mulf %124, %128 : vector<48x48xf32>
    %130 = arith.truncf %129 : vector<48x48xf32> to vector<48x48xbf16>
    %cst_41 = arith.constant dense<0.000000e+00> : vector<48x16xf32>
    %131 = tpu.matmul %130, %115, %cst_41 {dimension_numbers = #tpu.dot_dimension_numbers<[1], [0], [0], [1], [0, 0, 1, 1], [], []>} : vector<48x48xbf16>, vector<48x16xbf16>, vector<48x16xf32> -> vector<48x16xf32>
    %132 = arith.truncf %131 : vector<48x16xf32> to vector<48x16xbf16>
    %c1_42 = arith.constant 1 : index
    %c0_43 = arith.constant 0 : index
    %c0_44 = arith.constant 0 : index
    %133 = vector.load %arg3[%c1_42, %c0_43, %c0_44] : memref<4x16x32xbf16, #tpu.memory_space<vmem>>, vector<1x16x32xbf16>
    %134 = vector.shape_cast %133 : vector<1x16x32xbf16> to vector<16x32xbf16>
    %cst_45 = arith.constant dense<0.000000e+00> : vector<48x32xf32>
    %135 = tpu.matmul %132, %134, %cst_45 {dimension_numbers = #tpu.dot_dimension_numbers<[1], [0], [0], [1], [0, 0, 1, 1], [], []>} : vector<48x16xbf16>, vector<16x32xbf16>, vector<48x32xf32> -> vector<48x32xf32>
    %136 = arith.addf %109, %135 : vector<48x32xf32>
    %137 = arith.addf %52, %136 : vector<48x32xf32>
    %c9 = arith.constant 9 : index
    %c0_46 = arith.constant 0 : index
    %138 = vector.load %arg1[%c9, %c0_46] : memref<20x128xf32, #tpu.memory_space<vmem>>, vector<1x32xf32>
    %139 = vector.broadcast %138 : vector<1x32xf32> to vector<48x32xf32>
    %140 = arith.addf %137, %139 : vector<48x32xf32>
    %cst_47 = arith.constant dense<0.000000e+00> : vector<48xf32>
    %141 = vector.multi_reduction <add>, %140, %cst_47 [1] : vector<48x32xf32> to vector<48xf32>
    %142 = vector.shape_cast %141 : vector<48xf32> to vector<48x1xf32>
    %cst_48 = arith.constant 3.200000e+01 : f32
    %143 = vector.broadcast %cst_48 : f32 to vector<48x1xf32>
    %144 = arith.divf %142, %143 : vector<48x1xf32>
    %145 = vector.broadcast %144 : vector<48x1xf32> to vector<48x32xf32>
    %146 = arith.subf %140, %145 : vector<48x32xf32>
    %147 = arith.mulf %146, %146 : vector<48x32xf32>
    %cst_49 = arith.constant dense<0.000000e+00> : vector<48xf32>
    %148 = vector.multi_reduction <add>, %147, %cst_49 [1] : vector<48x32xf32> to vector<48xf32>
    %149 = vector.shape_cast %148 : vector<48xf32> to vector<48x1xf32>
    %cst_50 = arith.constant 3.200000e+01 : f32
    %150 = vector.broadcast %cst_50 : f32 to vector<48x1xf32>
    %151 = arith.divf %149, %150 : vector<48x1xf32>
    %cst_51 = arith.constant 9.99999974E-6 : f32
    %152 = vector.broadcast %cst_51 : f32 to vector<48x1xf32>
    %153 = arith.addf %151, %152 : vector<48x1xf32>
    %154 = math.rsqrt %153 : vector<48x1xf32>
    %155 = vector.broadcast %154 : vector<48x1xf32> to vector<48x32xf32>
    %156 = arith.mulf %146, %155 : vector<48x32xf32>
    %c6 = arith.constant 6 : index
    %c0_52 = arith.constant 0 : index
    %157 = vector.load %arg1[%c6, %c0_52] : memref<20x128xf32, #tpu.memory_space<vmem>>, vector<1x32xf32>
    %158 = vector.broadcast %157 : vector<1x32xf32> to vector<48x32xf32>
    %159 = arith.mulf %156, %158 : vector<48x32xf32>
    %c7 = arith.constant 7 : index
    %c0_53 = arith.constant 0 : index
    %160 = vector.load %arg1[%c7, %c0_53] : memref<20x128xf32, #tpu.memory_space<vmem>>, vector<1x32xf32>
    %161 = vector.broadcast %160 : vector<1x32xf32> to vector<48x32xf32>
    %162 = arith.addf %159, %161 : vector<48x32xf32>
    %163 = arith.truncf %162 : vector<48x32xf32> to vector<48x32xbf16>
    %c0_54 = arith.constant 0 : index
    %c0_55 = arith.constant 0 : index
    %c0_56 = arith.constant 0 : index
    %164 = vector.load %arg4[%c0_54, %c0_55, %c0_56] : memref<2x32x128xbf16, #tpu.memory_space<vmem>>, vector<1x32x128xbf16>
    %165 = vector.shape_cast %164 : vector<1x32x128xbf16> to vector<32x128xbf16>
    %cst_57 = arith.constant dense<0.000000e+00> : vector<48x128xf32>
    %166 = tpu.matmul %163, %165, %cst_57 {dimension_numbers = #tpu.dot_dimension_numbers<[1], [0], [0], [1], [0, 0, 1, 1], [], []>} : vector<48x32xbf16>, vector<32x128xbf16>, vector<48x128xf32> -> vector<48x128xf32>
    %c10 = arith.constant 10 : index
    %c0_58 = arith.constant 0 : index
    %167 = vector.load %arg1[%c10, %c0_58] : memref<20x128xf32, #tpu.memory_space<vmem>>, vector<1x128xf32>
    %168 = vector.broadcast %167 : vector<1x128xf32> to vector<48x128xf32>
    %169 = arith.addf %166, %168 : vector<48x128xf32>
    %cst_59 = arith.constant 5.000000e-01 : f32
    %170 = vector.broadcast %cst_59 : f32 to vector<48x128xf32>
    %171 = arith.mulf %170, %169 : vector<48x128xf32>
    %cst_60 = arith.constant 0.707106769 : f32
    %172 = vector.broadcast %cst_60 : f32 to vector<48x128xf32>
    %173 = arith.mulf %169, %172 : vector<48x128xf32>
    %174 = math.erf %173 : vector<48x128xf32>
    %cst_61 = arith.constant 1.000000e+00 : f32
    %175 = vector.broadcast %cst_61 : f32 to vector<48x128xf32>
    %176 = arith.addf %175, %174 : vector<48x128xf32>
    %177 = arith.mulf %171, %176 : vector<48x128xf32>
    %178 = arith.truncf %177 : vector<48x128xf32> to vector<48x128xbf16>
    %c0_62 = arith.constant 0 : index
    %c0_63 = arith.constant 0 : index
    %c0_64 = arith.constant 0 : index
    %179 = vector.load %arg5[%c0_62, %c0_63, %c0_64] : memref<2x128x32xbf16, #tpu.memory_space<vmem>>, vector<1x128x32xbf16>
    %180 = vector.shape_cast %179 : vector<1x128x32xbf16> to vector<128x32xbf16>
    %cst_65 = arith.constant dense<0.000000e+00> : vector<48x32xf32>
    %181 = tpu.matmul %178, %180, %cst_65 {dimension_numbers = #tpu.dot_dimension_numbers<[1], [0], [0], [1], [0, 0, 1, 1], [], []>} : vector<48x128xbf16>, vector<128x32xbf16>, vector<48x32xf32> -> vector<48x32xf32>
    %c11 = arith.constant 11 : index
    %c0_66 = arith.constant 0 : index
    %182 = vector.load %arg1[%c11, %c0_66] : memref<20x128xf32, #tpu.memory_space<vmem>>, vector<1x32xf32>
    %183 = vector.broadcast %182 : vector<1x32xf32> to vector<48x32xf32>
    %184 = arith.addf %181, %183 : vector<48x32xf32>
    %185 = arith.addf %140, %184 : vector<48x32xf32>
    %cst_67 = arith.constant dense<0.000000e+00> : vector<48xf32>
    %186 = vector.multi_reduction <add>, %185, %cst_67 [1] : vector<48x32xf32> to vector<48xf32>
    %187 = vector.shape_cast %186 : vector<48xf32> to vector<48x1xf32>
    %cst_68 = arith.constant 3.200000e+01 : f32
    %188 = vector.broadcast %cst_68 : f32 to vector<48x1xf32>
    %189 = arith.divf %187, %188 : vector<48x1xf32>
    %190 = vector.broadcast %189 : vector<48x1xf32> to vector<48x32xf32>
    %191 = arith.subf %185, %190 : vector<48x32xf32>
    %192 = arith.mulf %191, %191 : vector<48x32xf32>
    %cst_69 = arith.constant dense<0.000000e+00> : vector<48xf32>
    %193 = vector.multi_reduction <add>, %192, %cst_69 [1] : vector<48x32xf32> to vector<48xf32>
    %194 = vector.shape_cast %193 : vector<48xf32> to vector<48x1xf32>
    %cst_70 = arith.constant 3.200000e+01 : f32
    %195 = vector.broadcast %cst_70 : f32 to vector<48x1xf32>
    %196 = arith.divf %194, %195 : vector<48x1xf32>
    %cst_71 = arith.constant 9.99999974E-6 : f32
    %197 = vector.broadcast %cst_71 : f32 to vector<48x1xf32>
    %198 = arith.addf %196, %197 : vector<48x1xf32>
    %199 = math.rsqrt %198 : vector<48x1xf32>
    %200 = vector.broadcast %199 : vector<48x1xf32> to vector<48x32xf32>
    %201 = arith.mulf %191, %200 : vector<48x32xf32>
    %c12 = arith.constant 12 : index
    %c0_72 = arith.constant 0 : index
    %202 = vector.load %arg1[%c12, %c0_72] : memref<20x128xf32, #tpu.memory_space<vmem>>, vector<1x32xf32>
    %203 = vector.broadcast %202 : vector<1x32xf32> to vector<48x32xf32>
    %204 = arith.mulf %201, %203 : vector<48x32xf32>
    %c13 = arith.constant 13 : index
    %c0_73 = arith.constant 0 : index
    %205 = vector.load %arg1[%c13, %c0_73] : memref<20x128xf32, #tpu.memory_space<vmem>>, vector<1x32xf32>
    %206 = vector.broadcast %205 : vector<1x32xf32> to vector<48x32xf32>
    %207 = arith.addf %204, %206 : vector<48x32xf32>
    %208 = arith.truncf %207 : vector<48x32xf32> to vector<48x32xbf16>
    %c1_74 = arith.constant 1 : index
    %c0_75 = arith.constant 0 : index
    %c0_76 = arith.constant 0 : index
    %209 = vector.load %arg2[%c1_74, %c0_75, %c0_76] : memref<2x32x96xbf16, #tpu.memory_space<vmem>>, vector<1x32x96xbf16>
    %210 = vector.shape_cast %209 : vector<1x32x96xbf16> to vector<32x96xbf16>
    %cst_77 = arith.constant dense<0.000000e+00> : vector<48x96xf32>
    %211 = tpu.matmul %208, %210, %cst_77 {dimension_numbers = #tpu.dot_dimension_numbers<[1], [0], [0], [1], [0, 0, 1, 1], [], []>} : vector<48x32xbf16>, vector<32x96xbf16>, vector<48x96xf32> -> vector<48x96xf32>
    %c16 = arith.constant 16 : index
    %c0_78 = arith.constant 0 : index
    %212 = vector.load %arg1[%c16, %c0_78] : memref<20x128xf32, #tpu.memory_space<vmem>>, vector<1x96xf32>
    %213 = vector.broadcast %212 : vector<1x96xf32> to vector<48x96xf32>
    %214 = arith.addf %211, %213 : vector<48x96xf32>
    %cst_79 = arith.constant 0.000000e+00 : f32
    %215 = vector.broadcast %cst_79 : f32 to vector<48x32xf32>
    %216 = vector.extract_strided_slice %214 {offsets = [0, 0], sizes = [48, 16], strides = [1, 1]} : vector<48x96xf32> to vector<48x16xf32>
    %217 = arith.truncf %216 : vector<48x16xf32> to vector<48x16xbf16>
    %218 = vector.extract_strided_slice %214 {offsets = [0, 32], sizes = [48, 16], strides = [1, 1]} : vector<48x96xf32> to vector<48x16xf32>
    %219 = arith.truncf %218 : vector<48x16xf32> to vector<48x16xbf16>
    %220 = vector.extract_strided_slice %214 {offsets = [0, 64], sizes = [48, 16], strides = [1, 1]} : vector<48x96xf32> to vector<48x16xf32>
    %221 = arith.truncf %220 : vector<48x16xf32> to vector<48x16xbf16>
    %cst_80 = arith.constant dense<0.000000e+00> : vector<48x48xf32>
    %222 = tpu.matmul %217, %219, %cst_80 {dimension_numbers = #tpu.dot_dimension_numbers<[1], [1], [0], [0], [0, 0, 1, 0], [], []>} : vector<48x16xbf16>, vector<48x16xbf16>, vector<48x48xf32> -> vector<48x48xf32>
    %cst_81 = arith.constant 2.500000e-01 : f32
    %223 = vector.broadcast %cst_81 : f32 to vector<48x48xf32>
    %224 = arith.mulf %222, %223 : vector<48x48xf32>
    %225 = arith.addf %224, %29 : vector<48x48xf32>
    %cst_82 = arith.constant dense<0xFF800000> : vector<48xf32>
    %226 = vector.multi_reduction <maximumf>, %225, %cst_82 [1] : vector<48x48xf32> to vector<48xf32>
    %227 = vector.shape_cast %226 : vector<48xf32> to vector<48x1xf32>
    %228 = vector.broadcast %227 : vector<48x1xf32> to vector<48x48xf32>
    %229 = arith.subf %225, %228 : vector<48x48xf32>
    %230 = math.exp %229 : vector<48x48xf32>
    %cst_83 = arith.constant dense<0.000000e+00> : vector<48xf32>
    %231 = vector.multi_reduction <add>, %230, %cst_83 [1] : vector<48x48xf32> to vector<48xf32>
    %232 = vector.shape_cast %231 : vector<48xf32> to vector<48x1xf32>
    %233 = tpu.reciprocal %232 {approx = true} : vector<48x1xf32> -> vector<48x1xf32>
    %234 = vector.broadcast %233 : vector<48x1xf32> to vector<48x48xf32>
    %235 = arith.mulf %230, %234 : vector<48x48xf32>
    %236 = arith.truncf %235 : vector<48x48xf32> to vector<48x48xbf16>
    %cst_84 = arith.constant dense<0.000000e+00> : vector<48x16xf32>
    %237 = tpu.matmul %236, %221, %cst_84 {dimension_numbers = #tpu.dot_dimension_numbers<[1], [0], [0], [1], [0, 0, 1, 1], [], []>} : vector<48x48xbf16>, vector<48x16xbf16>, vector<48x16xf32> -> vector<48x16xf32>
    %238 = arith.truncf %237 : vector<48x16xf32> to vector<48x16xbf16>
    %c2 = arith.constant 2 : index
    %c0_85 = arith.constant 0 : index
    %c0_86 = arith.constant 0 : index
    %239 = vector.load %arg3[%c2, %c0_85, %c0_86] : memref<4x16x32xbf16, #tpu.memory_space<vmem>>, vector<1x16x32xbf16>
    %240 = vector.shape_cast %239 : vector<1x16x32xbf16> to vector<16x32xbf16>
    %cst_87 = arith.constant dense<0.000000e+00> : vector<48x32xf32>
    %241 = tpu.matmul %238, %240, %cst_87 {dimension_numbers = #tpu.dot_dimension_numbers<[1], [0], [0], [1], [0, 0, 1, 1], [], []>} : vector<48x16xbf16>, vector<16x32xbf16>, vector<48x32xf32> -> vector<48x32xf32>
    %242 = arith.addf %215, %241 : vector<48x32xf32>
    %243 = vector.extract_strided_slice %214 {offsets = [0, 16], sizes = [48, 16], strides = [1, 1]} : vector<48x96xf32> to vector<48x16xf32>
    %244 = arith.truncf %243 : vector<48x16xf32> to vector<48x16xbf16>
    %245 = vector.extract_strided_slice %214 {offsets = [0, 48], sizes = [48, 16], strides = [1, 1]} : vector<48x96xf32> to vector<48x16xf32>
    %246 = arith.truncf %245 : vector<48x16xf32> to vector<48x16xbf16>
    %247 = vector.extract_strided_slice %214 {offsets = [0, 80], sizes = [48, 16], strides = [1, 1]} : vector<48x96xf32> to vector<48x16xf32>
    %248 = arith.truncf %247 : vector<48x16xf32> to vector<48x16xbf16>
    %cst_88 = arith.constant dense<0.000000e+00> : vector<48x48xf32>
    %249 = tpu.matmul %244, %246, %cst_88 {dimension_numbers = #tpu.dot_dimension_numbers<[1], [1], [0], [0], [0, 0, 1, 0], [], []>} : vector<48x16xbf16>, vector<48x16xbf16>, vector<48x48xf32> -> vector<48x48xf32>
    %cst_89 = arith.constant 2.500000e-01 : f32
    %250 = vector.broadcast %cst_89 : f32 to vector<48x48xf32>
    %251 = arith.mulf %249, %250 : vector<48x48xf32>
    %252 = arith.addf %251, %29 : vector<48x48xf32>
    %cst_90 = arith.constant dense<0xFF800000> : vector<48xf32>
    %253 = vector.multi_reduction <maximumf>, %252, %cst_90 [1] : vector<48x48xf32> to vector<48xf32>
    %254 = vector.shape_cast %253 : vector<48xf32> to vector<48x1xf32>
    %255 = vector.broadcast %254 : vector<48x1xf32> to vector<48x48xf32>
    %256 = arith.subf %252, %255 : vector<48x48xf32>
    %257 = math.exp %256 : vector<48x48xf32>
    %cst_91 = arith.constant dense<0.000000e+00> : vector<48xf32>
    %258 = vector.multi_reduction <add>, %257, %cst_91 [1] : vector<48x48xf32> to vector<48xf32>
    %259 = vector.shape_cast %258 : vector<48xf32> to vector<48x1xf32>
    %260 = tpu.reciprocal %259 {approx = true} : vector<48x1xf32> -> vector<48x1xf32>
    %261 = vector.broadcast %260 : vector<48x1xf32> to vector<48x48xf32>
    %262 = arith.mulf %257, %261 : vector<48x48xf32>
    %263 = arith.truncf %262 : vector<48x48xf32> to vector<48x48xbf16>
    %cst_92 = arith.constant dense<0.000000e+00> : vector<48x16xf32>
    %264 = tpu.matmul %263, %248, %cst_92 {dimension_numbers = #tpu.dot_dimension_numbers<[1], [0], [0], [1], [0, 0, 1, 1], [], []>} : vector<48x48xbf16>, vector<48x16xbf16>, vector<48x16xf32> -> vector<48x16xf32>
    %265 = arith.truncf %264 : vector<48x16xf32> to vector<48x16xbf16>
    %c3 = arith.constant 3 : index
    %c0_93 = arith.constant 0 : index
    %c0_94 = arith.constant 0 : index
    %266 = vector.load %arg3[%c3, %c0_93, %c0_94] : memref<4x16x32xbf16, #tpu.memory_space<vmem>>, vector<1x16x32xbf16>
    %267 = vector.shape_cast %266 : vector<1x16x32xbf16> to vector<16x32xbf16>
    %cst_95 = arith.constant dense<0.000000e+00> : vector<48x32xf32>
    %268 = tpu.matmul %265, %267, %cst_95 {dimension_numbers = #tpu.dot_dimension_numbers<[1], [0], [0], [1], [0, 0, 1, 1], [], []>} : vector<48x16xbf16>, vector<16x32xbf16>, vector<48x32xf32> -> vector<48x32xf32>
    %269 = arith.addf %242, %268 : vector<48x32xf32>
    %270 = arith.addf %185, %269 : vector<48x32xf32>
    %c17 = arith.constant 17 : index
    %c0_96 = arith.constant 0 : index
    %271 = vector.load %arg1[%c17, %c0_96] : memref<20x128xf32, #tpu.memory_space<vmem>>, vector<1x32xf32>
    %272 = vector.broadcast %271 : vector<1x32xf32> to vector<48x32xf32>
    %273 = arith.addf %270, %272 : vector<48x32xf32>
    %cst_97 = arith.constant dense<0.000000e+00> : vector<48xf32>
    %274 = vector.multi_reduction <add>, %273, %cst_97 [1] : vector<48x32xf32> to vector<48xf32>
    %275 = vector.shape_cast %274 : vector<48xf32> to vector<48x1xf32>
    %cst_98 = arith.constant 3.200000e+01 : f32
    %276 = vector.broadcast %cst_98 : f32 to vector<48x1xf32>
    %277 = arith.divf %275, %276 : vector<48x1xf32>
    %278 = vector.broadcast %277 : vector<48x1xf32> to vector<48x32xf32>
    %279 = arith.subf %273, %278 : vector<48x32xf32>
    %280 = arith.mulf %279, %279 : vector<48x32xf32>
    %cst_99 = arith.constant dense<0.000000e+00> : vector<48xf32>
    %281 = vector.multi_reduction <add>, %280, %cst_99 [1] : vector<48x32xf32> to vector<48xf32>
    %282 = vector.shape_cast %281 : vector<48xf32> to vector<48x1xf32>
    %cst_100 = arith.constant 3.200000e+01 : f32
    %283 = vector.broadcast %cst_100 : f32 to vector<48x1xf32>
    %284 = arith.divf %282, %283 : vector<48x1xf32>
    %cst_101 = arith.constant 9.99999974E-6 : f32
    %285 = vector.broadcast %cst_101 : f32 to vector<48x1xf32>
    %286 = arith.addf %284, %285 : vector<48x1xf32>
    %287 = math.rsqrt %286 : vector<48x1xf32>
    %288 = vector.broadcast %287 : vector<48x1xf32> to vector<48x32xf32>
    %289 = arith.mulf %279, %288 : vector<48x32xf32>
    %c14 = arith.constant 14 : index
    %c0_102 = arith.constant 0 : index
    %290 = vector.load %arg1[%c14, %c0_102] : memref<20x128xf32, #tpu.memory_space<vmem>>, vector<1x32xf32>
    %291 = vector.broadcast %290 : vector<1x32xf32> to vector<48x32xf32>
    %292 = arith.mulf %289, %291 : vector<48x32xf32>
    %c15 = arith.constant 15 : index
    %c0_103 = arith.constant 0 : index
    %293 = vector.load %arg1[%c15, %c0_103] : memref<20x128xf32, #tpu.memory_space<vmem>>, vector<1x32xf32>
    %294 = vector.broadcast %293 : vector<1x32xf32> to vector<48x32xf32>
    %295 = arith.addf %292, %294 : vector<48x32xf32>
    %296 = arith.truncf %295 : vector<48x32xf32> to vector<48x32xbf16>
    %c1_104 = arith.constant 1 : index
    %c0_105 = arith.constant 0 : index
    %c0_106 = arith.constant 0 : index
    %297 = vector.load %arg4[%c1_104, %c0_105, %c0_106] : memref<2x32x128xbf16, #tpu.memory_space<vmem>>, vector<1x32x128xbf16>
    %298 = vector.shape_cast %297 : vector<1x32x128xbf16> to vector<32x128xbf16>
    %cst_107 = arith.constant dense<0.000000e+00> : vector<48x128xf32>
    %299 = tpu.matmul %296, %298, %cst_107 {dimension_numbers = #tpu.dot_dimension_numbers<[1], [0], [0], [1], [0, 0, 1, 1], [], []>} : vector<48x32xbf16>, vector<32x128xbf16>, vector<48x128xf32> -> vector<48x128xf32>
    %c18 = arith.constant 18 : index
    %c0_108 = arith.constant 0 : index
    %300 = vector.load %arg1[%c18, %c0_108] : memref<20x128xf32, #tpu.memory_space<vmem>>, vector<1x128xf32>
    %301 = vector.broadcast %300 : vector<1x128xf32> to vector<48x128xf32>
    %302 = arith.addf %299, %301 : vector<48x128xf32>
    %cst_109 = arith.constant 5.000000e-01 : f32
    %303 = vector.broadcast %cst_109 : f32 to vector<48x128xf32>
    %304 = arith.mulf %303, %302 : vector<48x128xf32>
    %cst_110 = arith.constant 0.707106769 : f32
    %305 = vector.broadcast %cst_110 : f32 to vector<48x128xf32>
    %306 = arith.mulf %302, %305 : vector<48x128xf32>
    %307 = math.erf %306 : vector<48x128xf32>
    %cst_111 = arith.constant 1.000000e+00 : f32
    %308 = vector.broadcast %cst_111 : f32 to vector<48x128xf32>
    %309 = arith.addf %308, %307 : vector<48x128xf32>
    %310 = arith.mulf %304, %309 : vector<48x128xf32>
    %311 = arith.truncf %310 : vector<48x128xf32> to vector<48x128xbf16>
    %c1_112 = arith.constant 1 : index
    %c0_113 = arith.constant 0 : index
    %c0_114 = arith.constant 0 : index
    %312 = vector.load %arg5[%c1_112, %c0_113, %c0_114] : memref<2x128x32xbf16, #tpu.memory_space<vmem>>, vector<1x128x32xbf16>
    %313 = vector.shape_cast %312 : vector<1x128x32xbf16> to vector<128x32xbf16>
    %cst_115 = arith.constant dense<0.000000e+00> : vector<48x32xf32>
    %314 = tpu.matmul %311, %313, %cst_115 {dimension_numbers = #tpu.dot_dimension_numbers<[1], [0], [0], [1], [0, 0, 1, 1], [], []>} : vector<48x128xbf16>, vector<128x32xbf16>, vector<48x32xf32> -> vector<48x32xf32>
    %c19 = arith.constant 19 : index
    %c0_116 = arith.constant 0 : index
    %315 = vector.load %arg1[%c19, %c0_116] : memref<20x128xf32, #tpu.memory_space<vmem>>, vector<1x32xf32>
    %316 = vector.broadcast %315 : vector<1x32xf32> to vector<48x32xf32>
    %317 = arith.addf %314, %316 : vector<48x32xf32>
    %318 = arith.addf %273, %317 : vector<48x32xf32>
    %cst_117 = arith.constant dense<0.000000e+00> : vector<48xf32>
    %319 = vector.multi_reduction <add>, %318, %cst_117 [1] : vector<48x32xf32> to vector<48xf32>
    %320 = vector.shape_cast %319 : vector<48xf32> to vector<48x1xf32>
    %cst_118 = arith.constant 3.200000e+01 : f32
    %321 = vector.broadcast %cst_118 : f32 to vector<48x1xf32>
    %322 = arith.divf %320, %321 : vector<48x1xf32>
    %323 = vector.broadcast %322 : vector<48x1xf32> to vector<48x32xf32>
    %324 = arith.subf %318, %323 : vector<48x32xf32>
    %325 = arith.mulf %324, %324 : vector<48x32xf32>
    %cst_119 = arith.constant dense<0.000000e+00> : vector<48xf32>
    %326 = vector.multi_reduction <add>, %325, %cst_119 [1] : vector<48x32xf32> to vector<48xf32>
    %327 = vector.shape_cast %326 : vector<48xf32> to vector<48x1xf32>
    %cst_120 = arith.constant 3.200000e+01 : f32
    %328 = vector.broadcast %cst_120 : f32 to vector<48x1xf32>
    %329 = arith.divf %327, %328 : vector<48x1xf32>
    %cst_121 = arith.constant 9.99999974E-6 : f32
    %330 = vector.broadcast %cst_121 : f32 to vector<48x1xf32>
    %331 = arith.addf %329, %330 : vector<48x1xf32>
    %332 = math.rsqrt %331 : vector<48x1xf32>
    %333 = vector.broadcast %332 : vector<48x1xf32> to vector<48x32xf32>
    %334 = arith.mulf %324, %333 : vector<48x32xf32>
    %c2_122 = arith.constant 2 : index
    %c0_123 = arith.constant 0 : index
    %335 = vector.load %arg1[%c2_122, %c0_123] : memref<20x128xf32, #tpu.memory_space<vmem>>, vector<1x32xf32>
    %336 = vector.broadcast %335 : vector<1x32xf32> to vector<48x32xf32>
    %337 = arith.mulf %334, %336 : vector<48x32xf32>
    %c3_124 = arith.constant 3 : index
    %c0_125 = arith.constant 0 : index
    %338 = vector.load %arg1[%c3_124, %c0_125] : memref<20x128xf32, #tpu.memory_space<vmem>>, vector<1x32xf32>
    %339 = vector.broadcast %338 : vector<1x32xf32> to vector<48x32xf32>
    %340 = arith.addf %337, %339 : vector<48x32xf32>
    %c0_126 = arith.constant 0 : index
    %c0_127 = arith.constant 0 : index
    %341 = vector.load %arg6[%c0_126, %c0_127] : memref<48x32xf32, #tpu.memory_space<vmem>>, vector<48x32xf32>
    tpu.vector_store %arg6[%c0_126, %c0_127], %340 {strides = array<i32>} : memref<48x32xf32, #tpu.memory_space<vmem>>, vector<48x32xf32>,
    return
  }
}

</mosaic_0001>

<bundles_post_ra>
// kernel: decision_transformer_forward.1
= control target key start
LH: loop header
LB: loop body
LE: loop exit
PB: predicated region body
PF: predicated region fallthrough
CT: control target
= control target key end

     0   :  { %vm117_vm0 = vcmask 261120   ;;  %v3344_v12 = vmov 32.0   ;;  %s3345_s22 = smov 96   ;;  %s3346_s23 = smov 80   ;;  %s4783_s0 = inlined_call_operand.vmem [shape: f32[48,32], index: 0, kind: input, shape index: {}]   ;;  %s4784_s1 = inlined_call_operand.vmem [shape: f32[20,128], index: 1, kind: input, shape index: {}]   ;;  %s4785_s2 = inlined_call_operand.vmem [shape: bf16[2,32,96], index: 2, kind: input, shape index: {}]   ;;  %s4786_s3 = inlined_call_operand.vmem [shape: bf16[4,16,32], index: 3, kind: input, shape index: {}]   ;;  %s4787_s4 = inlined_call_operand.vmem [shape: bf16[2,32,128], index: 4, kind: input, shape index: {}]   ;;  %s4788_s5 = inlined_call_operand.vmem [shape: bf16[2,128,32], index: 5, kind: input, shape index: {}]   ;;  %s4789_s6 = inlined_call_operand.vmem [shape: f32[48,32], index: 6, kind: output, shape index: {}]  }
   0x1   :  { %v115_v0 = vld [vmem:[%s4783_s0 + $0x20] sm:$0xff]  ;;  %v113_v1 = vld [vmem:[%s4783_s0 + $0x10] sm:$0xff]  ;;  %v116_v6 = vld [vmem:[%s4783_s0 + $0x28] sm:$0xff]  ;;  %3150 = vrcp.f32 %v3344_v12  ;;  %s3347_s24 = smov 112   ;;  %s3349_s25 = smov 64  }
   0x2   :  { %v111_v2 = vld [vmem:[%s4783_s0] sm:$0xff]  ;;  %v130_v3 = vsel %vm117_vm0, %v115_v0, 0.0  ;;  %v124_v4 = vsel %vm117_vm0, %v113_v1, 0.0  ;;  %v114_v7 = vld [vmem:[%s4783_s0 + $0x18] sm:$0xff]  ;;  %v112_v8 = vld [vmem:[%s4783_s0 + $0x8] sm:$0xff]  ;;  %v133_v9 = vsel %vm117_vm0, %v116_v6, 0.0 }
   0x3   :  { %v118_v5 = vsel %vm117_vm0, %v111_v2, 0.0  ;;  %131 = vadd.xlane.f32.xlu1 %v130_v3  ;;  %125 = vadd.xlane.f32.xlu0 %v124_v4  ;;  %v127_v10 = vsel %vm117_vm0, %v114_v7, 0.0  ;;  %v121_v11 = vsel %vm117_vm0, %v112_v8, 0.0  ;;  %s3350_s26 = smov 48  }
   0x4   :  { %119 = vadd.xlane.f32.xlu2 %v118_v5 }
   0x7   :  { %v3151_v13 = vpop.eup %3150 }
   0x8   :  { %v137_v14 = vmul.f32 32.0, %v3151_v13  ;;  %vm141_vm1 = vweird.f32 %v3151_v13 }
   0xa   :  { %v138_v15 = vsub.f32 1.0, %v137_v14 }
   0xb   :  { %134 = vadd.xlane.f32.xlu1 %v133_v9  ;;  %128 = vadd.xlane.f32.xlu0 %v127_v10 }
   0xc   :  { %122 = vadd.xlane.f32.xlu2 %v121_v11  ;;  %v139_v16 = vmul.f32 %v3151_v13, %v138_v15 }
   0xe   :  { %v140_v17 = vadd.f32 %v3151_v13, %v139_v16 }
  0x10   :  { %v3410_v18 = vsel %vm141_vm1, %v3151_v13, %v140_v17 }
  0x76   :  { %v132_v19 = vpop.xlane.xlu1 %131  ;;  %v126_v20 = vpop.xlane.xlu0 %125 }
  0x77   :  { %v147_v21 = vmul.f32 %v3410_v18, %v132_v19  ;;  %v145_v22 = vmul.f32 %v3410_v18, %v126_v20  ;;  %v120_v23 = vpop.xlane.xlu2 %119 }
  0x78   :  { %v143_v28 = vmul.f32 %v3410_v18, %v120_v23 }
  0x79   :  { %v3414_v24 = vsub.f32 %v115_v0, %v147_v21  ;;  %v3416_v25 = vsub.f32 %v113_v1, %v145_v22  ;;  %v3461_v22 = vld [vmem:[%s4784_s1] ss:$0 sm:$0xff] }
  0x7a   :  { %v3428_v37 = vsub.f32 %v111_v2, %v143_v28 }
  0x7b   :  { %v157_v26 = vmul.f32 %v3416_v25, %v3416_v25  ;;  %v159_v27 = vmul.f32 %v3414_v24, %v3414_v24 }
  0x7c   :  { %v155_v46 = vmul.f32 %v3428_v37, %v3428_v37 }
  0x7d   :  { %v167_v29 = vsel %vm117_vm0, %v157_v26, 0.0  ;;  %v173_v30 = vsel %vm117_vm0, %v159_v27, 0.0 }
  0x7e   :  { %v135_v31 = vpop.xlane.xlu1 %134  ;;  %168 = vadd.xlane.f32.xlu0 %v167_v29  ;;  %v129_v32 = vpop.xlane.xlu0 %128  ;;  %174 = vadd.xlane.f32.xlu2 %v173_v30  ;;  %v161_v48 = vsel %vm117_vm0, %v155_v46, 0.0 }
  0x7f   :  { %v148_v33 = vmul.f32 %v3410_v18, %v135_v31  ;;  %v146_v34 = vmul.f32 %v3410_v18, %v129_v32  ;;  %v123_v35 = vpop.xlane.xlu2 %122  ;;  %v3131_v31 = vld [vmem:[%s4784_s1 + $0x1] ss:$0 sm:$0xff] }
  0x80   :  { %v144_v36 = vmul.f32 %v3410_v18, %v123_v35 }
  0x81   :  { %v3430_v38 = vsub.f32 %v116_v6, %v148_v33  ;;  %v3432_v39 = vsub.f32 %v114_v7, %v146_v34 }
  0x82   :  { %v3434_v40 = vsub.f32 %v112_v8, %v144_v36 }
  0x83   :  { %v160_v41 = vmul.f32 %v3430_v38, %v3430_v38  ;;  %v158_v42 = vmul.f32 %v3432_v39, %v3432_v39 }
  0x84   :  { %v156_v43 = vmul.f32 %v3434_v40, %v3434_v40 }
  0x85   :  { %v176_v44 = vsel %vm117_vm0, %v160_v41, 0.0  ;;  %v170_v45 = vsel %vm117_vm0, %v158_v42, 0.0 }
  0x86   :  { %177 = vadd.xlane.f32.xlu0 %v176_v44  ;;  %171 = vadd.xlane.f32.xlu1 %v170_v45  ;;  %v164_v47 = vsel %vm117_vm0, %v156_v43, 0.0 }
  0x87   :  { %165 = vadd.xlane.f32.xlu2 %v164_v47 }
  0x8e   :  { %162 = vadd.xlane.f32.xlu1 %v161_v48 }
  0xf1   :  { %v169_v49 = vpop.xlane.xlu0 %168  ;;  %v175_v50 = vpop.xlane.xlu2 %174 }
  0xf2   :  { %v181_v51 = vmul.f32 %v169_v49, %v3410_v18  ;;  %v183_v52 = vmul.f32 %v175_v50, %v3410_v18 }
  0xf4   :  { %v187_v53 = vadd.f32 1e-05, %v181_v51  ;;  %v189_v54 = vadd.f32 1e-05, %v183_v52 }
  0xf6   :  { %3152 = vrsqrt.f32 %v187_v53  ;;  %vm237_vm2 = vweird.f32 %v189_v54  ;;  %vm217_vm5 = vweird.f32 %v187_v53 }
  0xf7   :  { %3154 = vrsqrt.f32 %v189_v54 }
  0xf9   :  { %v172_v55 = vpop.xlane.xlu1 %171  ;;  %v178_v56 = vpop.xlane.xlu0 %177 }
  0xfa   :  { %v182_v57 = vmul.f32 %v172_v55, %v3410_v18  ;;  %v184_v58 = vmul.f32 %v178_v56, %v3410_v18  ;;  %v166_v59 = vpop.xlane.xlu2 %165 }
  0xfb   :  { %v180_v60 = vmul.f32 %v166_v59, %v3410_v18 }
  0xfc   :  { %v3153_v61 = vpop.eup %3152  ;;  %v188_v62 = vadd.f32 1e-05, %v182_v57  ;;  %v190_v63 = vadd.f32 1e-05, %v184_v58 }
  0xfd   :  { %v3155_v0 = vpop.eup %3154  ;;  %v212_v1 = vmul.f32 %v3153_v61, %v187_v53  ;;  %v186_v2 = vadd.f32 1e-05, %v180_v60  ;;  %vm218_vm4 = vweird.f32 %v3153_v61 }
  0xfe   :  { %v232_v3 = vmul.f32 %v3155_v0, %v189_v54  ;;  %3156 = vrsqrt.f32 %v188_v62  ;;  %vm238_vm3 = vweird.f32 %v3155_v0  ;;  %vm219_vm7 = vmor %vm217_vm5, %vm218_vm4  ;;  %vm227_vm8 = vweird.f32 %v188_v62 }
  0xff   :  { %v213_v4 = vmul.f32 %v3153_v61, %v212_v1  ;;  %3158 = vrsqrt.f32 %v190_v63  ;;  %vm3454_vm6 = vmor %vm237_vm2, %vm238_vm3  ;;  %vm247_vm9 = vweird.f32 %v190_v63  ;;  %vm207_vm12 = vweird.f32 %v186_v2 }
 0x100   :  { %v233_v5 = vmul.f32 %v3155_v0, %v232_v3  ;;  %3160 = vrsqrt.f32 %v186_v2 }
 0x101   :  { %v214_v6 = vmul.f32 0.5, %v213_v4  ;;  %v163_v7 = vpop.xlane.xlu1 %162 }
 0x102   :  { %v234_v8 = vmul.f32 0.5, %v233_v5  ;;  %v179_v9 = vmul.f32 %v163_v7, %v3410_v18 }
 0x103   :  { %v215_v10 = vsub.f32 1.5, %v214_v6 }
 0x104   :  { %v3157_v11 = vpop.eup %3156  ;;  %v235_v12 = vsub.f32 1.5, %v234_v8  ;;  %v185_v13 = vadd.f32 1e-05, %v179_v9 }
 0x105   :  { %v3159_v14 = vpop.eup %3158  ;;  %v216_v15 = vmul.f32 %v3153_v61, %v215_v10  ;;  %v222_v17 = vmul.f32 %v3157_v11, %v188_v62  ;;  %vm228_vm10 = vweird.f32 %v3157_v11 }
 0x106   :  { %v3161_v19 = vpop.eup %3160  ;;  %v236_v20 = vmul.f32 %v3155_v0, %v235_v12  ;;  %v242_v21 = vmul.f32 %v3159_v14, %v190_v63  ;;  %3162 = vrsqrt.f32 %v185_v13  ;;  %vm248_vm11 = vweird.f32 %v3159_v14  ;;  %vm3473_vm14 = vmor %vm227_vm8, %vm228_vm10 }
 0x107   :  { %v220_v23 = vsel %vm219_vm7, %v3153_v61, %v216_v15  ;;  %v223_v26 = vmul.f32 %v3157_v11, %v222_v17  ;;  %v202_v27 = vmul.f32 %v3161_v19, %v186_v2  ;;  %vm208_vm13 = vweird.f32 %v3161_v19  ;;  %vm3480_vm15 = vmor %vm247_vm9, %vm248_vm11 }
 0x108   :  { %v240_v28 = vsel %vm3454_vm6, %v3155_v0, %v236_v20  ;;  %v243_v29 = vmul.f32 %v3159_v14, %v242_v21  ;;  %v253_v30 = vmul.f32 %v220_v23, %v3416_v25  ;;  %vm3485_vm1 = vmor %vm207_vm12, %vm208_vm13  ;;  %vm197_vm2 = vweird.f32 %v185_v13 }
 0x109   :  { %v224_v32 = vmul.f32 0.5, %v223_v26  ;;  %v203_v33 = vmul.f32 %v3161_v19, %v202_v27  ;;  %v255_v34 = vmul.f32 %v240_v28, %v3414_v24 }
 0x10a   :  { %v244_v35 = vmul.f32 0.5, %v243_v29  ;;  %v261_v36 = vmul.f32 %v3461_v22, %v253_v30 }
 0x10b   :  { %v225_v41 = vsub.f32 1.5, %v224_v32  ;;  %v204_v42 = vmul.f32 0.5, %v203_v33  ;;  %v263_v43 = vmul.f32 %v3461_v22, %v255_v34 }
 0x10c   :  { %v3163_v25 = vpop.eup %3162  ;;  %v245_v45 = vsub.f32 1.5, %v244_v35  ;;  %v3477_v46 = vadd.f32 %v3131_v31, %v261_v36 }
 0x10d   :  { %v226_v24 = vmul.f32 %v3157_v11, %v225_v41  ;;  %v205_v48 = vsub.f32 1.5, %v204_v42  ;;  %v192_v49 = vmul.f32 %v3163_v25, %v185_v13  ;;  %v3491_v53 = vadd.f32 %v3131_v31, %v263_v43 }
 0x10e   :  { %v246_v50 = vmul.f32 %v3159_v14, %v245_v45  ;;  %v279_v52 = vsel %vm117_vm0, %v3477_v46, 0.0  ;;  %vm198_vm3 = vweird.f32 %v3163_v25 }
 0x10f   :  { %v230_v54 = vsel %vm3473_vm14, %v3157_v11, %v226_v24  ;;  %v206_v55 = vmul.f32 %v3161_v19, %v205_v48  ;;  %v193_v56 = vmul.f32 %v3163_v25, %v192_v49  ;;  %280 = vadd.xlane.f32.xlu0 %v279_v52  ;;  %v285_v58 = vsel %vm117_vm0, %v3491_v53, 0.0  ;;  %vm199_vm4 = vmor %vm197_vm2, %vm198_vm3 }
 0x110   :  { %v250_v57 = vsel %vm3480_vm15, %v3159_v14, %v246_v50  ;;  %v254_v59 = vmul.f32 %v230_v54, %v3432_v39  ;;  %286 = vadd.xlane.f32.xlu2 %v285_v58  ;;  %v3088_v50 = vld [vmem:[%s4785_s2 + $0x8] sm:$0xff] }
 0x111   :  { %v210_v60 = vsel %vm3485_vm1, %v3161_v19, %v206_v55  ;;  %v194_v61 = vmul.f32 0.5, %v193_v56  ;;  %v256_v62 = vmul.f32 %v250_v57, %v3430_v38  ;;  %3115 = vmatpush.bf16.msra.mxu3 %v3088_v50  ;;  %457 = vmatpush.bf16.msra.mxu0 %v3088_v50  ;;  %v3087_v55 = vld [vmem:[%s4785_s2] sm:$0xff] }
 0x112   :  { %v262_v63 = vmul.f32 %v3461_v22, %v254_v59  ;;  %v252_v0 = vmul.f32 %v210_v60, %v3434_v40 }
 0x113   :  { %v195_v1 = vsub.f32 1.5, %v194_v61  ;;  %v264_v2 = vmul.f32 %v3461_v22, %v256_v62 }
 0x114   :  { %v3506_v3 = vadd.f32 %v3131_v31, %v262_v63  ;;  %v260_v39 = vmul.f32 %v3461_v22, %v252_v0 }
 0x115   :  { %v196_v4 = vmul.f32 %v3163_v25, %v195_v1  ;;  %v3509_v5 = vadd.f32 %v3131_v31, %v264_v2  ;;  %3116 = vmatpush.bf16.msra.mxu3 %v3087_v55  ;;  %458 = vmatpush.bf16.msra.mxu0 %v3087_v55 }
 0x116   :  { %v282_v6 = vsel %vm117_vm0, %v3506_v3, 0.0  ;;  %v3513_v7 = vadd.f32 %v3131_v31, %v260_v39 }
 0x117   :  { %v200_v38 = vsel %vm199_vm4, %v3163_v25, %v196_v4  ;;  %v288_v40 = vsel %vm117_vm0, %v3509_v5, 0.0  ;;  %283 = vadd.xlane.f32.xlu1 %v282_v6 }
 0x118   :  { %289 = vadd.xlane.f32.xlu0 %v288_v40  ;;  %v276_v8 = vsel %vm117_vm0, %v3513_v7, 0.0  ;;  %v251_v9 = vmul.f32 %v200_v38, %v3428_v37 }
 0x119   :  { %277 = vadd.xlane.f32.xlu2 %v276_v8 }
 0x11a   :  { %v259_v10 = vmul.f32 %v3461_v22, %v251_v9 }
 0x11c   :  { %v3521_v11 = vadd.f32 %v3131_v31, %v259_v10 }
 0x11e   :  { %v273_v12 = vsel %vm117_vm0, %v3521_v11, 0.0 }
 0x11f   :  { %274 = vadd.xlane.f32.xlu1 %v273_v12 }
 0x182   :  { %v281_v13 = vpop.xlane.xlu0 %280 }
 0x183   :  { %v293_v14 = vmul.f32 %v281_v13, %v3410_v18  ;;  %v287_v15 = vpop.xlane.xlu2 %286 }
 0x184   :  { %v295_v17 = vmul.f32 %v287_v15, %v3410_v18 }
 0x185   :  { %v3527_v16 = vsub.f32 %v3477_v46, %v293_v14 }
 0x186   :  { %v3531_v37 = vsub.f32 %v3491_v53, %v295_v17 }
 0x187   :  { %v305_v19 = vmul.f32 %v3527_v16, %v3527_v16 }
 0x188   :  { %v307_v21 = vmul.f32 %v3531_v37, %v3531_v37 }
 0x189   :  { %v315_v20 = vsel %vm117_vm0, %v305_v19, 0.0 }
 0x18a   :  { %316 = vadd.xlane.f32.xlu0 %v315_v20  ;;  %v284_v22 = vpop.xlane.xlu1 %283  ;;  %v321_v27 = vsel %vm117_vm0, %v307_v21, 0.0 }
 0x18b   :  { %v290_v23 = vpop.xlane.xlu0 %289  ;;  %v294_v26 = vmul.f32 %v284_v22, %v3410_v18  ;;  %322 = vadd.xlane.f32.xlu2 %v321_v27 }
 0x18c   :  { %v296_v28 = vmul.f32 %v290_v23, %v3410_v18  ;;  %v278_v29 = vpop.xlane.xlu2 %277 }
 0x18d   :  { %v3542_v30 = vsub.f32 %v3506_v3, %v294_v26  ;;  %v292_v31 = vmul.f32 %v278_v29, %v3410_v18 }
 0x18e   :  { %v3546_v32 = vsub.f32 %v3509_v5, %v296_v28 }
 0x18f   :  { %v3549_v33 = vsub.f32 %v3513_v7, %v292_v31  ;;  %v306_v34 = vmul.f32 %v3542_v30, %v3542_v30 }
 0x190   :  { %v308_v35 = vmul.f32 %v3546_v32, %v3546_v32 }
 0x191   :  { %v318_v36 = vsel %vm117_vm0, %v306_v34, 0.0  ;;  %v304_v41 = vmul.f32 %v3549_v33, %v3549_v33 }
 0x192   :  { %v324_v42 = vsel %vm117_vm0, %v308_v35, 0.0  ;;  %319 = vadd.xlane.f32.xlu1 %v318_v36  ;;  %v275_v43 = vpop.xlane.xlu1 %274 }
 0x193   :  { %325 = vadd.xlane.f32.xlu0 %v324_v42  ;;  %v291_v25 = vmul.f32 %v275_v43, %v3410_v18  ;;  %v312_v44 = vsel %vm117_vm0, %v304_v41, 0.0  ;;  %v3132_v43 = vld [vmem:[%s4784_s1 + $0x4] ss:$0 sm:$0xff] }
 0x194   :  { %313 = vadd.xlane.f32.xlu2 %v312_v44 }
 0x195   :  { %v3562_v45 = vsub.f32 %v3521_v11, %v291_v25 }
 0x197   :  { %v303_v24 = vmul.f32 %v3562_v45, %v3562_v45 }
 0x199   :  { %v309_v47 = vsel %vm117_vm0, %v303_v24, 0.0 }
 0x19a   :  { %310 = vadd.xlane.f32.xlu1 %v309_v47 }
 0x1fd   :  { %v317_v48 = vpop.xlane.xlu0 %316 }
 0x1fe   :  { %v329_v49 = vmul.f32 %v317_v48, %v3410_v18  ;;  %v323_v51 = vpop.xlane.xlu2 %322 }
 0x1ff   :  { %v331_v54 = vmul.f32 %v323_v51, %v3410_v18 }
 0x200   :  { %v335_v52 = vadd.f32 1e-05, %v329_v49 }
 0x201   :  { %v3575_v56 = vadd.f32 1e-05, %v331_v54 }
 0x202   :  { %3164 = vrsqrt.f32 %v335_v52  ;;  %vm365_vm6 = vweird.f32 %v335_v52 }
 0x203   :  { %3166 = vrsqrt.f32 %v3575_v56 }
 0x205   :  { %v320_v57 = vpop.xlane.xlu1 %319 }
 0x206   :  { %v326_v58 = vpop.xlane.xlu0 %325  ;;  %v330_v59 = vmul.f32 %v320_v57, %v3410_v18 }
 0x207   :  { %v332_v60 = vmul.f32 %v326_v58, %v3410_v18  ;;  %v314_v61 = vpop.xlane.xlu2 %313 }
 0x208   :  { %v3165_v62 = vpop.eup %3164  ;;  %v336_v63 = vadd.f32 1e-05, %v330_v59  ;;  %v328_v0 = vmul.f32 %v314_v61, %v3410_v18 }
 0x209   :  { %v360_v1 = vmul.f32 %v3165_v62, %v335_v52  ;;  %v3581_v2 = vadd.f32 1e-05, %v332_v60  ;;  %v3584_v6 = vpop.eup %3166  ;;  %vm366_vm5 = vweird.f32 %v3165_v62  ;;  %v3133_v52 = vld [vmem:[%s4784_s1 + $0x5] ss:$0 sm:$0xff] }
 0x20a   :  { %3168 = vrsqrt.f32 %v336_v63  ;;  %v334_v39 = vadd.f32 1e-05, %v328_v0  ;;  %v380_v12 = vmul.f32 %v3584_v6, %v3575_v56  ;;  %vm367_vm7 = vmor %vm365_vm6, %vm366_vm5  ;;  %vm375_vm9 = vweird.f32 %v336_v63 }
 0x20b   :  { %v361_v4 = vmul.f32 %v3165_v62, %v360_v1  ;;  %3170 = vrsqrt.f32 %v3581_v2  ;;  %vm395_vm1 = vweird.f32 %v3581_v2  ;;  %vm386_vm2 = vweird.f32 %v3584_v6 }
 0x20c   :  { %3172 = vrsqrt.f32 %v334_v39  ;;  %v381_v23 = vmul.f32 %v3584_v6, %v380_v12  ;;  %vm355_vm12 = vweird.f32 %v334_v39  ;;  %vm385_vm6 = vweird.f32 %v3575_v56 }
 0x20d   :  { %v362_v38 = vmul.f32 0.5, %v361_v4  ;;  %v311_v40 = vpop.xlane.xlu1 %310 }
 0x20e   :  { %v327_v8 = vmul.f32 %v311_v40, %v3410_v18  ;;  %v382_v42 = vmul.f32 0.5, %v381_v23 }
 0x20f   :  { %v363_v9 = vsub.f32 1.5, %v362_v38 }
 0x210   :  { %v3169_v10 = vpop.eup %3168  ;;  %v333_v13 = vadd.f32 1e-05, %v327_v8  ;;  %v383_v54 = vsub.f32 1.5, %v382_v42 }
 0x211   :  { %v3589_v14 = vpop.eup %3170  ;;  %v364_v15 = vmul.f32 %v3165_v62, %v363_v9  ;;  %v370_v17 = vmul.f32 %v3169_v10, %v336_v63  ;;  %vm376_vm8 = vweird.f32 %v3169_v10 }
 0x212   :  { %v3173_v19 = vpop.eup %3172  ;;  %v390_v20 = vmul.f32 %v3589_v14, %v3581_v2  ;;  %3174 = vrsqrt.f32 %v333_v13  ;;  %vm377_vm11 = vmor %vm375_vm9, %vm376_vm8  ;;  %vm396_vm14 = vweird.f32 %v3589_v14  ;;  %v384_v63 = vmul.f32 %v3584_v6, %v383_v54 }
 0x213   :  { %v371_v21 = vmul.f32 %v3169_v10, %v370_v17  ;;  %v350_v22 = vmul.f32 %v3173_v19, %v334_v39  ;;  %v368_v27 = vsel %vm367_vm7, %v3165_v62, %v364_v15  ;;  %vm356_vm10 = vweird.f32 %v3173_v19  ;;  %vm397_vm3 = vmor %vm395_vm1, %vm396_vm14 }
 0x214   :  { %v391_v26 = vmul.f32 %v3589_v14, %v390_v20  ;;  %v401_v41 = vmul.f32 %v368_v27, %v3527_v16  ;;  %vm357_vm13 = vmor %vm355_vm12, %vm356_vm10  ;;  %vm345_vm4 = vweird.f32 %v333_v13  ;;  %vm487_vm8 = vcmask 130048  }
 0x215   :  { %v372_v28 = vmul.f32 0.5, %v371_v21  ;;  %v351_v29 = vmul.f32 %v3173_v19, %v350_v22  ;;  %vm387_vm7 = vmor %vm385_vm6, %vm386_vm2  ;;  %vm542_vm12 = vcmask 392192  }
 0x216   :  { %v392_v31 = vmul.f32 0.5, %v391_v26  ;;  %v409_v16 = vmul.f32 %v3132_v43, %v401_v41  ;;  %v388_v38 = vsel %vm387_vm7, %v3584_v6, %v384_v63 }
 0x217   :  { %v373_v34 = vsub.f32 1.5, %v372_v28  ;;  %v352_v35 = vmul.f32 0.5, %v351_v29  ;;  %v403_v9 = vmul.f32 %v388_v38, %v3531_v37 }
 0x218   :  { %v3175_v36 = vpop.eup %3174  ;;  %v393_v47 = vsub.f32 1.5, %v392_v31  ;;  %v417_v61 = vadd.f32 %v3133_v52, %v409_v16 }
 0x219   :  { %v374_v25 = vmul.f32 %v3169_v10, %v373_v34  ;;  %v353_v44 = vsub.f32 1.5, %v352_v35  ;;  %v340_v24 = vmul.f32 %v3175_v36, %v333_v13  ;;  %vm346_vm15 = vweird.f32 %v3175_v36 }
 0x21a   :  { %v394_v59 = vmul.f32 %v3589_v14, %v393_v47  ;;  %vm347_vm5 = vmor %vm345_vm4, %vm346_vm15 }
 0x21b   :  { %v378_v48 = vsel %vm377_vm11, %v3169_v10, %v374_v25  ;;  %v354_v49 = vmul.f32 %v3173_v19, %v353_v44  ;;  %v341_v50 = vmul.f32 %v3175_v36, %v340_v24 }
 0x21c   :  { %v402_v51 = vmul.f32 %v378_v48, %v3542_v30  ;;  %v398_v39 = vsel %vm397_vm3, %v3589_v14, %v394_v59  ;;  %v411_v14 = vmul.f32 %v3132_v43, %v403_v9 }
 0x21d   :  { %v358_v55 = vsel %vm357_vm13, %v3173_v19, %v354_v49  ;;  %v342_v57 = vmul.f32 0.5, %v341_v50  ;;  %v404_v40 = vmul.f32 %v398_v39, %v3546_v32  ;;  %v3134_v32 = vld [vmem:[%s4784_s1 + $0x8] ss:$0 sm:$0xff] }
 0x21e   :  { %v410_v58 = vmul.f32 %v3132_v43, %v402_v51  ;;  %v400_v30 = vmul.f32 %v358_v55, %v3549_v33  ;;  %v419_v17 = vadd.f32 %v3133_v52, %v411_v14 }
 0x21f   :  { %v343_v60 = vsub.f32 1.5, %v342_v57  ;;  %v412_v56 = vmul.f32 %v3132_v43, %v404_v40  ;;  %v24_v57 = vlaneseq }
 0x220   :  { %v418_v62 = vadd.f32 %v3133_v52, %v410_v58  ;;  %v408_v33 = vmul.f32 %v3132_v43, %v400_v30 }
 0x221   :  { %v344_v0 = vmul.f32 %v3175_v36, %v343_v60  ;;  %v420_v15 = vadd.f32 %v3133_v52, %v412_v56  ;;  %v3660_v58 = vshrl.u32 %v24_v57, 7  ;;  %v3662_v59 = vand.u32 127, %v24_v57 }
 0x222   :  { %v422_v1 = vpack.c.bf16 %v418_v62, %v417_v61  ;;  %v416_v12 = vadd.f32 %v3133_v52, %v408_v33  ;;  %v3348_v61 = vmov -1e+30  }
 0x223   :  { %v348_v4 = vsel %vm347_vm5, %v3175_v36, %v344_v0  ;;  %vm52_vm9 = vcmp.lt.s32.totalorder %v3662_v59, 24  ;;  %vm93_vm10 = vcmp.le.s32.totalorder %v3662_v59, %v3660_v58  ;;  %v26_v60 = vadd.s32 8, %v3660_v58 }
 0x224   :  { %v399_v2 = vmul.f32 %v348_v4, %v3562_v45  ;;  %2894 = vmatmul.msk.bf16.vlgmr.msra.gmra.mxu3 %vm117_vm0, %v422_v1  ;;  %v423_v45 = vpack.c.bf16 %v420_v15, %v419_v17  ;;  %vm99_vm11 = vmand %vm52_vm9, %vm93_vm10  ;;  %v27_v33 = vadd.s32 16, %v3660_v58  ;;  %v28_v14 = vadd.s32 24, %v3660_v58 }
 0x225   :  { %v3671_v62 = vsel %vm99_vm11, 0.0, %v3348_v61  ;;  %vm94_vm13 = vcmp.le.s32.totalorder %v3662_v59, %v26_v60  ;;  %vm78_vm2 = vcmp.ge.s32.totalorder %v3662_v59, 24  ;;  %vm79_vm3 = vcmp.lt.s32.totalorder %v3662_v59, 48 }
 0x226   :  { %v407_v8 = vmul.f32 %v3132_v43, %v399_v2  ;;  %vm100_vm14 = vmand %vm52_vm9, %vm94_vm13  ;;  %vm95_vm15 = vcmp.le.s32.totalorder %v3662_v59, %v27_v33  ;;  %vm96_vm5 = vcmp.le.s32.totalorder %v3662_v59, %v28_v14 }
 0x227   :  { %vm101_vm1 = vmand %vm52_vm9, %vm95_vm15 }
 0x228   :  { %v415_v10 = vadd.f32 %v3133_v52, %v407_v8  ;;  %v3688_v8 = vsel %vm100_vm14, 0.0, %v3348_v61  ;;  %vm3709_vm4 = vmand %vm78_vm2, %vm79_vm3 }
 0x229   :  { %vm102_vm6 = vmand %vm3709_vm4, %vm96_vm5 }
 0x22a   :  { %v421_v13 = vpack.c.bf16 %v416_v12, %v415_v10 }
 0x22c   :  { %2893 = vmatmul.msk.bf16.vlgmr.msra.gmra.mxu0 %vm117_vm0, %v421_v13 }
 0x234   :  { %2895 = vmatmul.msk.bf16.gmra.mxu3 %vm117_vm0, %v423_v45 }
 0x2a7   :  { %v465_v19 = vpop.f32.mrf.mxu3 }
 0x2a8   :  { %v466_v37 = vadd.f32 %v3134_v32, %v465_v19  ;;  %v3707_v19 = vsel %vm101_vm1, 0.0, %v3348_v61 }
 0x2a9   :  { %v460_v20 = vpop.f32.mrf.mxu0 }
 0x2aa   :  { %v461_v28 = vadd.f32 %v3134_v32, %v460_v20 }
 0x2af   :  { %v467_v6 = vpop.f32.mrf.mxu3 }
 0x2b0   :  { %v468_v21 = vadd.f32 %v3134_v32, %v467_v6 }
 0x2b1   :  { %v462_v23 = vpop.f32.mrf.mxu0 }
 0x2b2   :  { %v3621_v22 = vpack.c.bf16 %v468_v21, %v466_v37  ;;  %v463_v26 = vadd.f32 %v3134_v32, %v462_v23 }
 0x2b4   :  { %483 = vrot.lane.b32.xlu1 %v3621_v22, %s3345_s22  ;;  %v3625_v29 = vpack.c.bf16 %v463_v26, %v461_v28  ;;  %v29_v26 = vadd.s32 32, %v3660_v58 }
 0x2b6   :  { %vm97_vm7 = vcmp.le.s32.totalorder %v3662_v59, %v29_v26 }
 0x2b7   :  { %v470_v27 = vpop.f32.mrf.mxu3  ;;  %vm103_vm9 = vmand %vm3709_vm4, %vm97_vm7 }
 0x2b8   :  { %v471_v34 = vadd.f32 %v3134_v32, %v470_v27 }
 0x2bc   :  { %665 = vrot.lane.b32.xlu1 %v3625_v29, %s3346_s23 }
 0x2bf   :  { %v472_v31 = vpop.f32.mrf.mxu3 }
 0x2c0   :  { %v473_v35 = vadd.f32 %v3134_v32, %v472_v31 }
 0x2c2   :  { %v3629_v36 = vpack.c.bf16 %v473_v35, %v471_v34  ;;  %v3728_v34 = vsel %vm102_vm6, 0.0, %v3348_v61 }
 0x2c4   :  { %669 = vrot.lane.b32.xlu2 %v3629_v36, %s3346_s23  ;;  %485 = vrot.lane.b32.xlu0 %v3629_v36, %s3345_s22 }
 0x2c5   :  { %663 = vrot.lane.b32.xlu1 %v3629_v36, %s3347_s24 }
 0x2cc   :  { %667 = vrot.lane.b32.xlu2 %v3621_v22, %s3346_s23  ;;  %481 = vrot.lane.b32.xlu0 %v3625_v29, %s3345_s22 }
 0x2d4   :  { %661 = vrot.lane.b32.xlu2 %v3621_v22, %s3347_s24  ;;  %659 = vrot.lane.b32.xlu0 %v3625_v29, %s3347_s24 }
 0x31e   :  { %v670_v41 = vpop.permute.xlu2 %669 }
 0x31f   :  { %v687_v42 = vsel %vm487_vm8, %v670_v41, 0 }
 0x320   :  { %694 = vmatpush.bf16.xpose.msrb.mxu3 %v687_v42 }
 0x326   :  { %v484_v43 = vpop.permute.xlu1 %483  ;;  %v668_v25 = vpop.permute.xlu2 %667 }
 0x327   :  { %v684_v44 = vsel %vm487_vm8, %v668_v25, 0  ;;  %v501_v51 = vsel %vm487_vm8, %v484_v43, 0 }
 0x328   :  { %695 = vmatpush.bf16.xpose.msrb.mxu3 %v684_v44 }
 0x32e   :  { %v666_v24 = vpop.permute.xlu1 %665  ;;  %v662_v54 = vpop.permute.xlu2 %661 }
 0x32f   :  { %v681_v47 = vsel %vm487_vm8, %v666_v24, 0  ;;  %v30_v24 = vadd.s32 40, %v3660_v58 }
 0x330   :  { %696 = vmatpush.bf16.xpose.msrb.mxu3 %v681_v47 }
 0x331   :  { %vm98_vm10 = vcmp.le.s32.totalorder %v3662_v59, %v30_v24 }
 0x332   :  { %vm104_vm11 = vmand %vm3709_vm4, %vm98_vm10 }
 0x333   :  { %v3755_v60 = vsel %vm104_vm11, 0.0, %v3348_v61 }
 0x336   :  { %v486_v48 = vpop.permute.xlu0 %485 }
 0x337   :  { %v504_v49 = vsel %vm487_vm8, %v486_v48, 0  ;;  %v664_v55 = vpop.permute.xlu1 %663 }
 0x338   :  { %511 = vmatpush.bf16.xpose.msra.mxu1 %v504_v49  ;;  %v3745_v49 = vsel %vm103_vm9, 0.0, %v3348_v61 }
 0x33e   :  { %v482_v50 = vpop.permute.xlu0 %481 }
 0x33f   :  { %v498_v52 = vsel %vm487_vm8, %v482_v50, 0 }
 0x340   :  { %512 = vmatpush.bf16.xpose.msra.mxu1 %v501_v51 }
 0x346   :  { %v660_v16 = vpop.permute.xlu0 %659 }
 0x347   :  { %2902 = vmatmul.msk.bf16.vlgmr.msrb.gmra.mxu3 %vm487_vm8, %v660_v16 }
 0x348   :  { %513 = vmatpush.bf16.xpose.msra.mxu1 %v498_v52 }
 0x34f   :  { %2896 = vmatmul.msk.bf16.vlgmr.msra.gmra.mxu1 %vm487_vm8, %v3625_v29 }
 0x357   :  { %2903 = vmatmul.msk.bf16.gmra.mxu3 %vm487_vm8, %v662_v54 }
 0x35f   :  { %2897 = vmatmul.msk.bf16.gmra.mxu1 %vm487_vm8, %v3621_v22 }
 0x367   :  { %2904 = vmatmul.msk.bf16.gmra.mxu3 %vm487_vm8, %v664_v55 }
 0x36f   :  { %2898 = vmatmul.msk.bf16.gmra.mxu1 %vm487_vm8, %v3629_v36 }
 0x3ca   :  { %v698_v30 = vpop.f32.mrf.mxu3 }
 0x3cb   :  { %v713_v63 = vmul.f32 0.25, %v698_v30 }
 0x3cc   :  { %v515_v0 = vpop.f32.mrf.mxu1 }
 0x3cd   :  { %v530_v1 = vmul.f32 0.25, %v515_v0  ;;  %v3675_v39 = vadd.f32 %v713_v63, %v3671_v62 }
 0x3cf   :  { %v725_v4 = vsel %vm542_vm12, %v3675_v39, -inf  ;;  %v3680_v2 = vadd.f32 %v530_v1, %v3671_v62 }
 0x3d0   :  { %726 = vmax.xlane.f32.xlu1 %v725_v4 }
 0x3d1   :  { %v543_v38 = vsel %vm542_vm12, %v3680_v2, -inf }
 0x3d2   :  { %544 = vmax.xlane.f32.xlu0 %v543_v38  ;;  %v700_v40 = vpop.f32.mrf.mxu3 }
 0x3d3   :  { %v714_v9 = vmul.f32 0.25, %v700_v40 }
 0x3d4   :  { %v517_v10 = vpop.f32.mrf.mxu1 }
 0x3d5   :  { %v531_v12 = vmul.f32 0.25, %v517_v10  ;;  %v3692_v13 = vadd.f32 %v714_v9, %v3688_v8 }
 0x3d7   :  { %v3695_v56 = vadd.f32 %v531_v12, %v3688_v8  ;;  %v728_v17 = vsel %vm542_vm12, %v3692_v13, -inf }
 0x3d9   :  { %v546_v15 = vsel %vm542_vm12, %v3695_v56, -inf }
 0x3da   :  { %547 = vmax.xlane.f32.xlu2 %v546_v15  ;;  %729 = vmax.xlane.f32.xlu0 %v728_v17  ;;  %v703_v45 = vpop.f32.mrf.mxu3 }
 0x3db   :  { %v715_v20 = vmul.f32 0.25, %v703_v45 }
 0x3dc   :  { %v520_v32 = vpop.f32.mrf.mxu1 }
 0x3dd   :  { %v532_v37 = vmul.f32 0.25, %v520_v32  ;;  %v3715_v21 = vadd.f32 %v715_v20, %v3707_v19 }
 0x3df   :  { %v3718_v23 = vadd.f32 %v532_v37, %v3707_v19  ;;  %v731_v28 = vsel %vm542_vm12, %v3715_v21, -inf }
 0x3e1   :  { %v549_v27 = vsel %vm542_vm12, %v3718_v23, -inf }
 0x3e2   :  { %550 = vmax.xlane.f32.xlu0 %v549_v27  ;;  %732 = vmax.xlane.f32.xlu2 %v731_v28  ;;  %v705_v31 = vpop.f32.mrf.mxu3 }
 0x3e3   :  { %v716_v35 = vmul.f32 0.25, %v705_v31 }
 0x3e4   :  { %v522_v41 = vpop.f32.mrf.mxu1 }
 0x3e5   :  { %v533_v42 = vmul.f32 0.25, %v522_v41  ;;  %v3732_v43 = vadd.f32 %v716_v35, %v3728_v34 }
 0x3e7   :  { %v734_v25 = vsel %vm542_vm12, %v3732_v43, -inf  ;;  %v3737_v44 = vadd.f32 %v533_v42, %v3728_v34 }
 0x3e8   :  { %735 = vmax.xlane.f32.xlu1 %v734_v25 }
 0x3e9   :  { %v552_v47 = vsel %vm542_vm12, %v3737_v44, -inf }
 0x3ea   :  { %553 = vmax.xlane.f32.xlu2 %v552_v47  ;;  %v708_v48 = vpop.f32.mrf.mxu3 }
 0x3eb   :  { %v717_v50 = vmul.f32 0.25, %v708_v48 }
 0x3ec   :  { %v525_v51 = vpop.f32.mrf.mxu1 }
 0x3ed   :  { %v534_v16 = vmul.f32 0.25, %v525_v51  ;;  %v723_v52 = vadd.f32 %v717_v50, %v3745_v49 }
 0x3ef   :  { %v540_v54 = vadd.f32 %v534_v16, %v3745_v49  ;;  %v737_v57 = vsel %vm542_vm12, %v723_v52, -inf }
 0x3f1   :  { %v555_v55 = vsel %vm542_vm12, %v540_v54, -inf }
 0x3f2   :  { %556 = vmax.xlane.f32.xlu1 %v555_v55  ;;  %738 = vmax.xlane.f32.xlu2 %v737_v57  ;;  %v710_v58 = vpop.f32.mrf.mxu3 }
 0x3f3   :  { %v718_v30 = vmul.f32 0.25, %v710_v58 }
 0x3f4   :  { %v527_v59 = vpop.f32.mrf.mxu1 }
 0x3f5   :  { %v535_v63 = vmul.f32 0.25, %v527_v59  ;;  %v3758_v0 = vadd.f32 %v718_v30, %v3755_v60 }
 0x3f7   :  { %v3761_v1 = vadd.f32 %v535_v63, %v3755_v60  ;;  %v740_v33 = vsel %vm542_vm12, %v3758_v0, -inf }
 0x3f9   :  { %v558_v4 = vsel %vm542_vm12, %v3761_v1, -inf }
 0x3fa   :  { %559 = vmax.xlane.f32.xlu0 %v558_v4  ;;  %741 = vmax.xlane.f32.xlu1 %v740_v33 }
 0x40a   :  { %612 = vrot.lane.b32.xlu2 %v3625_v29, %s3349_s25 }
 0x413   :  { %616 = vrot.lane.b32.xlu1 %v3629_v36, %s3349_s25 }
 0x443   :  { %v727_v32 = vpop.xlane.xlu1 %726 }
 0x444   :  { %v743_v57 = vsub.f32 %v3675_v39, %v727_v32 }
 0x445   :  { %v545_v61 = vpop.xlane.xlu0 %544 }
 0x446   :  { %v561_v38 = vsub.f32 %v3680_v2, %v545_v61  ;;  %v749_v58 = vmul.f32 1.442695, %v743_v57 }
 0x448   :  { %v567_v40 = vmul.f32 1.442695, %v561_v38 }
 0x44a   :  { %3176 = vpow2.f32 %v567_v40 }
 0x44d   :  { %v730_v9 = vpop.xlane.xlu0 %729  ;;  %v548_v10 = vpop.xlane.xlu2 %547 }
 0x44e   :  { %v744_v12 = vsub.f32 %v3692_v13, %v730_v9  ;;  %v562_v14 = vsub.f32 %v3695_v56, %v548_v10 }
 0x450   :  { %v3774_v15 = vpop.eup %3176  ;;  %v751_v17 = vmul.f32 1.442695, %v744_v12  ;;  %v569_v45 = vmul.f32 1.442695, %v562_v14 }
 0x451   :  { %v579_v20 = vsel %vm542_vm12, %v3774_v15, 0.0 }
 0x452   :  { %3178 = vpow2.f32 %v751_v17  ;;  %580 = vadd.xlane.f32.xlu0 %v579_v20 }
 0x453   :  { %3180 = vpow2.f32 %v569_v45 }
 0x455   :  { %v551_v2 = vpop.xlane.xlu0 %550  ;;  %v733_v6 = vpop.xlane.xlu2 %732 }
 0x456   :  { %v563_v37 = vsub.f32 %v3718_v23, %v551_v2  ;;  %v745_v38 = vsub.f32 %v3715_v21, %v733_v6 }
 0x458   :  { %v3779_v26 = vpop.eup %3178  ;;  %v571_v13 = vmul.f32 1.442695, %v563_v37  ;;  %v753_v9 = vmul.f32 1.442695, %v745_v38 }
 0x459   :  { %v3781_v27 = vpop.eup %3180  ;;  %v764_v56 = vsel %vm542_vm12, %v3779_v26, 0.0 }
 0x45a   :  { %3182 = vpow2.f32 %v571_v13  ;;  %765 = vadd.xlane.f32.xlu1 %v764_v56  ;;  %v582_v28 = vsel %vm542_vm12, %v3781_v27, 0.0 }
 0x45b   :  { %583 = vadd.xlane.f32.xlu2 %v582_v28  ;;  %v736_v31 = vpop.xlane.xlu1 %735 }
 0x45c   :  { %v746_v4 = vsub.f32 %v3732_v43, %v736_v31 }
 0x45d   :  { %v554_v35 = vpop.xlane.xlu2 %553 }
 0x45e   :  { %v755_v39 = vmul.f32 1.442695, %v746_v4 }
 0x460   :  { %v3787_v41 = vpop.eup %3182 }
 0x461   :  { %v585_v23 = vsel %vm542_vm12, %v3787_v41, 0.0 }
 0x462   :  { %586 = vadd.xlane.f32.xlu1 %v585_v23 }
 0x465   :  { %v557_v42 = vpop.xlane.xlu1 %556  ;;  %v739_v25 = vpop.xlane.xlu2 %738 }
 0x466   :  { %v565_v24 = vsub.f32 %v540_v54, %v557_v42  ;;  %614 = vrot.lane.b32.xlu0 %v3621_v22, %s3349_s25  ;;  %v747_v48 = vsub.f32 %v723_v52, %v739_v25 }
 0x468   :  { %v575_v47 = vmul.f32 1.442695, %v565_v24  ;;  %v757_v50 = vmul.f32 1.442695, %v747_v48 }
 0x46a   :  { %3184 = vpow2.f32 %v575_v47 }
 0x46b   :  { %3186 = vpow2.f32 %v757_v50 }
 0x46c   :  { %3188 = vpow2.f32 %v749_v58 }
 0x46d   :  { %v742_v52 = vpop.xlane.xlu1 %741  ;;  %v560_v33 = vpop.xlane.xlu0 %559 }
 0x46e   :  { %v748_v10 = vsub.f32 %v3758_v0, %v742_v52  ;;  %v613_v32 = vpop.permute.xlu2 %612 }
 0x470   :  { %v3793_v51 = vpop.eup %3184  ;;  %v759_v14 = vmul.f32 1.442695, %v748_v10 }
 0x471   :  { %v591_v16 = vsel %vm542_vm12, %v3793_v51, 0.0  ;;  %v3799_v55 = vpop.eup %3186 }
 0x472   :  { %592 = vadd.xlane.f32.xlu1 %v591_v16  ;;  %v773_v54 = vsel %vm542_vm12, %v3799_v55, 0.0  ;;  %v3809_v63 = vpop.eup %3188 }
 0x473   :  { %798 = vrot.lane.b32.xlu2 %v3629_v36, %s3350_s26  ;;  %v564_v36 = vsub.f32 %v3737_v44, %v554_v35  ;;  %v566_v44 = vsub.f32 %v3761_v1, %v560_v33 }
 0x475   :  { %v573_v59 = vmul.f32 1.442695, %v564_v36  ;;  %v577_v40 = vmul.f32 1.442695, %v566_v44 }
 0x477   :  { %3190 = vpow2.f32 %v573_v59 }
 0x478   :  { %3192 = vpow2.f32 %v755_v39 }
 0x479   :  { %3194 = vpow2.f32 %v577_v40 }
 0x47a   :  { %774 = vadd.xlane.f32.xlu1 %v773_v54  ;;  %3196 = vpow2.f32 %v753_v9 }
 0x47b   :  { %796 = vrot.lane.b32.xlu2 %v3621_v22, %s3350_s26  ;;  %v761_v22 = vsel %vm542_vm12, %v3809_v63, 0.0  ;;  %3198 = vpow2.f32 %v759_v14 }
 0x483   :  { %794 = vrot.lane.b32.xlu2 %v3625_v29, %s3350_s26  ;;  %v3814_v29 = vpop.eup %3190 }
 0x484   :  { %v588_v61 = vsel %vm542_vm12, %v3814_v29, 0.0  ;;  %v3820_v43 = vpop.eup %3192 }
 0x485   :  { %v617_v30 = vpop.permute.xlu1 %616  ;;  %v770_v12 = vsel %vm542_vm12, %v3820_v43, 0.0  ;;  %v3825_v1 = vpop.eup %3194 }
 0x486   :  { %635 = vmatpush.bf16.msrb.mxu0 %v617_v30  ;;  %3117 = vmatpush.bf16.msrb.mxu1 %v617_v30  ;;  %v594_v17 = vsel %vm542_vm12, %v3825_v1, 0.0  ;;  %v3829_v21 = vpop.eup %3196 }
 0x487   :  { %3118 = vmatpush.bf16.msra.mxu2 %v617_v30  ;;  %v767_v45 = vsel %vm542_vm12, %v3829_v21, 0.0  ;;  %v3833_v20 = vpop.eup %3198 }
 0x488   :  { %v776_v0 = vsel %vm542_vm12, %v3833_v20, 0.0 }
 0x490   :  { %762 = vadd.xlane.f32.xlu0 %v761_v22 }
 0x498   :  { %589 = vadd.xlane.f32.xlu0 %v588_v61 }
 0x4a0   :  { %771 = vadd.xlane.f32.xlu0 %v770_v12 }
 0x4a8   :  { %595 = vadd.xlane.f32.xlu0 %v594_v17 }
 0x4ac   :  { %768 = vadd.xlane.f32.xlu2 %v767_v45 }
 0x4b0   :  { %777 = vadd.xlane.f32.xlu0 %v776_v0 }
 0x4c5   :  { %v581_v6 = vpop.xlane.xlu0 %580 }
 0x4cd   :  { %v766_v24 = vpop.xlane.xlu1 %765 }
 0x4ce   :  { %v584_v2 = vpop.xlane.xlu2 %583 }
 0x4cf   :  { %3200 = vrcp.f32 %v584_v2 }
 0x4d0   :  { %3202 = vrcp.f32 %v581_v6  ;;  %v3090_v6 = vld [vmem:[%s4786_s3 + $0x8] sm:$0xff] }
 0x4d1   :  { %3204 = vrcp.f32 %v766_v24 }
 0x4d5   :  { %v3201_v13 = vpop.eup %3200  ;;  %v587_v48 = vpop.xlane.xlu1 %586 }
 0x4d6   :  { %v799_v37 = vpop.permute.xlu2 %798  ;;  %v3203_v28 = vpop.eup %3202  ;;  %v604_v31 = vmul.f32 %v3201_v13, %v3781_v27 }
 0x4d7   :  { %v603_v35 = vmul.f32 %v3203_v28, %v3774_v15  ;;  %v3205_v27 = vpop.eup %3204 }
 0x4d8   :  { %v615_v56 = vpop.permute.xlu0 %614  ;;  %v786_v15 = vmul.f32 %v3205_v27, %v3779_v26 }
 0x4d9   :  { %636 = vmatpush.bf16.msrb.mxu0 %v615_v56  ;;  %3119 = vmatpush.bf16.msrb.mxu1 %v615_v56  ;;  %v609_v42 = vpack.c.bf16 %v604_v31, %v603_v35 }
 0x4da   :  { %3120 = vmatpush.bf16.msra.mxu2 %v615_v56 }
 0x4dd   :  { %637 = vmatpush.bf16.msrb.mxu0 %v613_v32  ;;  %3121 = vmatpush.bf16.msrb.mxu1 %v613_v32 }
 0x4de   :  { %3122 = vmatpush.bf16.msra.mxu2 %v613_v32  ;;  %v797_v23 = vpop.permute.xlu2 %796 }
 0x4e0   :  { %2899 = vmatmul.msk.bf16.vlgmr.msrb.gmra.mxu0 %vm542_vm12, %v609_v42 }
 0x4e1   :  { %817 = vmatpush.bf16.msra.mxu0 %v799_v37 }
 0x4e2   :  { %864 = vmatpush.bf16.msrb.mxu2 %v3090_v6 }
 0x4e5   :  { %818 = vmatpush.bf16.msra.mxu0 %v797_v23  ;;  %v593_v22 = vpop.xlane.xlu1 %592 }
 0x4e6   :  { %v795_v25 = vpop.permute.xlu2 %794 }
 0x4e9   :  { %819 = vmatpush.bf16.msra.mxu0 %v795_v25 }
 0x4ed   :  { %v775_v14 = vpop.xlane.xlu1 %774 }
 0x503   :  { %v763_v47 = vpop.xlane.xlu0 %762 }
 0x504   :  { %3206 = vrcp.f32 %v763_v47 }
 0x505   :  { %3208 = vrcp.f32 %v587_v48 }
 0x50a   :  { %v3207_v50 = vpop.eup %3206 }
 0x50b   :  { %v785_v16 = vmul.f32 %v3207_v50, %v3809_v63  ;;  %v590_v54 = vpop.xlane.xlu0 %589  ;;  %v3209_v57 = vpop.eup %3208 }
 0x50c   :  { %3210 = vrcp.f32 %v590_v54  ;;  %v605_v30 = vmul.f32 %v3209_v57, %v3787_v41  ;;  %v3135_v54 = vld [vmem:[%s4784_s1 + $0x9] ss:$0 sm:$0xff] }
 0x50d   :  { %v791_v52 = vpack.c.bf16 %v786_v15, %v785_v16  ;;  %3212 = vrcp.f32 %v593_v22 }
 0x50f   :  { %2905 = vmatmul.msk.bf16.vlgmr.msra.gmra.mxu0 %vm542_vm12, %v791_v52 }
 0x512   :  { %v3211_v58 = vpop.eup %3210 }
 0x513   :  { %v606_v36 = vmul.f32 %v3211_v58, %v3814_v29  ;;  %v772_v59 = vpop.xlane.xlu0 %771  ;;  %v3213_v39 = vpop.eup %3212 }
 0x514   :  { %v607_v44 = vmul.f32 %v3213_v39, %v3793_v51 }
 0x515   :  { %v610_v4 = vpack.c.bf16 %v606_v36, %v605_v30 }
 0x517   :  { %2900 = vmatmul.msk.bf16.vlgmr.msrb.gmra.mxu1 %vm542_vm12, %v610_v4 }
 0x51b   :  { %v596_v26 = vpop.xlane.xlu0 %595 }
 0x51c   :  { %3214 = vrcp.f32 %v596_v26 }
 0x51d   :  { %3216 = vrcp.f32 %v772_v59 }
 0x51f   :  { %v769_v63 = vpop.xlane.xlu2 %768 }
 0x520   :  { %3218 = vrcp.f32 %v769_v63 }
 0x522   :  { %v3215_v33 = vpop.eup %3214 }
 0x523   :  { %v608_v61 = vmul.f32 %v3215_v33, %v3825_v1  ;;  %v3217_v41 = vpop.eup %3216  ;;  %v778_v10 = vpop.xlane.xlu0 %777 }
 0x524   :  { %v788_v9 = vmul.f32 %v3217_v41, %v3820_v43  ;;  %3220 = vrcp.f32 %v778_v10  ;;  %v3089_v43 = vld [vmem:[%s4786_s3] sm:$0xff] }
 0x525   :  { %v611_v38 = vpack.c.bf16 %v608_v61, %v607_v44  ;;  %3222 = vrcp.f32 %v775_v14  ;;  %903 = vmatpush.bf16.msra.mxu1 %v3089_v43 }
 0x526   :  { %v3219_v29 = vpop.eup %3218 }
 0x527   :  { %2901 = vmatmul.msk.bf16.vlgmr.msra.gmra.mxu2 %vm542_vm12, %v611_v38  ;;  %v787_v40 = vmul.f32 %v3219_v29, %v3829_v21 }
 0x529   :  { %v792_v12 = vpack.c.bf16 %v788_v9, %v787_v40 }
 0x52a   :  { %v3221_v17 = vpop.eup %3220 }
 0x52b   :  { %2906 = vmatmul.msk.bf16.gmra.mxu0 %vm542_vm12, %v792_v12  ;;  %v3223_v51 = vpop.eup %3222  ;;  %v790_v1 = vmul.f32 %v3221_v17, %v3833_v20 }
 0x52c   :  { %v789_v45 = vmul.f32 %v3223_v51, %v3799_v55 }
 0x52e   :  { %v793_v0 = vpack.c.bf16 %v790_v1, %v789_v45 }
 0x53b   :  { %2907 = vmatmul.msk.bf16.gmra.mxu0 %vm542_vm12, %v793_v0 }
 0x55d   :  { %v639_v21 = vpop.f32.mrf.mxu0 }
 0x565   :  { %v641_v32 = vpop.f32.mrf.mxu0 }
 0x566   :  { %v654_v2 = vpack.c.bf16 %v641_v32, %v639_v21 }
 0x568   :  { %2921 = vmatmul.msk.bf16.vlgmr.msra.gmra.mxu1 %vm487_vm8, %v654_v2 }
 0x58c   :  { %v821_v20 = vpop.f32.mrf.mxu0 }
 0x594   :  { %v644_v55 = vpop.f32.mrf.mxu1  ;;  %v823_v37 = vpop.f32.mrf.mxu0 }
 0x595   :  { %v836_v13 = vpack.c.bf16 %v823_v37, %v821_v20 }
 0x597   :  { %2914 = vmatmul.msk.bf16.vlgmr.msrb.gmra.mxu2 %vm487_vm8, %v836_v13 }
 0x59c   :  { %v646_v56 = vpop.f32.mrf.mxu1 }
 0x59d   :  { %v655_v28 = vpack.c.bf16 %v646_v56, %v644_v55 }
 0x59f   :  { %2922 = vmatmul.msk.bf16.gmra.mxu1 %vm487_vm8, %v655_v28 }
 0x5a8   :  { %v826_v31 = vpop.f32.mrf.mxu0 }
 0x5aa   :  { %v649_v35 = vpop.f32.mrf.mxu2 }
 0x5b0   :  { %v828_v23 = vpop.f32.mrf.mxu0 }
 0x5b1   :  { %v837_v42 = vpack.c.bf16 %v828_v23, %v826_v31 }
 0x5b2   :  { %v651_v25 = vpop.f32.mrf.mxu2 }
 0x5b3   :  { %v656_v24 = vpack.c.bf16 %v651_v25, %v649_v35  ;;  %2915 = vmatmul.msk.bf16.gmra.mxu2 %vm487_vm8, %v837_v42 }
 0x5b5   :  { %2923 = vmatmul.msk.bf16.gmra.mxu1 %vm487_vm8, %v656_v24 }
 0x5b8   :  { %v831_v47 = vpop.f32.mrf.mxu0 }
 0x5c0   :  { %v833_v48 = vpop.f32.mrf.mxu0 }
 0x5c1   :  { %v838_v27 = vpack.c.bf16 %v833_v48, %v831_v47 }
 0x5c3   :  { %2916 = vmatmul.msk.bf16.gmra.mxu2 %vm487_vm8, %v838_v27 }
 0x5e5   :  { %v905_v50 = vpop.f32.mrf.mxu1 }
 0x5ed   :  { %v907_v30 = vpop.f32.mrf.mxu1 }
 0x61a   :  { %v866_v15 = vpop.f32.mrf.mxu2 }
 0x61b   :  { %v906_v16 = vadd.f32 %v905_v50, %v866_v15 }
 0x61c   :  { %v910_v63 = vpop.f32.mrf.mxu1 }
 0x61d   :  { %v920_v52 = vadd.f32 %v906_v16, %v3521_v11 }
 0x61f   :  { %v3871_v57 = vadd.f32 %v3135_v54, %v920_v52 }
 0x621   :  { %v934_v58 = vsel %vm117_vm0, %v3871_v57, 0.0 }
 0x622   :  { %935 = vadd.xlane.f32.xlu1 %v934_v58  ;;  %v868_v36 = vpop.f32.mrf.mxu2 }
 0x623   :  { %v908_v59 = vadd.f32 %v907_v30, %v868_v36 }
 0x624   :  { %v912_v61 = vpop.f32.mrf.mxu1 }
 0x625   :  { %v921_v4 = vadd.f32 %v908_v59, %v3513_v7 }
 0x627   :  { %v3876_v22 = vadd.f32 %v3135_v54, %v921_v4 }
 0x629   :  { %v937_v26 = vsel %vm117_vm0, %v3876_v22, 0.0 }
 0x62a   :  { %938 = vadd.xlane.f32.xlu2 %v937_v26 }
 0x632   :  { %v915_v9 = vpop.f32.mrf.mxu1 }
 0x636   :  { %v871_v39 = vpop.f32.mrf.mxu2 }
 0x637   :  { %v911_v11 = vadd.f32 %v910_v63, %v871_v39  ;;  %v3092_v39 = vld [vmem:[%s4787_s4 + $0x8] sm:$0xff] }
 0x638   :  { %1118 = vmatpush.bf16.msra.mxu3 %v3092_v39 }
 0x639   :  { %v922_v33 = vadd.f32 %v911_v11, %v3477_v46 }
 0x63a   :  { %v917_v1 = vpop.f32.mrf.mxu1 }
 0x63b   :  { %v3881_v44 = vadd.f32 %v3135_v54, %v922_v33  ;;  %v3091_v33 = vld [vmem:[%s4787_s4] sm:$0xff] }
 0x63c   :  { %1119 = vmatpush.bf16.msra.mxu3 %v3091_v33 }
 0x63d   :  { %v940_v41 = vsel %vm117_vm0, %v3881_v44, 0.0 }
 0x63e   :  { %941 = vadd.xlane.f32.xlu0 %v940_v41  ;;  %v873_v38 = vpop.f32.mrf.mxu2 }
 0x63f   :  { %v913_v7 = vadd.f32 %v912_v61, %v873_v38 }
 0x641   :  { %v923_v29 = vadd.f32 %v913_v7, %v3506_v3 }
 0x643   :  { %v3886_v40 = vadd.f32 %v3135_v54, %v923_v29 }
 0x645   :  { %v943_v10 = vsel %vm117_vm0, %v3886_v40, 0.0 }
 0x646   :  { %944 = vadd.xlane.f32.xlu1 %v943_v10  ;;  %v876_v12 = vpop.f32.mrf.mxu2 }
 0x647   :  { %v916_v46 = vadd.f32 %v915_v9, %v876_v12 }
 0x649   :  { %v924_v14 = vadd.f32 %v916_v46, %v3491_v53 }
 0x64b   :  { %v3891_v17 = vadd.f32 %v3135_v54, %v924_v14 }
 0x64d   :  { %v946_v51 = vsel %vm117_vm0, %v3891_v17, 0.0 }
 0x64e   :  { %947 = vadd.xlane.f32.xlu2 %v946_v51  ;;  %v878_v45 = vpop.f32.mrf.mxu2 }
 0x64f   :  { %v918_v3 = vadd.f32 %v917_v1, %v878_v45 }
 0x651   :  { %v925_v0 = vadd.f32 %v918_v3, %v3509_v5 }
 0x653   :  { %v3896_v43 = vadd.f32 %v3135_v54, %v925_v0 }
 0x655   :  { %v949_v21 = vsel %vm117_vm0, %v3896_v43, 0.0 }
 0x656   :  { %950 = vadd.xlane.f32.xlu0 %v949_v21  ;;  %v3953_v21 = vld [vmem:[%s4784_s1 + $0x6] ss:$0 sm:$0xff] }
 0x695   :  { %v936_v32 = vpop.xlane.xlu1 %935 }
 0x696   :  { %v952_v53 = vmul.f32 %v936_v32, %v3410_v18 }
 0x698   :  { %v3902_v2 = vsub.f32 %v3871_v57, %v952_v53 }
 0x69a   :  { %v964_v6 = vmul.f32 %v3902_v2, %v3902_v2 }
 0x69c   :  { %v970_v20 = vsel %vm117_vm0, %v964_v6, 0.0 }
 0x69d   :  { %971 = vadd.xlane.f32.xlu1 %v970_v20  ;;  %v939_v55 = vpop.xlane.xlu2 %938 }
 0x69e   :  { %v953_v5 = vmul.f32 %v939_v55, %v3410_v18 }
 0x6a0   :  { %v3909_v37 = vsub.f32 %v3876_v22, %v953_v5  ;;  %v3960_v5 = vld [vmem:[%s4784_s1 + $0x7] ss:$0 sm:$0xff] }
 0x6a2   :  { %v965_v13 = vmul.f32 %v3909_v37, %v3909_v37 }
 0x6a4   :  { %v973_v56 = vsel %vm117_vm0, %v965_v13, 0.0 }
 0x6a5   :  { %974 = vadd.xlane.f32.xlu2 %v973_v56 }
 0x6b1   :  { %v942_v28 = vpop.xlane.xlu0 %941 }
 0x6b2   :  { %v954_v31 = vmul.f32 %v942_v28, %v3410_v18 }
 0x6b4   :  { %v3916_v35 = vsub.f32 %v3881_v44, %v954_v31 }
 0x6b6   :  { %v966_v23 = vmul.f32 %v3916_v35, %v3916_v35 }
 0x6b8   :  { %v976_v42 = vsel %vm117_vm0, %v966_v23, 0.0 }
 0x6b9   :  { %v945_v25 = vpop.xlane.xlu1 %944  ;;  %977 = vadd.xlane.f32.xlu0 %v976_v42 }
 0x6ba   :  { %v955_v24 = vmul.f32 %v945_v25, %v3410_v18 }
 0x6bc   :  { %v3923_v47 = vsub.f32 %v3886_v40, %v955_v24 }
 0x6be   :  { %v967_v48 = vmul.f32 %v3923_v47, %v3923_v47 }
 0x6c0   :  { %v979_v27 = vsel %vm117_vm0, %v967_v48, 0.0 }
 0x6c1   :  { %980 = vadd.xlane.f32.xlu1 %v979_v27  ;;  %v948_v50 = vpop.xlane.xlu2 %947 }
 0x6c2   :  { %v956_v15 = vmul.f32 %v948_v50, %v3410_v18 }
 0x6c4   :  { %v3930_v16 = vsub.f32 %v3891_v17, %v956_v15 }
 0x6c6   :  { %v968_v54 = vmul.f32 %v3930_v16, %v3930_v16 }
 0x6c8   :  { %v982_v52 = vsel %vm117_vm0, %v968_v54, 0.0 }
 0x6c9   :  { %v951_v58 = vpop.xlane.xlu0 %950  ;;  %983 = vadd.xlane.f32.xlu2 %v982_v52 }
 0x6ca   :  { %v957_v30 = vmul.f32 %v951_v58, %v3410_v18 }
 0x6cc   :  { %v3937_v36 = vsub.f32 %v3896_v43, %v957_v30 }
 0x6ce   :  { %v969_v59 = vmul.f32 %v3937_v36, %v3937_v36 }
 0x6d0   :  { %v985_v4 = vsel %vm117_vm0, %v969_v59, 0.0 }
 0x6d1   :  { %986 = vadd.xlane.f32.xlu0 %v985_v4 }
 0x710   :  { %v972_v26 = vpop.xlane.xlu1 %971 }
 0x711   :  { %v988_v63 = vmul.f32 %v972_v26, %v3410_v18 }
 0x713   :  { %v994_v11 = vadd.f32 1e-05, %v988_v63 }
 0x715   :  { %3224 = vrsqrt.f32 %v994_v11  ;;  %vm1006_vm14 = vweird.f32 %v994_v11 }
 0x718   :  { %v975_v61 = vpop.xlane.xlu2 %974 }
 0x719   :  { %v989_v41 = vmul.f32 %v975_v61, %v3410_v18 }
 0x71b   :  { %v3225_v38 = vpop.eup %3224  ;;  %v995_v7 = vadd.f32 1e-05, %v989_v41 }
 0x71c   :  { %v1001_v29 = vmul.f32 %v3225_v38, %v994_v11  ;;  %vm1007_vm13 = vweird.f32 %v3225_v38 }
 0x71d   :  { %3226 = vrsqrt.f32 %v995_v7  ;;  %vm1008_vm15 = vmor %vm1006_vm14, %vm1007_vm13  ;;  %vm1016_vm2 = vweird.f32 %v995_v7 }
 0x71e   :  { %v1002_v9 = vmul.f32 %v3225_v38, %v1001_v29 }
 0x720   :  { %v1003_v10 = vmul.f32 0.5, %v1002_v9 }
 0x722   :  { %v1004_v12 = vsub.f32 1.5, %v1003_v10 }
 0x723   :  { %v3227_v46 = vpop.eup %3226 }
 0x724   :  { %v1005_v14 = vmul.f32 %v3225_v38, %v1004_v12  ;;  %v1011_v51 = vmul.f32 %v3227_v46, %v995_v7  ;;  %vm1017_vm1 = vweird.f32 %v3227_v46 }
 0x725   :  { %vm1018_vm3 = vmor %vm1016_vm2, %vm1017_vm1 }
 0x726   :  { %v1012_v1 = vmul.f32 %v3227_v46, %v1011_v51  ;;  %v1009_v45 = vsel %vm1008_vm15, %v3225_v38, %v1005_v14 }
 0x727   :  { %v1060_v32 = vmul.f32 %v1009_v45, %v3902_v2 }
 0x728   :  { %v1013_v3 = vmul.f32 0.5, %v1012_v1 }
 0x729   :  { %v1068_v13 = vmul.f32 %v3953_v21, %v1060_v32 }
 0x72a   :  { %v1014_v0 = vsub.f32 1.5, %v1013_v3 }
 0x72b   :  { %v1076_v2 = vadd.f32 %v3960_v5, %v1068_v13 }
 0x72c   :  { %v1015_v53 = vmul.f32 %v3227_v46, %v1014_v0  ;;  %v978_v6 = vpop.xlane.xlu0 %977 }
 0x72d   :  { %v990_v20 = vmul.f32 %v978_v6, %v3410_v18 }
 0x72e   :  { %v1019_v55 = vsel %vm1018_vm3, %v3227_v46, %v1015_v53 }
 0x72f   :  { %v1061_v56 = vmul.f32 %v1019_v55, %v3909_v37  ;;  %v996_v28 = vadd.f32 1e-05, %v990_v20 }
 0x731   :  { %v1069_v31 = vmul.f32 %v3953_v21, %v1061_v56  ;;  %3228 = vrsqrt.f32 %v996_v28  ;;  %vm1026_vm5 = vweird.f32 %v996_v28 }
 0x733   :  { %v1077_v23 = vadd.f32 %v3960_v5, %v1069_v31 }
 0x734   :  { %v981_v42 = vpop.xlane.xlu1 %980 }
 0x735   :  { %v991_v25 = vmul.f32 %v981_v42, %v3410_v18  ;;  %v1082_v24 = vpack.c.bf16 %v1077_v23, %v1076_v2 }
 0x737   :  { %v3229_v48 = vpop.eup %3228  ;;  %v997_v27 = vadd.f32 1e-05, %v991_v25  ;;  %2932 = vmatmul.msk.bf16.vlgmr.msra.gmra.mxu3 %vm117_vm0, %v1082_v24 }
 0x738   :  { %v1021_v50 = vmul.f32 %v3229_v48, %v996_v28  ;;  %vm1027_vm4 = vweird.f32 %v3229_v48 }
 0x739   :  { %3230 = vrsqrt.f32 %v997_v27  ;;  %vm1028_vm6 = vmor %vm1026_vm5, %vm1027_vm4  ;;  %vm1036_vm9 = vweird.f32 %v997_v27 }
 0x73a   :  { %v1022_v15 = vmul.f32 %v3229_v48, %v1021_v50 }
 0x73c   :  { %v1023_v37 = vmul.f32 0.5, %v1022_v15  ;;  %v984_v54 = vpop.xlane.xlu2 %983 }
 0x73d   :  { %v992_v52 = vmul.f32 %v984_v54, %v3410_v18 }
 0x73e   :  { %v1024_v58 = vsub.f32 1.5, %v1023_v37  ;;  %v3099_v37 = vld [vmem:[%s4788_s5 + $0x30] sm:$0xff] }
 0x73f   :  { %v3231_v30 = vpop.eup %3230  ;;  %v998_v59 = vadd.f32 1e-05, %v992_v52 }
 0x740   :  { %v1025_v4 = vmul.f32 %v3229_v48, %v1024_v58  ;;  %v1031_v26 = vmul.f32 %v3231_v30, %v997_v27  ;;  %vm1037_vm7 = vweird.f32 %v3231_v30 }
 0x741   :  { %3232 = vrsqrt.f32 %v998_v59  ;;  %vm1038_vm10 = vmor %vm1036_vm9, %vm1037_vm7  ;;  %vm1046_vm13 = vweird.f32 %v998_v59 }
 0x742   :  { %v1032_v63 = vmul.f32 %v3231_v30, %v1031_v26  ;;  %v1029_v39 = vsel %vm1028_vm6, %v3229_v48, %v1025_v4  ;;  %v3098_v4 = vld [vmem:[%s4788_s5 + $0x28] sm:$0xff] }
 0x743   :  { %v1062_v7 = vmul.f32 %v1029_v39, %v3916_v35 }
 0x744   :  { %v1033_v11 = vmul.f32 0.5, %v1032_v63  ;;  %v987_v33 = vpop.xlane.xlu0 %986 }
 0x745   :  { %v993_v61 = vmul.f32 %v987_v33, %v3410_v18  ;;  %v1070_v51 = vmul.f32 %v3953_v21, %v1062_v7 }
 0x746   :  { %v1034_v41 = vsub.f32 1.5, %v1033_v11 }
 0x747   :  { %v3233_v38 = vpop.eup %3232  ;;  %v999_v29 = vadd.f32 1e-05, %v993_v61  ;;  %v1078_v32 = vadd.f32 %v3960_v5, %v1070_v51  ;;  %v3097_v61 = vld [vmem:[%s4788_s5 + $0x20] sm:$0xff] }
 0x748   :  { %v1035_v9 = vmul.f32 %v3231_v30, %v1034_v41  ;;  %v1041_v10 = vmul.f32 %v3233_v38, %v998_v59  ;;  %vm1047_vm11 = vweird.f32 %v3233_v38 }
 0x749   :  { %3234 = vrsqrt.f32 %v999_v29  ;;  %vm1048_vm14 = vmor %vm1046_vm13, %vm1047_vm11  ;;  %vm1056_vm1 = vweird.f32 %v999_v29 }
 0x74a   :  { %v1039_v12 = vsel %vm1038_vm10, %v3231_v30, %v1035_v9  ;;  %v1042_v46 = vmul.f32 %v3233_v38, %v1041_v10 }
 0x74b   :  { %v1063_v14 = vmul.f32 %v1039_v12, %v3923_v47  ;;  %v3096_v12 = vld [vmem:[%s4788_s5 + $0x18] sm:$0xff] }
 0x74c   :  { %v1043_v1 = vmul.f32 0.5, %v1042_v46 }
 0x74d   :  { %v1071_v45 = vmul.f32 %v3953_v21, %v1063_v14 }
 0x74e   :  { %v1044_v3 = vsub.f32 1.5, %v1043_v1 }
 0x74f   :  { %v3235_v0 = vpop.eup %3234  ;;  %v1079_v35 = vadd.f32 %v3960_v5, %v1071_v45 }
 0x750   :  { %v1045_v53 = vmul.f32 %v3233_v38, %v1044_v3  ;;  %v1051_v6 = vmul.f32 %v3235_v0, %v999_v29  ;;  %vm1057_vm15 = vweird.f32 %v3235_v0 }
 0x751   :  { %v1083_v20 = vpack.c.bf16 %v1079_v35, %v1078_v32  ;;  %vm1058_vm2 = vmor %vm1056_vm1, %vm1057_vm15  ;;  %v3095_v32 = vld [vmem:[%s4788_s5 + $0x10] sm:$0xff] }
 0x752   :  { %v1052_v55 = vmul.f32 %v3235_v0, %v1051_v6  ;;  %v1049_v47 = vsel %vm1048_vm14, %v3233_v38, %v1045_v53 }
 0x753   :  { %2933 = vmatmul.msk.bf16.gmra.mxu3 %vm117_vm0, %v1083_v20  ;;  %v1064_v28 = vmul.f32 %v1049_v47, %v3930_v16  ;;  %v3988_v16 = vld [vmem:[%s4784_s1 + $0xa] ss:$0 sm:$0xff] }
 0x754   :  { %v1053_v13 = vmul.f32 0.5, %v1052_v55 }
 0x755   :  { %v1072_v42 = vmul.f32 %v3953_v21, %v1064_v28 }
 0x756   :  { %v1054_v56 = vsub.f32 1.5, %v1053_v13 }
 0x757   :  { %v1080_v24 = vadd.f32 %v3960_v5, %v1072_v42 }
 0x758   :  { %v1055_v31 = vmul.f32 %v3235_v0, %v1054_v56  ;;  %v3094_v56 = vld [vmem:[%s4788_s5 + $0x8] sm:$0xff] }
 0x75a   :  { %v1059_v2 = vsel %vm1058_vm2, %v3235_v0, %v1055_v31 }
 0x75b   :  { %v1065_v23 = vmul.f32 %v1059_v2, %v3937_v36  ;;  %v3100_v36 = vld [vmem:[%s4788_s5 + $0x38] sm:$0xff] }
 0x75c   :  { %1469 = vmatpush.bf16.msrb.mxu0 %v3100_v36 }
 0x75d   :  { %v1073_v25 = vmul.f32 %v3953_v21, %v1065_v23 }
 0x75f   :  { %v1081_v48 = vadd.f32 %v3960_v5, %v1073_v25 }
 0x760   :  { %1470 = vmatpush.bf16.msrb.mxu0 %v3099_v37 }
 0x761   :  { %v1084_v27 = vpack.c.bf16 %v1081_v48, %v1080_v24  ;;  %v3093_v48 = vld [vmem:[%s4788_s5] sm:$0xff] }
 0x763   :  { %2934 = vmatmul.msk.bf16.gmra.mxu3 %vm117_vm0, %v1084_v27 }
 0x764   :  { %1471 = vmatpush.bf16.msrb.mxu0 %v3098_v4 }
 0x768   :  { %1472 = vmatpush.bf16.msrb.mxu0 %v3097_v61 }
 0x76c   :  { %1473 = vmatpush.bf16.msrb.mxu0 %v3096_v12 }
 0x770   :  { %1474 = vmatpush.bf16.msrb.mxu0 %v3095_v32 }
 0x774   :  { %1475 = vmatpush.bf16.msrb.mxu0 %v3094_v56 }
 0x778   :  { %1476 = vmatpush.bf16.msrb.mxu0 %v3093_v48 }
 0x7ba   :  { %v1121_v50 = vpop.f32.mrf.mxu3 }
 0x7bb   :  { %v3991_v15 = vadd.f32 %v3988_v16, %v1121_v50 }
 0x7bd   :  { %v3997_v21 = vmul.f32 0.70710677, %v3991_v15 }
 0x7bf   :  { %v1148_v5 = vmul.f32 %v3997_v21, %v3997_v21 }
 0x7c1   :  { %v4004_v54 = vmin.f32 %v1148_v5, 16.0 }
 0x7c2   :  { %v1123_v52 = vpop.f32.mrf.mxu3 }
 0x7c3   :  { %v1150_v58 = vmul.f32 2.1237322e-06, %v4004_v54  ;;  %v1161_v30 = vmul.f32 3.8918573e-05, %v4004_v54  ;;  %v4009_v59 = vadd.f32 %v3988_v16, %v1123_v52 }
 0x7c5   :  { %v1151_v26 = vadd.f32 0.00028619796, %v1150_v58  ;;  %v1162_v63 = vadd.f32 0.001143296, %v1161_v30  ;;  %v4015_v39 = vmul.f32 0.70710677, %v4009_v59 }
 0x7c7   :  { %v1163_v11 = vmul.f32 %v1162_v63, %v4004_v54  ;;  %v1188_v33 = vmul.f32 %v4015_v39, %v4015_v39  ;;  %v1152_v41 = vmul.f32 %v1151_v26, %v4004_v54 }
 0x7c9   :  { %v1164_v38 = vadd.f32 0.014752088, %v1163_v11  ;;  %v1189_v7 = vmin.f32 %v1188_v33, 16.0  ;;  %v1153_v46 = vadd.f32 0.0036580483, %v1152_v41 }
 0x7cb   :  { %v1165_v29 = vmul.f32 %v1164_v38, %v4004_v54  ;;  %v1190_v9 = vmul.f32 2.1237322e-06, %v1189_v7  ;;  %v1201_v10 = vmul.f32 3.8918573e-05, %v1189_v7  ;;  %v1154_v35 = vmul.f32 %v1153_v46, %v4004_v54 }
 0x7cd   :  { %v1166_v14 = vadd.f32 0.112945676, %v1165_v29  ;;  %v1191_v51 = vadd.f32 0.00028619796, %v1190_v9  ;;  %v1202_v1 = vadd.f32 0.001143296, %v1201_v10 }
 0x7ce   :  { %v1155_v28 = vadd.f32 0.05243302, %v1154_v35 }
 0x7cf   :  { %v1167_v45 = vmul.f32 %v1166_v14, %v4004_v54  ;;  %v1192_v3 = vmul.f32 %v1191_v51, %v1189_v7  ;;  %v1203_v0 = vmul.f32 %v1202_v1, %v1189_v7 }
 0x7d0   :  { %v1156_v27 = vmul.f32 %v1155_v28, %v4004_v54 }
 0x7d1   :  { %v1168_v53 = vadd.f32 0.4994258, %v1167_v45  ;;  %v1193_v6 = vadd.f32 0.0036580483, %v1192_v3  ;;  %v1204_v20 = vadd.f32 0.014752088, %v1203_v0 }
 0x7d2   :  { %v1157_v58 = vadd.f32 0.18741608, %v1156_v27 }
 0x7d3   :  { %v1169_v55 = vmul.f32 %v1168_v53, %v4004_v54  ;;  %v1194_v47 = vmul.f32 %v1193_v6, %v1189_v7  ;;  %v1205_v13 = vmul.f32 %v1204_v20, %v1189_v7 }
 0x7d4   :  { %v1158_v38 = vmul.f32 %v1157_v58, %v4004_v54 }
 0x7d5   :  { %v1170_v31 = vadd.f32 1.0, %v1169_v55  ;;  %v1206_v2 = vadd.f32 0.112945676, %v1205_v13  ;;  %v1195_v42 = vadd.f32 0.05243302, %v1194_v47 }
 0x7d6   :  { %v1126_v23 = vpop.f32.mrf.mxu3  ;;  %v1159_v54 = vadd.f32 1.1283791, %v1158_v38 }
 0x7d7   :  { %3236 = vrcp.f32 %v1170_v31  ;;  %v1207_v25 = vmul.f32 %v1206_v2, %v1189_v7  ;;  %v4038_v24 = vadd.f32 %v3988_v16, %v1126_v23  ;;  %v1196_v36 = vmul.f32 %v1195_v42, %v1189_v7 }
 0x7d8   :  { %v1182_v29 = vand.u32 2147483648, %v1170_v31  ;;  %v1180_v14 = vand.u32 2147483647, %v1170_v31  ;;  %vm1176_vm4 = vweird.f32 %v1170_v31  ;;  %v1160_v23 = vmul.f32 %v1159_v54, %v3997_v21 }
 0x7d9   :  { %v1208_v50 = vadd.f32 0.4994258, %v1207_v25  ;;  %v4045_v5 = vmul.f32 0.70710677, %v4038_v24  ;;  %v1197_v11 = vadd.f32 0.18741608, %v1196_v36 }
 0x7da   :  { %v1183_v53 = vor.u32 1.1754944e-38, %v1182_v29  ;;  %vm1181_vm6 = vcmp.eq.f32.partialorder %v1180_v14, 8.507059e+37 }
 0x7db   :  { %v1209_v37 = vmul.f32 %v1208_v50, %v1189_v7  ;;  %v1228_v30 = vmul.f32 %v4045_v5, %v4045_v5  ;;  %v1198_v51 = vmul.f32 %v1197_v11, %v1189_v7 }
 0x7dd   :  { %v3237_v52 = vpop.eup %3236  ;;  %v1210_v26 = vadd.f32 1.0, %v1209_v37  ;;  %v4049_v33 = vmin.f32 %v1228_v30, 16.0  ;;  %v1199_v47 = vadd.f32 1.1283791, %v1198_v51 }
 0x7de   :  { %v1172_v4 = vmul.f32 %v3237_v52, %v1170_v31  ;;  %v1128_v63 = vpop.f32.mrf.mxu3  ;;  %vm1177_vm3 = vweird.f32 %v3237_v52 }
 0x7df   :  { %v4052_v61 = vadd.f32 %v3988_v16, %v1128_v63  ;;  %3238 = vrcp.f32 %v1210_v26  ;;  %v1230_v9 = vmul.f32 2.1237322e-06, %v4049_v33  ;;  %v1241_v46 = vmul.f32 3.8918573e-05, %v4049_v33  ;;  %vm1178_vm5 = vmor %vm1176_vm4, %vm1177_vm3 }
 0x7e0   :  { %v1173_v41 = vsub.f32 1.0, %v1172_v4  ;;  %v1220_v25 = vand.u32 2147483647, %v1210_v26  ;;  %v1222_v27 = vand.u32 2147483648, %v1210_v26  ;;  %vm1216_vm9 = vweird.f32 %v1210_v26 }
 0x7e1   :  { %v4057_v12 = vmul.f32 0.70710677, %v4052_v61  ;;  %v1231_v1 = vadd.f32 0.00028619796, %v1230_v9  ;;  %v1242_v0 = vadd.f32 0.001143296, %v1241_v46  ;;  %v1200_v29 = vmul.f32 %v1199_v47, %v4015_v39 }
 0x7e2   :  { %v1174_v10 = vmul.f32 %v3237_v52, %v1173_v41  ;;  %vm1221_vm11 = vcmp.eq.f32.partialorder %v1220_v25, 8.507059e+37  ;;  %v1223_v9 = vor.u32 1.1754944e-38, %v1222_v27 }
 0x7e3   :  { %v1268_v3 = vmul.f32 %v4057_v12, %v4057_v12  ;;  %v1243_v55 = vmul.f32 %v1242_v0, %v4049_v33  ;;  %v1232_v13 = vmul.f32 %v1231_v1, %v4049_v33 }
 0x7e4   :  { %v1175_v45 = vadd.f32 %v3237_v52, %v1174_v10 }
 0x7e5   :  { %v3239_v32 = vpop.eup %3238  ;;  %v4062_v6 = vmin.f32 %v1268_v3, 16.0  ;;  %v1244_v2 = vadd.f32 0.014752088, %v1243_v55  ;;  %v1233_v4 = vadd.f32 0.0036580483, %v1232_v13 }
 0x7e6   :  { %v1179_v35 = vsel %vm1178_vm5, %v3237_v52, %v1175_v45  ;;  %v1131_v20 = vpop.f32.mrf.mxu3  ;;  %v1212_v7 = vmul.f32 %v3239_v32, %v1210_v26  ;;  %vm1217_vm7 = vweird.f32 %v3239_v32 }
 0x7e7   :  { %v1184_v56 = vsel %vm1181_vm6, %v1183_v53, %v1179_v35  ;;  %v1270_v28 = vmul.f32 2.1237322e-06, %v4062_v6  ;;  %v4068_v31 = vadd.f32 %v3988_v16, %v1131_v20  ;;  %v1281_v48 = vmul.f32 3.8918573e-05, %v4062_v6  ;;  %vm1218_vm10 = vmor %vm1216_vm9, %vm1217_vm7 }
 0x7e8   :  { %v1213_v42 = vsub.f32 1.0, %v1212_v7  ;;  %v1185_v37 = vmul.f32 %v1184_v56, %v1160_v23  ;;  %v1245_v58 = vmul.f32 %v1244_v2, %v4049_v33  ;;  %v1234_v3 = vmul.f32 %v1233_v4, %v4049_v33 }
 0x7e9   :  { %v1271_v50 = vadd.f32 0.00028619796, %v1270_v28  ;;  %v4073_v36 = vmul.f32 0.70710677, %v4068_v31  ;;  %v1282_v30 = vadd.f32 0.001143296, %v1281_v48 }
 0x7ea   :  { %v1214_v52 = vmul.f32 %v3239_v32, %v1213_v42  ;;  %v1246_v41 = vadd.f32 0.112945676, %v1245_v58  ;;  %v2935_v14 = vclamps-f32 %v1185_v37, 1.0  ;;  %v1136_v20 = vmul.f32 0.5, %v3991_v15 }
 0x7eb   :  { %v1272_v63 = vmul.f32 %v1271_v50, %v4062_v6  ;;  %v1308_v21 = vmul.f32 %v4073_v36, %v4073_v36  ;;  %v1283_v38 = vmul.f32 %v1282_v30, %v4062_v6  ;;  %v1235_v28 = vadd.f32 0.05243302, %v1234_v3 }
 0x7ec   :  { %v1215_v11 = vadd.f32 %v3239_v32, %v1214_v52  ;;  %v1247_v45 = vmul.f32 %v1246_v41, %v4049_v33  ;;  %v1388_v47 = vadd.f32 1.0, %v2935_v14 }
 0x7ed   :  { %v4082_v10 = vmin.f32 %v1308_v21, 16.0  ;;  %v1273_v0 = vadd.f32 0.0036580483, %v1272_v63  ;;  %v1284_v54 = vadd.f32 0.014752088, %v1283_v38  ;;  %v1236_v4 = vmul.f32 %v1235_v28, %v4049_v33 }
 0x7ee   :  { %v1133_v46 = vpop.f32.mrf.mxu3  ;;  %v1219_v51 = vsel %vm1218_vm10, %v3239_v32, %v1215_v11  ;;  %v1137_v32 = vmul.f32 0.5, %v4009_v59  ;;  %v1248_v55 = vadd.f32 0.4994258, %v1247_v45  ;;  %v1394_v37 = vmul.f32 %v1388_v47, %v1136_v20 }
 0x7ef   :  { %v4085_v1 = vadd.f32 %v3988_v16, %v1133_v46  ;;  %v1224_v26 = vsel %vm1221_vm11, %v1223_v9, %v1219_v51  ;;  %v1310_v35 = vmul.f32 2.1237322e-06, %v4082_v10  ;;  %v1285_v16 = vmul.f32 %v1284_v54, %v4062_v6 }
 0x7f0   :  { %v1225_v39 = vmul.f32 %v1224_v26, %v1200_v29  ;;  %v1321_v56 = vmul.f32 3.8918573e-05, %v4082_v10  ;;  %v1274_v2 = vmul.f32 %v1273_v0, %v4062_v6  ;;  %v1249_v23 = vmul.f32 %v1248_v55, %v4049_v33 }
 0x7f1   :  { %v4091_v53 = vmul.f32 0.70710677, %v4085_v1  ;;  %v1286_v42 = vadd.f32 0.112945676, %v1285_v16  ;;  %v1311_v15 = vadd.f32 0.00028619796, %v1310_v35 }
 0x7f2   :  { %v2936_v7 = vclamps-f32 %v1225_v39, 1.0  ;;  %v1322_v59 = vadd.f32 0.001143296, %v1321_v56  ;;  %v1250_v27 = vadd.f32 1.0, %v1249_v23  ;;  %v1275_v63 = vadd.f32 0.05243302, %v1274_v2 }
 0x7f3   :  { %v1348_v13 = vmul.f32 %v4091_v53, %v4091_v53  ;;  %v1287_v50 = vmul.f32 %v1286_v42, %v4062_v6  ;;  %v1312_v41 = vmul.f32 %v1311_v15, %v4082_v10  ;;  %v1237_v46 = vadd.f32 0.18741608, %v1236_v4 }
 0x7f4   :  { %v1389_v25 = vadd.f32 1.0, %v2936_v7  ;;  %v1323_v30 = vmul.f32 %v1322_v59, %v4082_v10  ;;  %3240 = vrcp.f32 %v1250_v27  ;;  %v1276_v14 = vmul.f32 %v1275_v63, %v4062_v6 }
 0x7f5   :  { %v4101_v48 = vmin.f32 %v1348_v13, 16.0  ;;  %v1288_v29 = vadd.f32 0.4994258, %v1287_v50  ;;  %v1313_v26 = vadd.f32 0.0036580483, %v1312_v41  ;;  %v1238_v55 = vmul.f32 %v1237_v46, %v4049_v33 }
 0x7f6   :  { %v1395_v52 = vmul.f32 %v1389_v25, %v1137_v32  ;;  %v1324_v9 = vadd.f32 0.014752088, %v1323_v30  ;;  %v1277_v16 = vadd.f32 0.18741608, %v1276_v14  ;;  %v1262_v28 = vand.u32 2147483648, %v1250_v27 }
 0x7f7   :  { %v1350_v58 = vmul.f32 2.1237322e-06, %v4101_v48  ;;  %v1361_v21 = vmul.f32 3.8918573e-05, %v4101_v48  ;;  %v1289_v51 = vmul.f32 %v1288_v29, %v4062_v6  ;;  %v1314_v47 = vmul.f32 %v1313_v26, %v4082_v10 }
 0x7f8   :  { %v1400_v11 = vpack.c.bf16 %v1395_v52, %v1394_v37  ;;  %v1325_v3 = vmul.f32 %v1324_v9, %v4082_v10  ;;  %v1260_v42 = vand.u32 2147483647, %v1250_v27  ;;  %v1239_v15 = vadd.f32 1.1283791, %v1238_v55 }
 0x7f9   :  { %v1351_v38 = vadd.f32 0.00028619796, %v1350_v58  ;;  %v1362_v45 = vadd.f32 0.001143296, %v1361_v21  ;;  %v1290_v39 = vadd.f32 1.0, %v1289_v51  ;;  %v1278_v59 = vmul.f32 %v1277_v16, %v4062_v6 }
 0x7fa   :  { %1477 = vmatmul.bf16.vlgmr.msrb.gmra.mxu0 %v1400_v11  ;;  %v3241_v0 = vpop.eup %3240  ;;  %v1326_v32 = vadd.f32 0.112945676, %v1325_v3  ;;  %v1315_v33 = vadd.f32 0.05243302, %v1314_v47  ;;  %vm1256_vm14 = vweird.f32 %v1250_v27  ;;  %v1263_v4 = vor.u32 1.1754944e-38, %v1262_v28 }
 0x7fb   :  { %v1352_v54 = vmul.f32 %v1351_v38, %v4101_v48  ;;  %v1363_v35 = vmul.f32 %v1362_v45, %v4101_v48  ;;  %v1252_v20 = vmul.f32 %v3241_v0, %v1250_v27  ;;  %3242 = vrcp.f32 %v1290_v39 }
 0x7fc   :  { %v1327_v13 = vmul.f32 %v1326_v32, %v4082_v10  ;;  %vm1257_vm13 = vweird.f32 %v3241_v0  ;;  %vm1261_vm1 = vcmp.eq.f32.partialorder %v1260_v42, 8.507059e+37  ;;  %v1240_v29 = vmul.f32 %v1239_v15, %v4045_v5 }
 0x7fd   :  { %v1253_v7 = vsub.f32 1.0, %v1252_v20  ;;  %v1353_v56 = vadd.f32 0.0036580483, %v1352_v54  ;;  %v1364_v2 = vadd.f32 0.014752088, %v1363_v35  ;;  %vm1258_vm15 = vmor %vm1256_vm14, %vm1257_vm13  ;;  %v1316_v27 = vmul.f32 %v1315_v33, %v4082_v10 }
 0x7fe   :  { %v1328_v25 = vadd.f32 0.4994258, %v1327_v13  ;;  %v1279_v9 = vadd.f32 1.1283791, %v1278_v59  ;;  %v1300_v51 = vand.u32 2147483647, %v1290_v39  ;;  %vm1296_vm3 = vweird.f32 %v1290_v39 }
 0x7ff   :  { %v1254_v23 = vmul.f32 %v3241_v0, %v1253_v7  ;;  %v1365_v50 = vmul.f32 %v1364_v2, %v4101_v48  ;;  %v1354_v30 = vmul.f32 %v1353_v56, %v4101_v48  ;;  %v1302_v45 = vand.u32 2147483648, %v1290_v39 }
 0x800   :  { %v1329_v52 = vmul.f32 %v1328_v25, %v4082_v10  ;;  %v1280_v20 = vmul.f32 %v1279_v9, %v4057_v12  ;;  %v1317_v32 = vadd.f32 0.18741608, %v1316_v27  ;;  %vm1301_vm5 = vcmp.eq.f32.partialorder %v1300_v51, 8.507059e+37 }
 0x801   :  { %v1255_v37 = vadd.f32 %v3241_v0, %v1254_v23  ;;  %v3243_v58 = vpop.eup %3242  ;;  %v1366_v63 = vadd.f32 0.112945676, %v1365_v50  ;;  %v1355_v14 = vadd.f32 0.05243302, %v1354_v30  ;;  %v1303_v55 = vor.u32 1.1754944e-38, %v1302_v45 }
 0x802   :  { %v1292_v11 = vmul.f32 %v3243_v58, %v1290_v39  ;;  %v1330_v38 = vadd.f32 1.0, %v1329_v52  ;;  %vm1297_vm2 = vweird.f32 %v3243_v58  ;;  %v1318_v39 = vmul.f32 %v1317_v32, %v4082_v10 }
 0x803   :  { %v1259_v21 = vsel %vm1258_vm15, %v3241_v0, %v1255_v37  ;;  %v1367_v6 = vmul.f32 %v1366_v63, %v4101_v48  ;;  %v1356_v5 = vmul.f32 %v1355_v14, %v4101_v48  ;;  %vm1298_vm4 = vmor %vm1296_vm3, %vm1297_vm2  ;;  %v1138_v15 = vmul.f32 0.5, %v4038_v24 }
 0x804   :  { %v1264_v41 = vsel %vm1261_vm1, %v1263_v4, %v1259_v21  ;;  %v1293_v46 = vsub.f32 1.0, %v1292_v11  ;;  %3244 = vrcp.f32 %v1330_v38  ;;  %v1139_v59 = vmul.f32 0.5, %v4052_v61 }
 0x805   :  { %v1265_v26 = vmul.f32 %v1264_v41, %v1240_v29  ;;  %v1368_v0 = vadd.f32 0.4994258, %v1367_v6  ;;  %v1357_v23 = vadd.f32 0.18741608, %v1356_v5  ;;  %v1342_v50 = vand.u32 2147483648, %v1330_v38 }
 0x806   :  { %v1294_v3 = vmul.f32 %v3243_v58, %v1293_v46  ;;  %v1340_v52 = vand.u32 2147483647, %v1330_v38  ;;  %vm1336_vm7 = vweird.f32 %v1330_v38  ;;  %v1140_v32 = vmul.f32 0.5, %v4068_v31 }
 0x807   :  { %v1369_v35 = vmul.f32 %v1368_v0, %v4101_v48  ;;  %v2937_v16 = vclamps-f32 %v1265_v26, 1.0  ;;  %v1358_v30 = vmul.f32 %v1357_v23, %v4101_v48  ;;  %v1343_v11 = vor.u32 1.1754944e-38, %v1342_v50 }
 0x808   :  { %v1295_v54 = vadd.f32 %v3243_v58, %v1294_v3  ;;  %vm1341_vm10 = vcmp.eq.f32.partialorder %v1340_v52, 8.507059e+37  ;;  %v1141_v5 = vmul.f32 0.5, %v4085_v1 }
 0x809   :  { %v1370_v7 = vadd.f32 1.0, %v1369_v35  ;;  %v1390_v25 = vadd.f32 1.0, %v2937_v16  ;;  %v1359_v27 = vadd.f32 1.1283791, %v1358_v30 }
 0x80a   :  { %v1299_v47 = vsel %vm1298_vm4, %v3243_v58, %v1295_v54  ;;  %v3245_v13 = vpop.eup %3244  ;;  %v1319_v58 = vadd.f32 1.1283791, %v1318_v39 }
 0x80b   :  { %v1304_v56 = vsel %vm1301_vm5, %v1303_v55, %v1299_v47  ;;  %v1332_v2 = vmul.f32 %v3245_v13, %v1330_v38  ;;  %3246 = vrcp.f32 %v1370_v7  ;;  %vm1337_vm6 = vweird.f32 %v3245_v13 }
 0x80c   :  { %v1305_v28 = vmul.f32 %v1304_v56, %v1280_v20  ;;  %v1396_v63 = vmul.f32 %v1390_v25, %v1138_v15  ;;  %vm1338_vm9 = vmor %vm1336_vm7, %vm1337_vm6  ;;  %v1320_v61 = vmul.f32 %v1319_v58, %v4073_v36  ;;  %v1382_v46 = vand.u32 2147483648, %v1370_v7 }
 0x80d   :  { %v1333_v12 = vsub.f32 1.0, %v1332_v2  ;;  %v1380_v51 = vand.u32 2147483647, %v1370_v7  ;;  %vm1376_vm13 = vweird.f32 %v1370_v7  ;;  %v1360_v26 = vmul.f32 %v1359_v27, %v4091_v53  ;;  %v3139_v53 = vld [vmem:[%s4784_s1 + $0xb] ss:$0 sm:$0xff] }
 0x80e   :  { %v2938_v42 = vclamps-f32 %v1305_v28, 1.0  ;;  %v1383_v38 = vor.u32 1.1754944e-38, %v1382_v46 }
 0x80f   :  { %v1334_v37 = vmul.f32 %v3245_v13, %v1333_v12  ;;  %vm1381_vm15 = vcmp.eq.f32.partialorder %v1380_v51, 8.507059e+37 }
 0x810   :  { %v1391_v33 = vadd.f32 1.0, %v2938_v42 }
 0x811   :  { %v3247_v4 = vpop.eup %3246  ;;  %v1335_v10 = vadd.f32 %v3245_v13, %v1334_v37 }
 0x812   :  { %v1397_v21 = vmul.f32 %v1391_v33, %v1139_v59  ;;  %v1372_v41 = vmul.f32 %v3247_v4, %v1370_v7  ;;  %vm1377_vm11 = vweird.f32 %v3247_v4 }
 0x813   :  { %v1339_v24 = vsel %vm1338_vm9, %v3245_v13, %v1335_v10  ;;  %vm1378_vm14 = vmor %vm1376_vm13, %vm1377_vm11 }
 0x814   :  { %v1401_v6 = vpack.c.bf16 %v1397_v21, %v1396_v63  ;;  %v1344_v29 = vsel %vm1341_vm10, %v1343_v11, %v1339_v24  ;;  %v1373_v9 = vsub.f32 1.0, %v1372_v41 }
 0x815   :  { %v1345_v14 = vmul.f32 %v1344_v29, %v1320_v61 }
 0x816   :  { %1482 = vmatmul.bf16.gmra.mxu0 %v1401_v6  ;;  %v1374_v48 = vmul.f32 %v3247_v4, %v1373_v9 }
 0x817   :  { %v2939_v3 = vclamps-f32 %v1345_v14, 1.0 }
 0x818   :  { %v1375_v45 = vadd.f32 %v3247_v4, %v1374_v48 }
 0x819   :  { %v1392_v20 = vadd.f32 1.0, %v2939_v3 }
 0x81a   :  { %v1379_v0 = vsel %vm1378_vm14, %v3247_v4, %v1375_v45 }
 0x81b   :  { %v1384_v54 = vsel %vm1381_vm15, %v1383_v38, %v1379_v0  ;;  %v1398_v16 = vmul.f32 %v1392_v20, %v1140_v32 }
 0x81c   :  { %v1385_v36 = vmul.f32 %v1384_v54, %v1360_v26 }
 0x81e   :  { %v2940_v35 = vclamps-f32 %v1385_v36, 1.0 }
 0x820   :  { %v1393_v55 = vadd.f32 1.0, %v2940_v35 }
 0x822   :  { %v1399_v47 = vmul.f32 %v1393_v55, %v1141_v5 }
 0x824   :  { %v1402_v13 = vpack.c.bf16 %v1399_v47, %v1398_v16 }
 0x826   :  { %1487 = vmatmul.bf16.gmra.mxu0 %v1402_v13 }
 0x877   :  { %v1478_v7 = vpop.f32.mrf.mxu0 }
 0x878   :  { %v1479_v56 = vadd.f32 %v3139_v53, %v1478_v7  ;;  %v3102_v7 = vld [vmem:[%s4785_s2 + $0x18] sm:$0xff] }
 0x879   :  { %1684 = vmatpush.bf16.msra.mxu2 %v3102_v7 }
 0x87a   :  { %v4139_v28 = vadd.f32 %v1479_v56, %v3871_v57 }
 0x87c   :  { %v1499_v2 = vsel %vm117_vm0, %v4139_v28, 0.0 }
 0x87d   :  { %1500 = vadd.xlane.f32.xlu1 %v1499_v2 }
 0x87f   :  { %v1480_v31 = vpop.f32.mrf.mxu0 }
 0x880   :  { %v1481_v1 = vadd.f32 %v3139_v53, %v1480_v31  ;;  %v3101_v31 = vld [vmem:[%s4785_s2 + $0x10] sm:$0xff] }
 0x881   :  { %1685 = vmatpush.bf16.msra.mxu2 %v3101_v31 }
 0x882   :  { %v4144_v39 = vadd.f32 %v1481_v1, %v3876_v22 }
 0x884   :  { %v1502_v23 = vsel %vm117_vm0, %v4144_v39, 0.0 }
 0x885   :  { %1503 = vadd.xlane.f32.xlu2 %v1502_v23 }
 0x893   :  { %v1483_v42 = vpop.f32.mrf.mxu0 }
 0x894   :  { %v1484_v25 = vadd.f32 %v3139_v53, %v1483_v42 }
 0x896   :  { %v4149_v12 = vadd.f32 %v1484_v25, %v3881_v44 }
 0x898   :  { %v1505_v57 = vsel %vm117_vm0, %v4149_v12, 0.0 }
 0x899   :  { %1506 = vadd.xlane.f32.xlu0 %v1505_v57 }
 0x89b   :  { %v1485_v15 = vpop.f32.mrf.mxu0 }
 0x89c   :  { %v1486_v59 = vadd.f32 %v3139_v53, %v1485_v15 }
 0x89e   :  { %v4154_v50 = vadd.f32 %v1486_v59, %v3886_v40 }
 0x8a0   :  { %v1508_v22 = vsel %vm117_vm0, %v4154_v50, 0.0 }
 0x8a1   :  { %1509 = vadd.xlane.f32.xlu1 %v1508_v22 }
 0x8a3   :  { %v1488_v33 = vpop.f32.mrf.mxu0 }
 0x8a4   :  { %v1489_v37 = vadd.f32 %v3139_v53, %v1488_v33 }
 0x8a6   :  { %v4159_v52 = vadd.f32 %v1489_v37, %v3891_v17 }
 0x8a8   :  { %v1511_v44 = vsel %vm117_vm0, %v4159_v52, 0.0 }
 0x8a9   :  { %1512 = vadd.xlane.f32.xlu2 %v1511_v44 }
 0x8ab   :  { %v1490_v58 = vpop.f32.mrf.mxu0 }
 0x8ac   :  { %v1491_v30 = vadd.f32 %v3139_v53, %v1490_v58 }
 0x8ae   :  { %v4164_v4 = vadd.f32 %v1491_v30, %v3896_v43 }
 0x8b0   :  { %v1514_v40 = vsel %vm117_vm0, %v4164_v4, 0.0 }
 0x8b1   :  { %1515 = vadd.xlane.f32.xlu0 %v1514_v40  ;;  %v4221_v40 = vld [vmem:[%s4784_s1 + $0xc] ss:$0 sm:$0xff] }
 0x8f0   :  { %v1501_v63 = vpop.xlane.xlu1 %1500 }
 0x8f1   :  { %v1517_v21 = vmul.f32 %v1501_v63, %v3410_v18 }
 0x8f3   :  { %v4170_v10 = vsub.f32 %v4139_v28, %v1517_v21 }
 0x8f5   :  { %v1529_v17 = vmul.f32 %v4170_v10, %v4170_v10 }
 0x8f7   :  { %v1535_v11 = vsel %vm117_vm0, %v1529_v17, 0.0 }
 0x8f8   :  { %1536 = vadd.xlane.f32.xlu1 %v1535_v11  ;;  %v1504_v41 = vpop.xlane.xlu2 %1503  ;;  %v4227_v11 = vld [vmem:[%s4784_s1 + $0xd] ss:$0 sm:$0xff] }
 0x8f9   :  { %v1518_v43 = vmul.f32 %v1504_v41, %v3410_v18 }
 0x8fb   :  { %v4177_v6 = vsub.f32 %v4144_v39, %v1518_v43 }
 0x8fd   :  { %v1530_v24 = vmul.f32 %v4177_v6, %v4177_v6 }
 0x8ff   :  { %v1538_v61 = vsel %vm117_vm0, %v1530_v24, 0.0 }
 0x900   :  { %1539 = vadd.xlane.f32.xlu2 %v1538_v61 }
 0x90c   :  { %v1507_v29 = vpop.xlane.xlu0 %1506 }
 0x90d   :  { %v1519_v9 = vmul.f32 %v1507_v29, %v3410_v18 }
 0x90f   :  { %v4184_v27 = vsub.f32 %v4149_v12, %v1519_v9 }
 0x911   :  { %v1531_v46 = vmul.f32 %v4184_v27, %v4184_v27 }
 0x913   :  { %v1541_v14 = vsel %vm117_vm0, %v1531_v46, 0.0 }
 0x914   :  { %v1510_v48 = vpop.xlane.xlu1 %1509  ;;  %1542 = vadd.xlane.f32.xlu0 %v1541_v14 }
 0x915   :  { %v1520_v51 = vmul.f32 %v1510_v48, %v3410_v18 }
 0x917   :  { %v4191_v45 = vsub.f32 %v4154_v50, %v1520_v51 }
 0x919   :  { %v1532_v38 = vmul.f32 %v4191_v45, %v4191_v45 }
 0x91b   :  { %v1544_v26 = vsel %vm117_vm0, %v1532_v38, 0.0 }
 0x91c   :  { %1545 = vadd.xlane.f32.xlu1 %v1544_v26  ;;  %v1513_v3 = vpop.xlane.xlu2 %1512 }
 0x91d   :  { %v1521_v0 = vmul.f32 %v1513_v3, %v3410_v18 }
 0x91f   :  { %v4198_v54 = vsub.f32 %v4159_v52, %v1521_v0 }
 0x921   :  { %v1533_v36 = vmul.f32 %v4198_v54, %v4198_v54 }
 0x923   :  { %v1547_v35 = vsel %vm117_vm0, %v1533_v36, 0.0 }
 0x924   :  { %v1516_v20 = vpop.xlane.xlu0 %1515  ;;  %1548 = vadd.xlane.f32.xlu2 %v1547_v35 }
 0x925   :  { %v1522_v32 = vmul.f32 %v1516_v20, %v3410_v18 }
 0x927   :  { %v4205_v5 = vsub.f32 %v4164_v4, %v1522_v32 }
 0x929   :  { %v1534_v55 = vmul.f32 %v4205_v5, %v4205_v5 }
 0x92b   :  { %v1550_v16 = vsel %vm117_vm0, %v1534_v55, 0.0 }
 0x92c   :  { %1551 = vadd.xlane.f32.xlu0 %v1550_v16 }
 0x96b   :  { %v1537_v47 = vpop.xlane.xlu1 %1536 }
 0x96c   :  { %v1553_v13 = vmul.f32 %v1537_v47, %v3410_v18 }
 0x96e   :  { %v1559_v53 = vadd.f32 1e-05, %v1553_v13 }
 0x970   :  { %3248 = vrsqrt.f32 %v1559_v53  ;;  %vm1571_vm2 = vweird.f32 %v1559_v53 }
 0x973   :  { %v1540_v56 = vpop.xlane.xlu2 %1539 }
 0x974   :  { %v1554_v2 = vmul.f32 %v1540_v56, %v3410_v18 }
 0x976   :  { %v3249_v1 = vpop.eup %3248  ;;  %v1560_v23 = vadd.f32 1e-05, %v1554_v2 }
 0x977   :  { %v1566_v42 = vmul.f32 %v3249_v1, %v1559_v53  ;;  %vm1572_vm1 = vweird.f32 %v3249_v1 }
 0x978   :  { %3250 = vrsqrt.f32 %v1560_v23  ;;  %vm1573_vm3 = vmor %vm1571_vm2, %vm1572_vm1  ;;  %vm1581_vm5 = vweird.f32 %v1560_v23 }
 0x979   :  { %v1567_v25 = vmul.f32 %v3249_v1, %v1566_v42 }
 0x97b   :  { %v1568_v57 = vmul.f32 0.5, %v1567_v25 }
 0x97d   :  { %v1569_v15 = vsub.f32 1.5, %v1568_v57 }
 0x97e   :  { %v3251_v59 = vpop.eup %3250 }
 0x97f   :  { %v1570_v22 = vmul.f32 %v3249_v1, %v1569_v15  ;;  %v1576_v33 = vmul.f32 %v3251_v59, %v1560_v23  ;;  %vm1582_vm4 = vweird.f32 %v3251_v59 }
 0x980   :  { %vm1583_vm6 = vmor %vm1581_vm5, %vm1582_vm4 }
 0x981   :  { %v1577_v37 = vmul.f32 %v3251_v59, %v1576_v33  ;;  %v1574_v44 = vsel %vm1573_vm3, %v3249_v1, %v1570_v22 }
 0x982   :  { %v1625_v63 = vmul.f32 %v1574_v44, %v4170_v10 }
 0x983   :  { %v1578_v58 = vmul.f32 0.5, %v1577_v37 }
 0x984   :  { %v1633_v41 = vmul.f32 %v4221_v40, %v1625_v63 }
 0x985   :  { %v1579_v30 = vsub.f32 1.5, %v1578_v58 }
 0x986   :  { %v1641_v10 = vadd.f32 %v4227_v11, %v1633_v41 }
 0x987   :  { %v1580_v21 = vmul.f32 %v3251_v59, %v1579_v30  ;;  %v1543_v24 = vpop.xlane.xlu0 %1542 }
 0x988   :  { %v1555_v29 = vmul.f32 %v1543_v24, %v3410_v18 }
 0x989   :  { %v1584_v17 = vsel %vm1583_vm6, %v3251_v59, %v1580_v21 }
 0x98a   :  { %v1626_v43 = vmul.f32 %v1584_v17, %v4177_v6  ;;  %v1561_v46 = vadd.f32 1e-05, %v1555_v29 }
 0x98c   :  { %v1634_v61 = vmul.f32 %v4221_v40, %v1626_v43  ;;  %3252 = vrsqrt.f32 %v1561_v46  ;;  %vm1591_vm9 = vweird.f32 %v1561_v46 }
 0x98e   :  { %v1642_v9 = vadd.f32 %v4227_v11, %v1634_v61 }
 0x98f   :  { %v1546_v48 = vpop.xlane.xlu1 %1545 }
 0x990   :  { %v1647_v14 = vpack.c.bf16 %v1642_v9, %v1641_v10  ;;  %v1556_v51 = vmul.f32 %v1546_v48, %v3410_v18 }
 0x992   :  { %2985 = vmatmul.msk.bf16.vlgmr.msra.gmra.mxu2 %vm117_vm0, %v1647_v14  ;;  %v3253_v38 = vpop.eup %3252  ;;  %v1562_v26 = vadd.f32 1e-05, %v1556_v51 }
 0x993   :  { %v1586_v6 = vmul.f32 %v3253_v38, %v1561_v46  ;;  %vm1592_vm7 = vweird.f32 %v3253_v38 }
 0x994   :  { %3254 = vrsqrt.f32 %v1562_v26  ;;  %vm1593_vm10 = vmor %vm1591_vm9, %vm1592_vm7  ;;  %vm1601_vm13 = vweird.f32 %v1562_v26 }
 0x995   :  { %v1587_v3 = vmul.f32 %v3253_v38, %v1586_v6 }
 0x997   :  { %v1588_v0 = vmul.f32 0.5, %v1587_v3  ;;  %v1549_v36 = vpop.xlane.xlu2 %1548 }
 0x998   :  { %v1557_v20 = vmul.f32 %v1549_v36, %v3410_v18 }
 0x999   :  { %v1589_v35 = vsub.f32 1.5, %v1588_v0  ;;  %v3142_v0 = vld [vmem:[%s4784_s1 + $0x10] ss:$0 sm:$0xff] }
 0x99a   :  { %v3255_v32 = vpop.eup %3254  ;;  %v1563_v47 = vadd.f32 1e-05, %v1557_v20 }
 0x99b   :  { %v1590_v55 = vmul.f32 %v3253_v38, %v1589_v35  ;;  %v1596_v16 = vmul.f32 %v3255_v32, %v1562_v26  ;;  %vm1602_vm11 = vweird.f32 %v3255_v32 }
 0x99c   :  { %3256 = vrsqrt.f32 %v1563_v47  ;;  %vm1603_vm14 = vmor %vm1601_vm13, %vm1602_vm11  ;;  %vm1611_vm1 = vweird.f32 %v1563_v47 }
 0x99d   :  { %v1597_v13 = vmul.f32 %v3255_v32, %v1596_v16  ;;  %v1594_v53 = vsel %vm1593_vm10, %v3253_v38, %v1590_v55 }
 0x99e   :  { %v1627_v1 = vmul.f32 %v1594_v53, %v4184_v27 }
 0x99f   :  { %v1598_v7 = vmul.f32 0.5, %v1597_v13  ;;  %v1552_v56 = vpop.xlane.xlu0 %1551 }
 0x9a0   :  { %v1558_v31 = vmul.f32 %v1552_v56, %v3410_v18  ;;  %v1635_v33 = vmul.f32 %v4221_v40, %v1627_v1 }
 0x9a1   :  { %v1599_v2 = vsub.f32 1.5, %v1598_v7 }
 0x9a2   :  { %v3257_v23 = vpop.eup %3256  ;;  %v1564_v25 = vadd.f32 1e-05, %v1558_v31  ;;  %v1643_v30 = vadd.f32 %v4227_v11, %v1635_v33 }
 0x9a3   :  { %v1600_v42 = vmul.f32 %v3255_v32, %v1599_v2  ;;  %v1606_v57 = vmul.f32 %v3257_v23, %v1563_v47  ;;  %vm1612_vm15 = vweird.f32 %v3257_v23 }
 0x9a4   :  { %3258 = vrsqrt.f32 %v1564_v25  ;;  %vm1613_vm2 = vmor %vm1611_vm1, %vm1612_vm15  ;;  %vm1621_vm4 = vweird.f32 %v1564_v25 }
 0x9a5   :  { %v1604_v15 = vsel %vm1603_vm14, %v3255_v32, %v1600_v42  ;;  %v1607_v22 = vmul.f32 %v3257_v23, %v1606_v57 }
 0x9a6   :  { %v1628_v59 = vmul.f32 %v1604_v15, %v4191_v45 }
 0x9a7   :  { %v1608_v37 = vmul.f32 0.5, %v1607_v22 }
 0x9a8   :  { %v1636_v44 = vmul.f32 %v4221_v40, %v1628_v59 }
 0x9a9   :  { %v1609_v58 = vsub.f32 1.5, %v1608_v37 }
 0x9aa   :  { %v1644_v27 = vadd.f32 %v4227_v11, %v1636_v44  ;;  %v3259_v63 = vpop.eup %3258 }
 0x9ab   :  { %v1610_v21 = vmul.f32 %v3257_v23, %v1609_v58  ;;  %v1616_v17 = vmul.f32 %v3259_v63, %v1564_v25  ;;  %vm1622_vm3 = vweird.f32 %v3259_v63 }
 0x9ac   :  { %v1648_v41 = vpack.c.bf16 %v1644_v27, %v1643_v30  ;;  %vm1623_vm5 = vmor %vm1621_vm4, %vm1622_vm3 }
 0x9ad   :  { %v1617_v43 = vmul.f32 %v3259_v63, %v1616_v17  ;;  %v1614_v45 = vsel %vm1613_vm2, %v3257_v23, %v1610_v21 }
 0x9ae   :  { %2986 = vmatmul.msk.bf16.gmra.mxu2 %vm117_vm0, %v1648_v41  ;;  %v1629_v29 = vmul.f32 %v1614_v45, %v4198_v54 }
 0x9af   :  { %v1618_v24 = vmul.f32 0.5, %v1617_v43 }
 0x9b0   :  { %v1637_v14 = vmul.f32 %v4221_v40, %v1629_v29 }
 0x9b1   :  { %v1619_v61 = vsub.f32 1.5, %v1618_v24 }
 0x9b2   :  { %v1645_v51 = vadd.f32 %v4227_v11, %v1637_v14 }
 0x9b3   :  { %v1620_v10 = vmul.f32 %v3259_v63, %v1619_v61 }
 0x9b5   :  { %v1624_v9 = vsel %vm1623_vm5, %v3259_v63, %v1620_v10 }
 0x9b6   :  { %v1630_v46 = vmul.f32 %v1624_v9, %v4205_v5 }
 0x9b8   :  { %v1638_v48 = vmul.f32 %v4221_v40, %v1630_v46 }
 0x9ba   :  { %v1646_v38 = vadd.f32 %v4227_v11, %v1638_v48 }
 0x9bc   :  { %v1649_v26 = vpack.c.bf16 %v1646_v38, %v1645_v51 }
 0x9be   :  { %2987 = vmatmul.msk.bf16.gmra.mxu2 %vm117_vm0, %v1649_v26 }
 0xa15   :  { %v1687_v6 = vpop.f32.mrf.mxu2 }
 0xa16   :  { %v1688_v11 = vadd.f32 %v3142_v0, %v1687_v6 }
 0xa1d   :  { %v1689_v3 = vpop.f32.mrf.mxu2 }
 0xa1e   :  { %v1690_v40 = vadd.f32 %v3142_v0, %v1689_v3 }
 0xa20   :  { %v4260_v55 = vpack.c.bf16 %v1690_v40, %v1688_v11 }
 0xa31   :  { %v1692_v54 = vpop.f32.mrf.mxu2 }
 0xa32   :  { %v1693_v5 = vadd.f32 %v3142_v0, %v1692_v54 }
 0xa39   :  { %v1694_v36 = vpop.f32.mrf.mxu2 }
 0xa3a   :  { %v1695_v35 = vadd.f32 %v3142_v0, %v1694_v36 }
 0xa3c   :  { %v4256_v20 = vpack.c.bf16 %v1695_v35, %v1693_v5 }
 0xa3e   :  { %1710 = vrot.lane.b32.xlu0 %v4256_v20, %s3345_s22 }
 0xa41   :  { %v1697_v32 = vpop.f32.mrf.mxu2 }
 0xa42   :  { %v1698_v47 = vadd.f32 %v3142_v0, %v1697_v32 }
 0xa46   :  { %1708 = vrot.lane.b32.xlu0 %v4260_v55, %s3345_s22 }
 0xa49   :  { %v1699_v16 = vpop.f32.mrf.mxu2 }
 0xa4a   :  { %v1700_v13 = vadd.f32 %v3142_v0, %v1699_v16 }
 0xa4c   :  { %v4264_v53 = vpack.c.bf16 %v1700_v13, %v1698_v47 }
 0xa4e   :  { %1887 = vrot.lane.b32.xlu0 %v4256_v20, %s3347_s24  ;;  %1895 = vrot.lane.b32.xlu2 %v4264_v53, %s3346_s23 }
 0xa4f   :  { %1712 = vrot.lane.b32.xlu1 %v4264_v53, %s3345_s22 }
 0xa56   :  { %1891 = vrot.lane.b32.xlu2 %v4260_v55, %s3346_s23 }
 0xa57   :  { %1893 = vrot.lane.b32.xlu1 %v4256_v20, %s3346_s23 }
 0xa5e   :  { %1889 = vrot.lane.b32.xlu2 %v4264_v53, %s3347_s24 }
 0xa5f   :  { %1885 = vrot.lane.b32.xlu1 %v4260_v55, %s3347_s24 }
 0xa66   :  { %1841 = vrot.lane.b32.xlu2 %v4264_v53, %s3349_s25 }
 0xa67   :  { %1839 = vrot.lane.b32.xlu1 %v4256_v20, %s3349_s25 }
 0xaa8   :  { %v1896_v7 = vpop.permute.xlu2 %1895 }
 0xaa9   :  { %v1913_v56 = vsel %vm487_vm8, %v1896_v7, 0 }
 0xaaa   :  { %1920 = vmatpush.bf16.xpose.msra.mxu0 %v1913_v56 }
 0xab0   :  { %v1892_v2 = vpop.permute.xlu2 %1891  ;;  %v1711_v25 = vpop.permute.xlu0 %1710 }
 0xab1   :  { %v1727_v15 = vsel %vm487_vm8, %v1711_v25, 0  ;;  %v1907_v37 = vsel %vm487_vm8, %v1892_v2, 0 }
 0xab8   :  { %v1890_v31 = vpop.permute.xlu2 %1889  ;;  %v1709_v22 = vpop.permute.xlu0 %1708 }
 0xab9   :  { %v1724_v44 = vsel %vm487_vm8, %v1709_v22, 0 }
 0xac0   :  { %v1842_v1 = vpop.permute.xlu2 %1841  ;;  %v1888_v30 = vpop.permute.xlu0 %1887 }
 0xac1   :  { %v1713_v23 = vpop.permute.xlu1 %1712  ;;  %1860 = vmatpush.bf16.msrb.mxu3 %v1842_v1 }
 0xac2   :  { %v1730_v42 = vsel %vm487_vm8, %v1713_v23, 0 }
 0xac3   :  { %1737 = vmatpush.bf16.xpose.msrb.mxu1 %v1730_v42 }
 0xac9   :  { %v1894_v57 = vpop.permute.xlu1 %1893 }
 0xaca   :  { %v1910_v59 = vsel %vm487_vm8, %v1894_v57, 0 }
 0xacb   :  { %1738 = vmatpush.bf16.xpose.msrb.mxu1 %v1727_v15  ;;  %1921 = vmatpush.bf16.xpose.msra.mxu0 %v1910_v59 }
 0xad1   :  { %v1886_v33 = vpop.permute.xlu1 %1885 }
 0xad3   :  { %1739 = vmatpush.bf16.xpose.msrb.mxu1 %v1724_v44  ;;  %1922 = vmatpush.bf16.xpose.msra.mxu0 %v1907_v37 }
 0xad9   :  { %v1840_v58 = vpop.permute.xlu1 %1839 }
 0xada   :  { %2988 = vmatmul.msk.bf16.vlgmr.msrb.gmra.mxu1 %vm487_vm8, %v4260_v55  ;;  %1861 = vmatpush.bf16.msrb.mxu3 %v1840_v58 }
 0xadb   :  { %2996 = vmatmul.msk.bf16.vlgmr.msra.gmra.mxu0 %vm487_vm8, %v1886_v33 }
 0xaea   :  { %2989 = vmatmul.msk.bf16.gmra.mxu1 %vm487_vm8, %v4256_v20 }
 0xaeb   :  { %2997 = vmatmul.msk.bf16.gmra.mxu0 %vm487_vm8, %v1888_v30 }
 0xafa   :  { %2990 = vmatmul.msk.bf16.gmra.mxu1 %vm487_vm8, %v4264_v53 }
 0xafb   :  { %2998 = vmatmul.msk.bf16.gmra.mxu0 %vm487_vm8, %v1890_v31 }
 0xb57   :  { %v1741_v27 = vpop.f32.mrf.mxu1 }
 0xb58   :  { %v1756_v63 = vmul.f32 0.25, %v1741_v27  ;;  %v1924_v21 = vpop.f32.mrf.mxu0 }
 0xb59   :  { %v1939_v17 = vmul.f32 0.25, %v1924_v21 }
 0xb5a   :  { %v1762_v41 = vadd.f32 %v1756_v63, %v3671_v62 }
 0xb5b   :  { %v1945_v43 = vadd.f32 %v1939_v17, %v3671_v62 }
 0xb5c   :  { %v1768_v45 = vsel %vm542_vm12, %v1762_v41, -inf }
 0xb5d   :  { %1769 = vmax.xlane.f32.xlu1 %v1768_v45  ;;  %v1951_v24 = vsel %vm542_vm12, %v1945_v43, -inf }
 0xb5e   :  { %1952 = vmax.xlane.f32.xlu2 %v1951_v24 }
 0xb5f   :  { %v1743_v61 = vpop.f32.mrf.mxu1 }
 0xb60   :  { %v1757_v29 = vmul.f32 0.25, %v1743_v61  ;;  %v1926_v10 = vpop.f32.mrf.mxu0 }
 0xb61   :  { %v1940_v9 = vmul.f32 0.25, %v1926_v10 }
 0xb62   :  { %v1763_v46 = vadd.f32 %v1757_v29, %v3688_v8 }
 0xb63   :  { %v4305_v14 = vadd.f32 %v1940_v9, %v3688_v8 }
 0xb64   :  { %v1771_v48 = vsel %vm542_vm12, %v1763_v46, -inf }
 0xb65   :  { %1772 = vmax.xlane.f32.xlu0 %v1771_v48  ;;  %v1954_v62 = vsel %vm542_vm12, %v4305_v14, -inf }
 0xb66   :  { %1955 = vmax.xlane.f32.xlu1 %v1954_v62 }
 0xb67   :  { %v1746_v51 = vpop.f32.mrf.mxu1 }
 0xb68   :  { %v1758_v38 = vmul.f32 0.25, %v1746_v51  ;;  %v1929_v26 = vpop.f32.mrf.mxu0 }
 0xb69   :  { %v1941_v6 = vmul.f32 0.25, %v1929_v26 }
 0xb6a   :  { %v4311_v3 = vadd.f32 %v1758_v38, %v3707_v19 }
 0xb6b   :  { %v4314_v54 = vadd.f32 %v1941_v6, %v3707_v19 }
 0xb6c   :  { %v1774_v8 = vsel %vm542_vm12, %v4311_v3, -inf }
 0xb6d   :  { %1775 = vmax.xlane.f32.xlu0 %v1774_v8  ;;  %v1957_v0 = vsel %vm542_vm12, %v4314_v54, -inf }
 0xb6e   :  { %1958 = vmax.xlane.f32.xlu1 %v1957_v0 }
 0xb6f   :  { %v1748_v36 = vpop.f32.mrf.mxu1 }
 0xb70   :  { %v1759_v5 = vmul.f32 0.25, %v1748_v36  ;;  %v1931_v35 = vpop.f32.mrf.mxu0 }
 0xb71   :  { %v1942_v40 = vmul.f32 0.25, %v1931_v35 }
 0xb72   :  { %v1765_v11 = vadd.f32 %v1759_v5, %v3728_v34 }
 0xb73   :  { %v4322_v32 = vadd.f32 %v1942_v40, %v3728_v34 }
 0xb74   :  { %v1777_v19 = vsel %vm542_vm12, %v1765_v11, -inf }
 0xb75   :  { %1778 = vmax.xlane.f32.xlu2 %v1777_v19  ;;  %v1960_v16 = vsel %vm542_vm12, %v4322_v32, -inf }
 0xb76   :  { %1961 = vmax.xlane.f32.xlu0 %v1960_v16 }
 0xb77   :  { %v1751_v47 = vpop.f32.mrf.mxu1 }
 0xb78   :  { %v1760_v13 = vmul.f32 0.25, %v1751_v47  ;;  %v1934_v7 = vpop.f32.mrf.mxu0 }
 0xb79   :  { %v1943_v56 = vmul.f32 0.25, %v1934_v7 }
 0xb7a   :  { %v1766_v2 = vadd.f32 %v1760_v13, %v3745_v49 }
 0xb7b   :  { %v4329_v31 = vadd.f32 %v1943_v56, %v3745_v49 }
 0xb7c   :  { %v1780_v1 = vsel %vm542_vm12, %v1766_v2, -inf }
 0xb7d   :  { %1781 = vmax.xlane.f32.xlu2 %v1780_v1  ;;  %v1963_v34 = vsel %vm542_vm12, %v4329_v31, -inf }
 0xb7e   :  { %1964 = vmax.xlane.f32.xlu0 %v1963_v34 }
 0xb7f   :  { %v1753_v23 = vpop.f32.mrf.mxu1 }
 0xb80   :  { %v1761_v42 = vmul.f32 0.25, %v1753_v23  ;;  %v1936_v25 = vpop.f32.mrf.mxu0 }
 0xb81   :  { %v1944_v57 = vmul.f32 0.25, %v1936_v25 }
 0xb82   :  { %v4335_v15 = vadd.f32 %v1761_v42, %v3755_v60 }
 0xb83   :  { %v1950_v59 = vadd.f32 %v1944_v57, %v3755_v60 }
 0xb84   :  { %v1783_v49 = vsel %vm542_vm12, %v4335_v15, -inf }
 0xb85   :  { %1784 = vmax.xlane.f32.xlu1 %v1783_v49  ;;  %v1966_v22 = vsel %vm542_vm12, %v1950_v59, -inf }
 0xb86   :  { %1967 = vmax.xlane.f32.xlu2 %v1966_v22 }
 0xb9e   :  { %1837 = vrot.lane.b32.xlu2 %v4260_v55, %s3349_s25 }
 0xba6   :  { %2020 = vrot.lane.b32.xlu2 %v4260_v55, %s3350_s26 }
 0xbd0   :  { %v1770_v33 = vpop.xlane.xlu1 %1769 }
 0xbd1   :  { %v1953_v37 = vpop.xlane.xlu2 %1952  ;;  %v1786_v44 = vsub.f32 %v1762_v41, %v1770_v33 }
 0xbd2   :  { %v1969_v58 = vsub.f32 %v1945_v43, %v1953_v37 }
 0xbd3   :  { %v1792_v30 = vmul.f32 1.442695, %v1786_v44 }
 0xbd4   :  { %v1975_v27 = vmul.f32 1.442695, %v1969_v58 }
 0xbd5   :  { %3260 = vpow2.f32 %v1792_v30 }
 0xbd6   :  { %3262 = vpow2.f32 %v1975_v27 }
 0xbd8   :  { %v1773_v60 = vpop.xlane.xlu0 %1772 }
 0xbd9   :  { %v1787_v63 = vsub.f32 %v1763_v46, %v1773_v60  ;;  %v1956_v21 = vpop.xlane.xlu1 %1955 }
 0xbda   :  { %v1970_v61 = vsub.f32 %v4305_v14, %v1956_v21 }
 0xbdb   :  { %v4345_v17 = vpop.eup %3260  ;;  %v1794_v45 = vmul.f32 1.442695, %v1787_v63 }
 0xbdc   :  { %v4347_v24 = vpop.eup %3262  ;;  %v1804_v55 = vsel %vm542_vm12, %v4345_v17, 0.0  ;;  %v1977_v43 = vmul.f32 1.442695, %v1970_v61 }
 0xbdd   :  { %3264 = vpow2.f32 %v1794_v45  ;;  %v1987_v41 = vsel %vm542_vm12, %v4347_v24, 0.0  ;;  %1805 = vadd.xlane.f32.xlu1 %v1804_v55 }
 0xbde   :  { %1988 = vadd.xlane.f32.xlu0 %v1987_v41  ;;  %3266 = vpow2.f32 %v1977_v43 }
 0xbe0   :  { %v1776_v16 = vpop.xlane.xlu0 %1775 }
 0xbe1   :  { %v1788_v47 = vsub.f32 %v4311_v3, %v1776_v16 }
 0xbe3   :  { %v4354_v29 = vpop.eup %3264  ;;  %v1796_v7 = vmul.f32 1.442695, %v1788_v47 }
 0xbe4   :  { %v1807_v10 = vsel %vm542_vm12, %v4354_v29, 0.0  ;;  %v4358_v14 = vpop.eup %3266 }
 0xbe5   :  { %v1990_v62 = vsel %vm542_vm12, %v4358_v14, 0.0 }
 0xbe6   :  { %1808 = vadd.xlane.f32.xlu0 %v1807_v10 }
 0xbe8   :  { %v1779_v9 = vpop.xlane.xlu2 %1778 }
 0xbe9   :  { %v1789_v46 = vsub.f32 %v1765_v11, %v1779_v9  ;;  %v1962_v13 = vpop.xlane.xlu0 %1961 }
 0xbea   :  { %v1972_v56 = vsub.f32 %v4322_v32, %v1962_v13 }
 0xbeb   :  { %v1798_v48 = vmul.f32 1.442695, %v1789_v46 }
 0xbec   :  { %v1981_v34 = vmul.f32 1.442695, %v1972_v56 }
 0xbed   :  { %3268 = vpow2.f32 %v1798_v48 }
 0xbee   :  { %1991 = vadd.xlane.f32.xlu0 %v1990_v62 }
 0xbf0   :  { %v1782_v51 = vpop.xlane.xlu2 %1781 }
 0xbf1   :  { %v1790_v38 = vsub.f32 %v1766_v2, %v1782_v51  ;;  %v1959_v2 = vpop.xlane.xlu1 %1958  ;;  %v1965_v23 = vpop.xlane.xlu0 %1964 }
 0xbf2   :  { %v1971_v1 = vsub.f32 %v4314_v54, %v1959_v2  ;;  %v1973_v25 = vsub.f32 %v4329_v31, %v1965_v23 }
 0xbf3   :  { %v4362_v26 = vpop.eup %3268  ;;  %v1800_v6 = vmul.f32 1.442695, %v1790_v38 }
 0xbf4   :  { %v1813_v8 = vsel %vm542_vm12, %v4362_v26, 0.0  ;;  %v1979_v42 = vmul.f32 1.442695, %v1971_v1  ;;  %v1983_v3 = vmul.f32 1.442695, %v1973_v25 }
 0xbf5   :  { %3270 = vpow2.f32 %v1800_v6  ;;  %1814 = vadd.xlane.f32.xlu2 %v1813_v8 }
 0xbf6   :  { %2022 = vrot.lane.b32.xlu1 %v4256_v20, %s3350_s26 }
 0xbf9   :  { %v1968_v0 = vpop.xlane.xlu2 %1967  ;;  %v1785_v57 = vpop.xlane.xlu1 %1784 }
 0xbfa   :  { %v1974_v36 = vsub.f32 %v1950_v59, %v1968_v0  ;;  %v1791_v49 = vsub.f32 %v4335_v15, %v1785_v57 }
 0xbfb   :  { %v4368_v5 = vpop.eup %3270 }
 0xbfc   :  { %v1985_v35 = vmul.f32 1.442695, %v1974_v36  ;;  %v1816_v40 = vsel %vm542_vm12, %v4368_v5, 0.0  ;;  %v1802_v32 = vmul.f32 1.442695, %v1791_v49  ;;  %v3103_v49 = vld [vmem:[%s4786_s3 + $0x10] sm:$0xff] }
 0xbfd   :  { %1817 = vadd.xlane.f32.xlu2 %v1816_v40 }
 0xbfe   :  { %3272 = vpow2.f32 %v1985_v35 }
 0xbff   :  { %3274 = vpow2.f32 %v1796_v7 }
 0xc00   :  { %3276 = vpow2.f32 %v1981_v34 }
 0xc01   :  { %v1838_v11 = vpop.permute.xlu2 %1837  ;;  %3278 = vpow2.f32 %v1979_v42 }
 0xc02   :  { %1862 = vmatpush.bf16.msrb.mxu3 %v1838_v11  ;;  %2024 = vrot.lane.b32.xlu0 %v4264_v53, %s3350_s26  ;;  %3280 = vpow2.f32 %v1983_v3 }
 0xc03   :  { %3282 = vpow2.f32 %v1802_v32 }
 0xc04   :  { %v4374_v19 = vpop.eup %3272 }
 0xc05   :  { %v2002_v20 = vsel %vm542_vm12, %v4374_v19, 0.0  ;;  %v3275_v53 = vpop.eup %3274 }
 0xc06   :  { %2003 = vadd.xlane.f32.xlu2 %v2002_v20  ;;  %v1810_v59 = vsel %vm542_vm12, %v3275_v53, 0.0  ;;  %v3277_v22 = vpop.eup %3276  ;;  %2129 = vmatpush.bf16.msra.mxu3 %v3103_v49 }
 0xc07   :  { %v1996_v54 = vsel %vm542_vm12, %v3277_v22, 0.0  ;;  %v3279_v33 = vpop.eup %3278 }
 0xc08   :  { %v1993_v37 = vsel %vm542_vm12, %v3279_v33, 0.0  ;;  %v4386_v44 = vpop.eup %3280 }
 0xc09   :  { %v1999_v31 = vsel %vm542_vm12, %v4386_v44, 0.0  ;;  %v3283_v58 = vpop.eup %3282  ;;  %v2021_v62 = vpop.permute.xlu2 %2020 }
 0xc0a   :  { %v1819_v15 = vsel %vm542_vm12, %v3283_v58, 0.0 }
 0xc20   :  { %1811 = vadd.xlane.f32.xlu1 %v1810_v59 }
 0xc28   :  { %1997 = vadd.xlane.f32.xlu1 %v1996_v54 }
 0xc2c   :  { %1994 = vadd.xlane.f32.xlu0 %v1993_v37 }
 0xc30   :  { %2000 = vadd.xlane.f32.xlu1 %v1999_v31 }
 0xc34   :  { %1820 = vadd.xlane.f32.xlu0 %v1819_v15 }
 0xc50   :  { %v1806_v27 = vpop.xlane.xlu1 %1805 }
 0xc51   :  { %v1989_v30 = vpop.xlane.xlu0 %1988  ;;  %3284 = vrcp.f32 %v1806_v27 }
 0xc57   :  { %v3285_v63 = vpop.eup %3284 }
 0xc58   :  { %v1828_v45 = vmul.f32 %v3285_v63, %v4345_v17 }
 0xc59   :  { %v1809_v60 = vpop.xlane.xlu0 %1808 }
 0xc5a   :  { %3286 = vrcp.f32 %v1809_v60 }
 0xc60   :  { %v3287_v21 = vpop.eup %3286 }
 0xc61   :  { %v1829_v61 = vmul.f32 %v3287_v21, %v4354_v29  ;;  %v1992_v41 = vpop.xlane.xlu0 %1991 }
 0xc62   :  { %3288 = vrcp.f32 %v1992_v41 }
 0xc63   :  { %v1834_v55 = vpack.c.bf16 %v1829_v61, %v1828_v45  ;;  %3290 = vrcp.f32 %v1989_v30 }
 0xc65   :  { %2991 = vmatmul.msk.bf16.vlgmr.msrb.gmra.mxu3 %vm542_vm12, %v1834_v55 }
 0xc68   :  { %v3289_v10 = vpop.eup %3288  ;;  %v2023_v9 = vpop.permute.xlu1 %2022 }
 0xc69   :  { %v3291_v46 = vpop.eup %3290  ;;  %v2012_v48 = vmul.f32 %v3289_v10, %v4358_v14  ;;  %v1815_v29 = vpop.xlane.xlu2 %1814 }
 0xc6a   :  { %v2011_v51 = vmul.f32 %v3291_v46, %v4347_v24  ;;  %3292 = vrcp.f32 %v1815_v29 }
 0xc6c   :  { %v2017_v17 = vpack.c.bf16 %v2012_v48, %v2011_v51 }
 0xc70   :  { %v3293_v6 = vpop.eup %3292 }
 0xc71   :  { %v1831_v35 = vmul.f32 %v3293_v6, %v4362_v26  ;;  %v1818_v24 = vpop.xlane.xlu2 %1817 }
 0xc74   :  { %v2025_v43 = vpop.permute.xlu0 %2024 }
 0xc75   :  { %2043 = vmatpush.bf16.msrb.mxu2 %v2025_v43 }
 0xc79   :  { %2044 = vmatpush.bf16.msrb.mxu2 %v2023_v9  ;;  %v2004_v2 = vpop.xlane.xlu2 %2003  ;;  %v3143_v9 = vld [vmem:[%s4784_s1 + $0x11] ss:$0 sm:$0xff] }
 0xc7d   :  { %2045 = vmatpush.bf16.msrb.mxu2 %v2021_v62 }
 0xc80   :  { %2999 = vmatmul.msk.bf16.vlgmr.msrb.gmra.mxu2 %vm542_vm12, %v2017_v17 }
 0xc93   :  { %v1812_v38 = vpop.xlane.xlu1 %1811 }
 0xc94   :  { %3294 = vrcp.f32 %v1812_v38 }
 0xc9a   :  { %v3295_v8 = vpop.eup %3294 }
 0xc9b   :  { %v1998_v0 = vpop.xlane.xlu1 %1997  ;;  %v1830_v36 = vmul.f32 %v3295_v8, %v3275_v53 }
 0xc9c   :  { %3296 = vrcp.f32 %v1998_v0 }
 0xc9d   :  { %v1835_v40 = vpack.c.bf16 %v1831_v35, %v1830_v36 }
 0xc9f   :  { %v1995_v14 = vpop.xlane.xlu0 %1994  ;;  %2992 = vmatmul.msk.bf16.gmra.mxu3 %vm542_vm12, %v1835_v40 }
 0xca0   :  { %3298 = vrcp.f32 %v1995_v14 }
 0xca1   :  { %3300 = vrcp.f32 %v1818_v24 }
 0xca2   :  { %v3297_v11 = vpop.eup %3296 }
 0xca3   :  { %v2014_v13 = vmul.f32 %v3297_v11, %v3277_v22  ;;  %v2001_v7 = vpop.xlane.xlu1 %2000 }
 0xca6   :  { %v3299_v20 = vpop.eup %3298 }
 0xca7   :  { %v1821_v16 = vpop.xlane.xlu0 %1820  ;;  %v2013_v47 = vmul.f32 %v3299_v20, %v3279_v33  ;;  %v3301_v26 = vpop.eup %3300 }
 0xca8   :  { %3302 = vrcp.f32 %v1821_v16  ;;  %v1832_v34 = vmul.f32 %v3301_v26, %v4368_v5  ;;  %v3104_v5 = vld [vmem:[%s4786_s3 + $0x18] sm:$0xff] }
 0xca9   :  { %v2018_v56 = vpack.c.bf16 %v2014_v13, %v2013_v47  ;;  %3304 = vrcp.f32 %v2001_v7  ;;  %2090 = vmatpush.bf16.msra.mxu1 %v3104_v5 }
 0xcaa   :  { %3306 = vrcp.f32 %v2004_v2 }
 0xcab   :  { %3000 = vmatmul.msk.bf16.gmra.mxu2 %vm542_vm12, %v2018_v56 }
 0xcae   :  { %v3303_v1 = vpop.eup %3302 }
 0xcaf   :  { %v1833_v23 = vmul.f32 %v3303_v1, %v3283_v58  ;;  %v3305_v42 = vpop.eup %3304 }
 0xcb0   :  { %v3307_v25 = vpop.eup %3306  ;;  %v2015_v57 = vmul.f32 %v3305_v42, %v4386_v44 }
 0xcb1   :  { %v1836_v53 = vpack.c.bf16 %v1833_v23, %v1832_v34  ;;  %v2016_v59 = vmul.f32 %v3307_v25, %v4374_v19 }
 0xcb3   :  { %2993 = vmatmul.msk.bf16.gmra.mxu3 %vm542_vm12, %v1836_v53  ;;  %v2019_v3 = vpack.c.bf16 %v2016_v59, %v2015_v57 }
 0xcbb   :  { %3001 = vmatmul.msk.bf16.gmra.mxu2 %vm542_vm12, %v2019_v3 }
 0xce8   :  { %v1864_v22 = vpop.f32.mrf.mxu3 }
 0xcf0   :  { %v1866_v32 = vpop.f32.mrf.mxu3 }
 0xcf1   :  { %v1879_v54 = vpack.c.bf16 %v1866_v32, %v1864_v22 }
 0xcf3   :  { %3015 = vmatmul.msk.bf16.vlgmr.msra.gmra.mxu3 %vm487_vm8, %v1879_v54 }
 0xd03   :  { %v2047_v33 = vpop.f32.mrf.mxu2 }
 0xd0b   :  { %v2049_v19 = vpop.f32.mrf.mxu2 }
 0xd0c   :  { %v2062_v37 = vpack.c.bf16 %v2049_v19, %v2047_v33 }
 0xd0e   :  { %3008 = vmatmul.msk.bf16.vlgmr.msra.gmra.mxu1 %vm487_vm8, %v2062_v37 }
 0xd22   :  { %v1869_v44 = vpop.f32.mrf.mxu3 }
 0xd2a   :  { %v1871_v31 = vpop.f32.mrf.mxu3 }
 0xd2b   :  { %v1880_v58 = vpack.c.bf16 %v1871_v31, %v1869_v44 }
 0xd2d   :  { %3016 = vmatmul.msk.bf16.gmra.mxu3 %vm487_vm8, %v1880_v58 }
 0xd2e   :  { %v2052_v15 = vpop.f32.mrf.mxu2 }
 0xd36   :  { %v1874_v30 = vpop.f32.mrf.mxu3  ;;  %v2054_v27 = vpop.f32.mrf.mxu2 }
 0xd37   :  { %v2063_v60 = vpack.c.bf16 %v2054_v27, %v2052_v15 }
 0xd39   :  { %3009 = vmatmul.msk.bf16.gmra.mxu1 %vm487_vm8, %v2063_v60 }
 0xd3e   :  { %v1876_v63 = vpop.f32.mrf.mxu3  ;;  %v2057_v21 = vpop.f32.mrf.mxu2 }
 0xd3f   :  { %v1881_v45 = vpack.c.bf16 %v1876_v63, %v1874_v30 }
 0xd41   :  { %3017 = vmatmul.msk.bf16.gmra.mxu3 %vm487_vm8, %v1881_v45 }
 0xd46   :  { %v2059_v61 = vpop.f32.mrf.mxu2 }
 0xd47   :  { %v2064_v55 = vpack.c.bf16 %v2059_v61, %v2057_v21 }
 0xd49   :  { %3010 = vmatmul.msk.bf16.gmra.mxu1 %vm487_vm8, %v2064_v55 }
 0xd76   :  { %v2131_v41 = vpop.f32.mrf.mxu3 }
 0xd7e   :  { %v2133_v51 = vpop.f32.mrf.mxu3 }
 0xd8b   :  { %v2092_v43 = vpop.f32.mrf.mxu1 }
 0xd8c   :  { %v2132_v10 = vadd.f32 %v2131_v41, %v2092_v43 }
 0xd8e   :  { %v2146_v46 = vadd.f32 %v2132_v10, %v4139_v28 }
 0xd90   :  { %v4421_v48 = vadd.f32 %v3143_v9, %v2146_v46  ;;  %v3106_v46 = vld [vmem:[%s4787_s4 + $0x18] sm:$0xff] }
 0xd91   :  { %2345 = vmatpush.bf16.msrb.mxu0 %v3106_v46 }
 0xd92   :  { %v2160_v62 = vsel %vm117_vm0, %v4421_v48, 0.0 }
 0xd93   :  { %v2094_v17 = vpop.f32.mrf.mxu1  ;;  %2161 = vadd.xlane.f32.xlu0 %v2160_v62 }
 0xd94   :  { %v2134_v29 = vadd.f32 %v2133_v51, %v2094_v17  ;;  %v3105_v17 = vld [vmem:[%s4787_s4 + $0x10] sm:$0xff] }
 0xd95   :  { %2346 = vmatpush.bf16.msrb.mxu0 %v3105_v17 }
 0xd96   :  { %v2147_v38 = vadd.f32 %v2134_v29, %v4144_v39 }
 0xd98   :  { %v4426_v6 = vadd.f32 %v3143_v9, %v2147_v38 }
 0xd9a   :  { %v2163_v8 = vsel %vm117_vm0, %v4426_v6, 0.0 }
 0xd9b   :  { %2164 = vadd.xlane.f32.xlu1 %v2163_v8 }
 0xdb0   :  { %v2136_v0 = vpop.f32.mrf.mxu3 }
 0xdb6   :  { %v2097_v36 = vpop.f32.mrf.mxu1 }
 0xdb7   :  { %v2137_v28 = vadd.f32 %v2136_v0, %v2097_v36 }
 0xdb8   :  { %v2138_v14 = vpop.f32.mrf.mxu3 }
 0xdb9   :  { %v2148_v35 = vadd.f32 %v2137_v28, %v4149_v12 }
 0xdbb   :  { %v4431_v40 = vadd.f32 %v3143_v9, %v2148_v35 }
 0xdbd   :  { %v2166_v24 = vsel %vm117_vm0, %v4431_v40, 0.0 }
 0xdbe   :  { %2167 = vadd.xlane.f32.xlu2 %v2166_v24  ;;  %v2099_v11 = vpop.f32.mrf.mxu1 }
 0xdbf   :  { %v2139_v39 = vadd.f32 %v2138_v14, %v2099_v11 }
 0xdc1   :  { %v2149_v20 = vadd.f32 %v2139_v39, %v4154_v50 }
 0xdc3   :  { %v4436_v16 = vadd.f32 %v3143_v9, %v2149_v20 }
 0xdc4   :  { %v2141_v47 = vpop.f32.mrf.mxu3 }
 0xdc5   :  { %v2169_v13 = vsel %vm117_vm0, %v4436_v16, 0.0 }
 0xdc6   :  { %2170 = vadd.xlane.f32.xlu0 %v2169_v13  ;;  %v2102_v7 = vpop.f32.mrf.mxu1 }
 0xdc7   :  { %v2142_v12 = vadd.f32 %v2141_v47, %v2102_v7 }
 0xdc9   :  { %v2150_v56 = vadd.f32 %v2142_v12, %v4159_v52 }
 0xdcb   :  { %v4441_v2 = vadd.f32 %v3143_v9, %v2150_v56  ;;  %v4503_v56 = vld [vmem:[%s4784_s1 + $0xe] ss:$0 sm:$0xff] }
 0xdcc   :  { %v2143_v1 = vpop.f32.mrf.mxu3 }
 0xdcd   :  { %v2172_v26 = vsel %vm117_vm0, %v4441_v2, 0.0 }
 0xdce   :  { %2173 = vadd.xlane.f32.xlu1 %v2172_v26  ;;  %v2104_v34 = vpop.f32.mrf.mxu1 }
 0xdcf   :  { %v2144_v50 = vadd.f32 %v2143_v1, %v2104_v34 }
 0xdd1   :  { %v2151_v23 = vadd.f32 %v2144_v50, %v4164_v4  ;;  %v4509_v50 = vld [vmem:[%s4784_s1 + $0xf] ss:$0 sm:$0xff] }
 0xdd3   :  { %v4446_v53 = vadd.f32 %v3143_v9, %v2151_v23 }
 0xdd5   :  { %v2175_v42 = vsel %vm117_vm0, %v4446_v53, 0.0 }
 0xdd6   :  { %2176 = vadd.xlane.f32.xlu2 %v2175_v42 }
 0xe06   :  { %v2162_v25 = vpop.xlane.xlu0 %2161 }
 0xe07   :  { %v2178_v52 = vmul.f32 %v2162_v25, %v3410_v18 }
 0xe09   :  { %v4452_v57 = vsub.f32 %v4421_v48, %v2178_v52 }
 0xe0b   :  { %v2190_v59 = vmul.f32 %v4452_v57, %v4452_v57 }
 0xe0d   :  { %v2196_v3 = vsel %vm117_vm0, %v2190_v59, 0.0 }
 0xe0e   :  { %2197 = vadd.xlane.f32.xlu0 %v2196_v3  ;;  %v2165_v49 = vpop.xlane.xlu1 %2164 }
 0xe0f   :  { %v2179_v4 = vmul.f32 %v2165_v49, %v3410_v18 }
 0xe11   :  { %v4459_v22 = vsub.f32 %v4426_v6, %v2179_v4 }
 0xe13   :  { %v2191_v5 = vmul.f32 %v4459_v22, %v4459_v22 }
 0xe15   :  { %v2199_v32 = vsel %vm117_vm0, %v2191_v5, 0.0 }
 0xe16   :  { %2200 = vadd.xlane.f32.xlu1 %v2199_v32 }
 0xe31   :  { %v2168_v54 = vpop.xlane.xlu2 %2167 }
 0xe32   :  { %v2180_v33 = vmul.f32 %v2168_v54, %v3410_v18 }
 0xe34   :  { %v4466_v19 = vsub.f32 %v4431_v40, %v2180_v33 }
 0xe36   :  { %v2192_v37 = vmul.f32 %v4466_v19, %v4466_v19 }
 0xe38   :  { %v2202_v44 = vsel %vm117_vm0, %v2192_v37, 0.0 }
 0xe39   :  { %v2171_v31 = vpop.xlane.xlu0 %2170  ;;  %2203 = vadd.xlane.f32.xlu2 %v2202_v44 }
 0xe3a   :  { %v2181_v58 = vmul.f32 %v2171_v31, %v3410_v18 }
 0xe3c   :  { %v4473_v15 = vsub.f32 %v4436_v16, %v2181_v58 }
 0xe3e   :  { %v2193_v30 = vmul.f32 %v4473_v15, %v4473_v15 }
 0xe40   :  { %v2205_v27 = vsel %vm117_vm0, %v2193_v30, 0.0 }
 0xe41   :  { %2206 = vadd.xlane.f32.xlu0 %v2205_v27  ;;  %v2174_v60 = vpop.xlane.xlu1 %2173 }
 0xe42   :  { %v2182_v63 = vmul.f32 %v2174_v60, %v3410_v18 }
 0xe44   :  { %v4480_v21 = vsub.f32 %v4441_v2, %v2182_v63 }
 0xe46   :  { %v2194_v45 = vmul.f32 %v4480_v21, %v4480_v21 }
 0xe48   :  { %v2208_v61 = vsel %vm117_vm0, %v2194_v45, 0.0 }
 0xe49   :  { %v2177_v55 = vpop.xlane.xlu2 %2176  ;;  %2209 = vadd.xlane.f32.xlu1 %v2208_v61 }
 0xe4a   :  { %v2183_v41 = vmul.f32 %v2177_v55, %v3410_v18 }
 0xe4c   :  { %v4487_v43 = vsub.f32 %v4446_v53, %v2183_v41 }
 0xe4e   :  { %v2195_v10 = vmul.f32 %v4487_v43, %v4487_v43 }
 0xe50   :  { %v2211_v9 = vsel %vm117_vm0, %v2195_v10, 0.0 }
 0xe51   :  { %2212 = vadd.xlane.f32.xlu2 %v2211_v9 }
 0xe81   :  { %v2198_v62 = vpop.xlane.xlu0 %2197 }
 0xe82   :  { %v2214_v51 = vmul.f32 %v2198_v62, %v3410_v18 }
 0xe84   :  { %v2220_v29 = vadd.f32 1e-05, %v2214_v51 }
 0xe86   :  { %3308 = vrsqrt.f32 %v2220_v29  ;;  %vm2232_vm12 = vweird.f32 %v2220_v29 }
 0xe89   :  { %v2201_v38 = vpop.xlane.xlu1 %2200 }
 0xe8a   :  { %v2215_v8 = vmul.f32 %v2201_v38, %v3410_v18 }
 0xe8c   :  { %v3309_v0 = vpop.eup %3308  ;;  %v2221_v36 = vadd.f32 1e-05, %v2215_v8 }
 0xe8d   :  { %v2227_v28 = vmul.f32 %v3309_v0, %v2220_v29  ;;  %vm2233_vm8 = vweird.f32 %v3309_v0 }
 0xe8e   :  { %3310 = vrsqrt.f32 %v2221_v36  ;;  %vm2234_vm6 = vmor %vm2232_vm12, %vm2233_vm8  ;;  %vm2242_vm9 = vweird.f32 %v2221_v36 }
 0xe8f   :  { %v2228_v35 = vmul.f32 %v3309_v0, %v2227_v28 }
 0xe91   :  { %v2229_v14 = vmul.f32 0.5, %v2228_v35 }
 0xe93   :  { %v2230_v24 = vsub.f32 1.5, %v2229_v14 }
 0xe94   :  { %v3311_v11 = vpop.eup %3310 }
 0xe95   :  { %v2231_v39 = vmul.f32 %v3309_v0, %v2230_v24  ;;  %v2237_v20 = vmul.f32 %v3311_v11, %v2221_v36  ;;  %vm2243_vm7 = vweird.f32 %v3311_v11 }
 0xe96   :  { %vm2244_vm10 = vmor %vm2242_vm9, %vm2243_vm7 }
 0xe97   :  { %v2238_v47 = vmul.f32 %v3311_v11, %v2237_v20  ;;  %v2235_v13 = vsel %vm2234_vm6, %v3309_v0, %v2231_v39 }
 0xe98   :  { %v2286_v26 = vmul.f32 %v2235_v13, %v4452_v57 }
 0xe99   :  { %v2239_v7 = vmul.f32 0.5, %v2238_v47 }
 0xe9a   :  { %v2294_v23 = vmul.f32 %v4503_v56, %v2286_v26 }
 0xe9b   :  { %v2240_v12 = vsub.f32 1.5, %v2239_v7 }
 0xe9c   :  { %v2302_v52 = vadd.f32 %v4509_v50, %v2294_v23 }
 0xe9d   :  { %v2241_v1 = vmul.f32 %v3311_v11, %v2240_v12 }
 0xe9f   :  { %v2245_v34 = vsel %vm2244_vm10, %v3311_v11, %v2241_v1 }
 0xea0   :  { %v2287_v42 = vmul.f32 %v2245_v34, %v4459_v22 }
 0xea2   :  { %v2295_v25 = vmul.f32 %v4503_v56, %v2287_v42 }
 0xea4   :  { %v2303_v59 = vadd.f32 %v4509_v50, %v2295_v25 }
 0xea6   :  { %v2308_v57 = vpack.c.bf16 %v2303_v59, %v2302_v52 }
 0xea8   :  { %3030 = vmatmul.msk.bf16.vlgmr.msrb.gmra.mxu0 %vm117_vm0, %v2308_v57 }
 0xeac   :  { %v2204_v3 = vpop.xlane.xlu2 %2203 }
 0xead   :  { %v2216_v49 = vmul.f32 %v2204_v3, %v3410_v18 }
 0xeaf   :  { %v2222_v4 = vadd.f32 1e-05, %v2216_v49 }
 0xeb1   :  { %3312 = vrsqrt.f32 %v2222_v4  ;;  %vm2252_vm13 = vweird.f32 %v2222_v4 }
 0xeb4   :  { %v2207_v5 = vpop.xlane.xlu0 %2206 }
 0xeb5   :  { %v2217_v32 = vmul.f32 %v2207_v5, %v3410_v18  ;;  %v3113_v5 = vld [vmem:[%s4788_s5 + $0x70] sm:$0xff] }
 0xeb7   :  { %v3313_v54 = vpop.eup %3312  ;;  %v2223_v33 = vadd.f32 1e-05, %v2217_v32 }
 0xeb8   :  { %v2247_v22 = vmul.f32 %v3313_v54, %v2222_v4  ;;  %vm2253_vm11 = vweird.f32 %v3313_v54 }
 0xeb9   :  { %3314 = vrsqrt.f32 %v2223_v33  ;;  %vm2254_vm14 = vmor %vm2252_vm13, %vm2253_vm11  ;;  %vm2262_vm1 = vweird.f32 %v2223_v33 }
 0xeba   :  { %v2248_v37 = vmul.f32 %v3313_v54, %v2247_v22 }
 0xebc   :  { %v2249_v44 = vmul.f32 0.5, %v2248_v37  ;;  %v2210_v31 = vpop.xlane.xlu1 %2209 }
 0xebd   :  { %v2218_v58 = vmul.f32 %v2210_v31, %v3410_v18 }
 0xebe   :  { %v2250_v30 = vsub.f32 1.5, %v2249_v44  ;;  %v3112_v44 = vld [vmem:[%s4788_s5 + $0x68] sm:$0xff] }
 0xebf   :  { %v3315_v27 = vpop.eup %3314  ;;  %v2224_v60 = vadd.f32 1e-05, %v2218_v58 }
 0xec0   :  { %v2251_v63 = vmul.f32 %v3313_v54, %v2250_v30  ;;  %v2257_v45 = vmul.f32 %v3315_v27, %v2223_v33  ;;  %vm2263_vm15 = vweird.f32 %v3315_v27 }
 0xec1   :  { %3316 = vrsqrt.f32 %v2224_v60  ;;  %vm2264_vm2 = vmor %vm2262_vm1, %vm2263_vm15  ;;  %vm2272_vm4 = vweird.f32 %v2224_v60 }
 0xec2   :  { %v2258_v61 = vmul.f32 %v3315_v27, %v2257_v45  ;;  %v2255_v55 = vsel %vm2254_vm14, %v3313_v54, %v2251_v63 }
 0xec3   :  { %v2288_v51 = vmul.f32 %v2255_v55, %v4466_v19 }
 0xec4   :  { %v2259_v41 = vmul.f32 0.5, %v2258_v61  ;;  %v2213_v10 = vpop.xlane.xlu2 %2212 }
 0xec5   :  { %v2219_v9 = vmul.f32 %v2213_v10, %v3410_v18  ;;  %v2296_v28 = vmul.f32 %v4503_v56, %v2288_v51  ;;  %v3110_v10 = vld [vmem:[%s4788_s5 + $0x58] sm:$0xff] }
 0xec6   :  { %v2260_v46 = vsub.f32 1.5, %v2259_v41 }
 0xec7   :  { %v3317_v62 = vpop.eup %3316  ;;  %v2225_v17 = vadd.f32 1e-05, %v2219_v9  ;;  %v2304_v39 = vadd.f32 %v4509_v50, %v2296_v28 }
 0xec8   :  { %v2261_v29 = vmul.f32 %v3315_v27, %v2260_v46  ;;  %v2267_v38 = vmul.f32 %v3317_v62, %v2224_v60  ;;  %vm2273_vm3 = vweird.f32 %v3317_v62  ;;  %v3111_v60 = vld [vmem:[%s4788_s5 + $0x60] sm:$0xff] }
 0xec9   :  { %3318 = vrsqrt.f32 %v2225_v17  ;;  %vm2274_vm5 = vmor %vm2272_vm4, %vm2273_vm3  ;;  %vm2282_vm12 = vweird.f32 %v2225_v17 }
 0xeca   :  { %v2265_v8 = vsel %vm2264_vm2, %v3315_v27, %v2261_v29  ;;  %v2268_v0 = vmul.f32 %v3317_v62, %v2267_v38 }
 0xecb   :  { %v2289_v36 = vmul.f32 %v2265_v8, %v4473_v15  ;;  %v3109_v8 = vld [vmem:[%s4788_s5 + $0x50] sm:$0xff] }
 0xecc   :  { %v2269_v35 = vmul.f32 0.5, %v2268_v0 }
 0xecd   :  { %v2297_v14 = vmul.f32 %v4503_v56, %v2289_v36 }
 0xece   :  { %v2270_v24 = vsub.f32 1.5, %v2269_v35 }
 0xecf   :  { %v3319_v11 = vpop.eup %3318  ;;  %v2305_v19 = vadd.f32 %v4509_v50, %v2297_v14 }
 0xed0   :  { %v2271_v20 = vmul.f32 %v3317_v62, %v2270_v24  ;;  %v2277_v47 = vmul.f32 %v3319_v11, %v2225_v17  ;;  %vm2283_vm8 = vweird.f32 %v3319_v11 }
 0xed1   :  { %v2309_v13 = vpack.c.bf16 %v2305_v19, %v2304_v39  ;;  %vm2284_vm6 = vmor %vm2282_vm12, %vm2283_vm8  ;;  %v3108_v39 = vld [vmem:[%s4788_s5 + $0x48] sm:$0xff] }
 0xed2   :  { %v2278_v7 = vmul.f32 %v3319_v11, %v2277_v47  ;;  %v2275_v15 = vsel %vm2274_vm5, %v3317_v62, %v2271_v20 }
 0xed3   :  { %3031 = vmatmul.msk.bf16.gmra.mxu0 %vm117_vm0, %v2309_v13  ;;  %v2290_v1 = vmul.f32 %v2275_v15, %v4480_v21  ;;  %v4538_v21 = vld [vmem:[%s4784_s1 + $0x12] ss:$0 sm:$0xff]  ;;  %v3107_v15 = vld [vmem:[%s4788_s5 + $0x40] sm:$0xff] }
 0xed4   :  { %v2279_v12 = vmul.f32 0.5, %v2278_v7 }
 0xed5   :  { %v2298_v25 = vmul.f32 %v4503_v56, %v2290_v1 }
 0xed6   :  { %v2280_v26 = vsub.f32 1.5, %v2279_v12 }
 0xed7   :  { %v2306_v59 = vadd.f32 %v4509_v50, %v2298_v25 }
 0xed8   :  { %v2281_v34 = vmul.f32 %v3319_v11, %v2280_v26 }
 0xeda   :  { %v2285_v23 = vsel %vm2284_vm6, %v3319_v11, %v2281_v34 }
 0xedb   :  { %v2291_v42 = vmul.f32 %v2285_v23, %v4487_v43  ;;  %v3114_v43 = vld [vmem:[%s4788_s5 + $0x78] sm:$0xff] }
 0xedc   :  { %2697 = vmatpush.bf16.msra.mxu2 %v3114_v43 }
 0xedd   :  { %v2299_v52 = vmul.f32 %v4503_v56, %v2291_v42 }
 0xedf   :  { %v2307_v57 = vadd.f32 %v4509_v50, %v2299_v52 }
 0xee0   :  { %2698 = vmatpush.bf16.msra.mxu2 %v3113_v5 }
 0xee1   :  { %v2310_v3 = vpack.c.bf16 %v2307_v57, %v2306_v59 }
 0xee3   :  { %3032 = vmatmul.msk.bf16.gmra.mxu0 %vm117_vm0, %v2310_v3 }
 0xee4   :  { %2699 = vmatpush.bf16.msra.mxu2 %v3112_v44 }
 0xee8   :  { %2700 = vmatpush.bf16.msra.mxu2 %v3111_v60 }
 0xeec   :  { %2701 = vmatpush.bf16.msra.mxu2 %v3110_v10 }
 0xef0   :  { %2702 = vmatpush.bf16.msra.mxu2 %v3109_v8 }
 0xef4   :  { %2703 = vmatpush.bf16.msra.mxu2 %v3108_v39 }
 0xef8   :  { %2704 = vmatpush.bf16.msra.mxu2 %v3107_v15 }
 0xf25   :  { %v2348_v49 = vpop.f32.mrf.mxu0 }
 0xf26   :  { %v4541_v4 = vadd.f32 %v4538_v21, %v2348_v49 }
 0xf28   :  { %v4547_v56 = vmul.f32 0.70710677, %v4541_v4 }
 0xf2a   :  { %v2375_v50 = vmul.f32 %v4547_v56, %v4547_v56 }
 0xf2c   :  { %v2376_v32 = vmin.f32 %v2375_v50, 16.0 }
 0xf2d   :  { %v2350_v54 = vpop.f32.mrf.mxu0 }
 0xf2e   :  { %v2377_v33 = vmul.f32 2.1237322e-06, %v2376_v32  ;;  %v2388_v22 = vmul.f32 3.8918573e-05, %v2376_v32  ;;  %v4555_v37 = vadd.f32 %v4538_v21, %v2350_v54 }
 0xf30   :  { %v2378_v31 = vadd.f32 0.00028619796, %v2377_v33  ;;  %v2389_v58 = vadd.f32 0.001143296, %v2388_v22  ;;  %v4561_v30 = vmul.f32 0.70710677, %v4555_v37 }
 0xf32   :  { %v2390_v27 = vmul.f32 %v2389_v58, %v2376_v32  ;;  %v2415_v63 = vmul.f32 %v4561_v30, %v4561_v30  ;;  %v2379_v45 = vmul.f32 %v2378_v31, %v2376_v32 }
 0xf34   :  { %v2391_v61 = vadd.f32 0.014752088, %v2390_v27  ;;  %v2416_v55 = vmin.f32 %v2415_v63, 16.0  ;;  %v2380_v62 = vadd.f32 0.0036580483, %v2379_v45 }
 0xf36   :  { %v2392_v41 = vmul.f32 %v2391_v61, %v2376_v32  ;;  %v2417_v9 = vmul.f32 2.1237322e-06, %v2416_v55  ;;  %v2428_v46 = vmul.f32 3.8918573e-05, %v2416_v55  ;;  %v2381_v28 = vmul.f32 %v2380_v62, %v2376_v32 }
 0xf38   :  { %v2393_v51 = vadd.f32 0.112945676, %v2392_v41  ;;  %v2418_v17 = vadd.f32 0.00028619796, %v2417_v9  ;;  %v2429_v29 = vadd.f32 0.001143296, %v2428_v46 }
 0xf39   :  { %v2382_v20 = vadd.f32 0.05243302, %v2381_v28 }
 0xf3a   :  { %v2394_v38 = vmul.f32 %v2393_v51, %v2376_v32  ;;  %v2419_v0 = vmul.f32 %v2418_v17, %v2416_v55  ;;  %v2430_v36 = vmul.f32 %v2429_v29, %v2416_v55 }
 0xf3b   :  { %v2383_v26 = vmul.f32 %v2382_v20, %v2376_v32 }
 0xf3c   :  { %v2395_v35 = vadd.f32 0.4994258, %v2394_v38  ;;  %v2420_v14 = vadd.f32 0.0036580483, %v2419_v0  ;;  %v2431_v24 = vadd.f32 0.014752088, %v2430_v36 }
 0xf3d   :  { %v2384_v25 = vadd.f32 0.18741608, %v2383_v26 }
 0xf3e   :  { %v2396_v11 = vmul.f32 %v2395_v35, %v2376_v32  ;;  %v2432_v19 = vmul.f32 %v2431_v24, %v2416_v55  ;;  %v2421_v13 = vmul.f32 %v2420_v14, %v2416_v55 }
 0xf3f   :  { %v2385_v49 = vmul.f32 %v2384_v25, %v2376_v32 }
 0xf40   :  { %v2397_v47 = vadd.f32 1.0, %v2396_v11  ;;  %v2433_v7 = vadd.f32 0.112945676, %v2432_v19  ;;  %v2422_v1 = vadd.f32 0.05243302, %v2421_v13 }
 0xf41   :  { %v2386_v22 = vadd.f32 1.1283791, %v2385_v49 }
 0xf42   :  { %3320 = vrcp.f32 %v2397_v47  ;;  %v2434_v12 = vmul.f32 %v2433_v7, %v2416_v55  ;;  %v2423_v59 = vmul.f32 %v2422_v1, %v2416_v55  ;;  %v2409_v50 = vand.u32 2147483648, %v2397_v47 }
 0xf43   :  { %v2407_v54 = vand.u32 2147483647, %v2397_v47  ;;  %vm2403_vm9 = vweird.f32 %v2397_v47  ;;  %v2387_v41 = vmul.f32 %v2386_v22, %v4547_v56  ;;  %v2364_v1 = vmul.f32 0.5, %v4555_v37 }
 0xf44   :  { %v2435_v34 = vadd.f32 0.4994258, %v2434_v12  ;;  %v2424_v5 = vadd.f32 0.18741608, %v2423_v59  ;;  %v2410_v27 = vor.u32 1.1754944e-38, %v2409_v50 }
 0xf45   :  { %vm2408_vm11 = vcmp.eq.f32.partialorder %v2407_v54, 8.507059e+37 }
 0xf46   :  { %v2436_v23 = vmul.f32 %v2435_v34, %v2416_v55  ;;  %v2425_v60 = vmul.f32 %v2424_v5, %v2416_v55 }
 0xf48   :  { %v3321_v42 = vpop.eup %3320  ;;  %v2437_v57 = vadd.f32 1.0, %v2436_v23  ;;  %v2426_v9 = vadd.f32 1.1283791, %v2425_v60 }
 0xf49   :  { %v2399_v52 = vmul.f32 %v3321_v42, %v2397_v47  ;;  %vm2404_vm7 = vweird.f32 %v3321_v42 }
 0xf4a   :  { %3322 = vrcp.f32 %v2437_v57  ;;  %vm2405_vm10 = vmor %vm2403_vm9, %vm2404_vm7  ;;  %v2449_v46 = vand.u32 2147483648, %v2437_v57  ;;  %v2447_v55 = vand.u32 2147483647, %v2437_v57  ;;  %vm2443_vm14 = vweird.f32 %v2437_v57 }
 0xf4b   :  { %v2400_v3 = vsub.f32 1.0, %v2399_v52  ;;  %v2427_v14 = vmul.f32 %v2426_v9, %v4561_v30  ;;  %v2363_v30 = vmul.f32 0.5, %v4541_v4 }
 0xf4c   :  { %v2450_v0 = vor.u32 1.1754944e-38, %v2449_v46  ;;  %vm2448_vm1 = vcmp.eq.f32.partialorder %v2447_v55, 8.507059e+37 }
 0xf4d   :  { %v2401_v43 = vmul.f32 %v3321_v42, %v2400_v3 }
 0xf4f   :  { %v2402_v33 = vadd.f32 %v3321_v42, %v2401_v43 }
 0xf50   :  { %v2353_v44 = vpop.f32.mrf.mxu0  ;;  %v3323_v31 = vpop.eup %3322 }
 0xf51   :  { %v2406_v58 = vsel %vm2405_vm10, %v3321_v42, %v2402_v33  ;;  %v4581_v63 = vadd.f32 %v4538_v21, %v2353_v44  ;;  %v2439_v45 = vmul.f32 %v3323_v31, %v2437_v57  ;;  %vm2444_vm13 = vweird.f32 %v3323_v31 }
 0xf52   :  { %v2411_v32 = vsel %vm2408_vm11, %v2410_v27, %v2406_v58  ;;  %vm2445_vm15 = vmor %vm2443_vm14, %vm2444_vm13 }
 0xf53   :  { %v4584_v61 = vmul.f32 0.70710677, %v4581_v63  ;;  %v2440_v10 = vsub.f32 1.0, %v2439_v45  ;;  %v2412_v51 = vmul.f32 %v2411_v32, %v2387_v41 }
 0xf55   :  { %v2455_v62 = vmul.f32 %v4584_v61, %v4584_v61  ;;  %v2441_v17 = vmul.f32 %v3323_v31, %v2440_v10  ;;  %v3033_v35 = vclamps-f32 %v2412_v51, 1.0 }
 0xf57   :  { %v4589_v29 = vmin.f32 %v2455_v62, 16.0  ;;  %v2442_v38 = vadd.f32 %v3323_v31, %v2441_v17  ;;  %v2615_v7 = vadd.f32 1.0, %v3033_v35 }
 0xf58   :  { %v2355_v8 = vpop.f32.mrf.mxu0 }
 0xf59   :  { %v2457_v36 = vmul.f32 2.1237322e-06, %v4589_v29  ;;  %v4593_v56 = vadd.f32 %v4538_v21, %v2355_v8  ;;  %v2468_v28 = vmul.f32 3.8918573e-05, %v4589_v29  ;;  %v2446_v24 = vsel %vm2445_vm15, %v3323_v31, %v2442_v38 }
 0xf5a   :  { %v2451_v11 = vsel %vm2448_vm1, %v2450_v0, %v2446_v24  ;;  %v2621_v3 = vmul.f32 %v2615_v7, %v2363_v30 }
 0xf5b   :  { %v4598_v39 = vmul.f32 0.70710677, %v4593_v56  ;;  %v2452_v19 = vmul.f32 %v2451_v11, %v2427_v14  ;;  %v2469_v20 = vadd.f32 0.001143296, %v2468_v28  ;;  %v2458_v47 = vadd.f32 0.00028619796, %v2457_v36 }
 0xf5d   :  { %v2495_v13 = vmul.f32 %v4598_v39, %v4598_v39  ;;  %v3034_v15 = vclamps-f32 %v2452_v19, 1.0  ;;  %v2470_v12 = vmul.f32 %v2469_v20, %v4589_v29  ;;  %v2459_v25 = vmul.f32 %v2458_v47, %v4589_v29 }
 0xf5f   :  { %v4603_v26 = vmin.f32 %v2495_v13, 16.0  ;;  %v2616_v34 = vadd.f32 1.0, %v3034_v15  ;;  %v2471_v42 = vadd.f32 0.014752088, %v2470_v12  ;;  %v2460_v33 = vadd.f32 0.0036580483, %v2459_v25 }
 0xf60   :  { %v2358_v23 = vpop.f32.mrf.mxu0 }
 0xf61   :  { %v2497_v52 = vmul.f32 2.1237322e-06, %v4603_v26  ;;  %v4610_v59 = vadd.f32 %v4538_v21, %v2358_v23  ;;  %v2508_v57 = vmul.f32 3.8918573e-05, %v4603_v26  ;;  %v2622_v49 = vmul.f32 %v2616_v34, %v2364_v1 }
 0xf62   :  { %v2472_v43 = vmul.f32 %v2471_v42, %v4589_v29  ;;  %v2461_v41 = vmul.f32 %v2460_v33, %v4589_v29 }
 0xf63   :  { %v2498_v50 = vadd.f32 0.00028619796, %v2497_v52  ;;  %v2627_v4 = vpack.c.bf16 %v2622_v49, %v2621_v3  ;;  %v4615_v37 = vmul.f32 0.70710677, %v4610_v59  ;;  %v2509_v54 = vadd.f32 0.001143296, %v2508_v57 }
 0xf64   :  { %v2473_v5 = vadd.f32 0.112945676, %v2472_v43  ;;  %v2462_v0 = vadd.f32 0.05243302, %v2461_v41 }
 0xf65   :  { %v2499_v22 = vmul.f32 %v2498_v50, %v4603_v26  ;;  %v2535_v44 = vmul.f32 %v4615_v37, %v4615_v37  ;;  %2705 = vmatmul.bf16.vlgmr.msra.gmra.mxu2 %v2627_v4  ;;  %v2510_v58 = vmul.f32 %v2509_v54, %v4603_v26 }
 0xf66   :  { %v2474_v31 = vmul.f32 %v2473_v5, %v4589_v29  ;;  %v2463_v20 = vmul.f32 %v2462_v0, %v4589_v29 }
 0xf67   :  { %v4622_v27 = vmin.f32 %v2535_v44, 16.0  ;;  %v2511_v32 = vadd.f32 0.014752088, %v2510_v58  ;;  %v2500_v10 = vadd.f32 0.0036580483, %v2499_v22 }
 0xf68   :  { %v2360_v60 = vpop.f32.mrf.mxu0  ;;  %v2475_v45 = vadd.f32 0.4994258, %v2474_v31  ;;  %v2464_v25 = vadd.f32 0.18741608, %v2463_v20 }
 0xf69   :  { %v4626_v9 = vadd.f32 %v4538_v21, %v2360_v60  ;;  %v2537_v46 = vmul.f32 2.1237322e-06, %v4622_v27  ;;  %v2548_v62 = vmul.f32 3.8918573e-05, %v4622_v27  ;;  %v2512_v17 = vmul.f32 %v2511_v32, %v4603_v26 }
 0xf6a   :  { %v2476_v51 = vmul.f32 %v2475_v45, %v4589_v29  ;;  %v2501_v35 = vmul.f32 %v2500_v10, %v4603_v26  ;;  %v2465_v58 = vmul.f32 %v2464_v25, %v4589_v29 }
 0xf6b   :  { %v2538_v55 = vadd.f32 0.00028619796, %v2537_v46  ;;  %v2549_v38 = vadd.f32 0.001143296, %v2548_v62  ;;  %v4633_v8 = vmul.f32 0.70710677, %v4626_v9 }
 0xf6c   :  { %v2477_v36 = vadd.f32 1.0, %v2476_v51  ;;  %v2513_v28 = vadd.f32 0.112945676, %v2512_v17  ;;  %v2502_v13 = vadd.f32 0.05243302, %v2501_v35 }
 0xf6d   :  { %v2550_v21 = vmul.f32 %v2549_v38, %v4622_v27  ;;  %v2575_v14 = vmul.f32 %v4633_v8, %v4633_v8  ;;  %v2539_v24 = vmul.f32 %v2538_v55, %v4622_v27  ;;  %v2466_v0 = vadd.f32 1.1283791, %v2465_v58 }
 0xf6e   :  { %3324 = vrcp.f32 %v2477_v36  ;;  %v2514_v47 = vmul.f32 %v2513_v28, %v4603_v26  ;;  %v2503_v3 = vmul.f32 %v2502_v13, %v4603_v26  ;;  %v2489_v32 = vand.u32 2147483648, %v2477_v36 }
 0xf6f   :  { %v2551_v11 = vadd.f32 0.014752088, %v2550_v21  ;;  %v4640_v19 = vmin.f32 %v2575_v14, 16.0  ;;  %v2540_v30 = vadd.f32 0.0036580483, %v2539_v24  ;;  %vm2483_vm3 = vweird.f32 %v2477_v36 }
 0xf70   :  { %v2515_v1 = vadd.f32 0.4994258, %v2514_v47  ;;  %v2504_v60 = vadd.f32 0.18741608, %v2503_v3  ;;  %v2487_v51 = vand.u32 2147483647, %v2477_v36 }
 0xf71   :  { %v2552_v7 = vmul.f32 %v2551_v11, %v4622_v27  ;;  %v2577_v15 = vmul.f32 2.1237322e-06, %v4640_v19  ;;  %v2588_v12 = vmul.f32 3.8918573e-05, %v4640_v19  ;;  %v2541_v4 = vmul.f32 %v2540_v30, %v4622_v27 }
 0xf72   :  { %v2516_v57 = vmul.f32 %v2515_v1, %v4603_v26  ;;  %v2505_v29 = vmul.f32 %v2504_v60, %v4603_v26  ;;  %v2490_v24 = vor.u32 1.1754944e-38, %v2489_v32  ;;  %vm2488_vm5 = vcmp.eq.f32.partialorder %v2487_v51, 8.507059e+37 }
 0xf73   :  { %v2553_v34 = vadd.f32 0.112945676, %v2552_v7  ;;  %v2578_v23 = vadd.f32 0.00028619796, %v2577_v15  ;;  %v2589_v52 = vadd.f32 0.001143296, %v2588_v12 }
 0xf74   :  { %v3325_v42 = vpop.eup %3324  ;;  %v2517_v54 = vadd.f32 1.0, %v2516_v57  ;;  %v2542_v41 = vadd.f32 0.05243302, %v2541_v4  ;;  %v2506_v7 = vadd.f32 1.1283791, %v2505_v29 }
 0xf75   :  { %v2554_v49 = vmul.f32 %v2553_v34, %v4622_v27  ;;  %v2579_v43 = vmul.f32 %v2578_v23, %v4640_v19  ;;  %v2479_v50 = vmul.f32 %v3325_v42, %v2477_v36  ;;  %v2590_v5 = vmul.f32 %v2589_v52, %v4640_v19 }
 0xf76   :  { %3326 = vrcp.f32 %v2517_v54  ;;  %vm2484_vm2 = vweird.f32 %v3325_v42  ;;  %v2543_v35 = vmul.f32 %v2542_v41, %v4622_v27  ;;  %v2467_v36 = vmul.f32 %v2466_v0, %v4584_v61 }
 0xf77   :  { %v2555_v33 = vadd.f32 0.4994258, %v2554_v49  ;;  %v2580_v22 = vadd.f32 0.0036580483, %v2579_v43  ;;  %v2591_v44 = vadd.f32 0.014752088, %v2590_v5  ;;  %vm2485_vm4 = vmor %vm2483_vm3, %vm2484_vm2  ;;  %v2507_v3 = vmul.f32 %v2506_v7, %v4598_v39 }
 0xf78   :  { %v2480_v31 = vsub.f32 1.0, %v2479_v50  ;;  %v2544_v26 = vadd.f32 0.18741608, %v2543_v35  ;;  %v2529_v30 = vand.u32 2147483648, %v2517_v54  ;;  %v2527_v25 = vand.u32 2147483647, %v2517_v54 }
 0xf79   :  { %v2556_v45 = vmul.f32 %v2555_v33, %v4622_v27  ;;  %v2592_v10 = vmul.f32 %v2591_v44, %v4640_v19  ;;  %v2581_v17 = vmul.f32 %v2580_v22, %v4640_v19  ;;  %vm2523_vm12 = vweird.f32 %v2517_v54 }
 0xf7a   :  { %v2481_v46 = vmul.f32 %v3325_v42, %v2480_v31  ;;  %v2545_v61 = vmul.f32 %v2544_v26, %v4622_v27  ;;  %v2530_v50 = vor.u32 1.1754944e-38, %v2529_v30  ;;  %vm2528_vm7 = vcmp.eq.f32.partialorder %v2527_v25, 8.507059e+37 }
 0xf7b   :  { %v4656_v62 = vadd.f32 1.0, %v2556_v45  ;;  %v2593_v55 = vadd.f32 0.112945676, %v2592_v10  ;;  %v2582_v20 = vadd.f32 0.05243302, %v2581_v17  ;;  %v2365_v41 = vmul.f32 0.5, %v4581_v63 }
 0xf7c   :  { %v2482_v38 = vadd.f32 %v3325_v42, %v2481_v46  ;;  %v3327_v28 = vpop.eup %3326  ;;  %v2546_v27 = vadd.f32 1.1283791, %v2545_v61  ;;  %v2366_v17 = vmul.f32 0.5, %v4593_v56  ;;  %v2368_v30 = vmul.f32 0.5, %v4626_v9 }
 0xf7d   :  { %3328 = vrcp.f32 %v4656_v62  ;;  %v2594_v21 = vmul.f32 %v2593_v55, %v4640_v19  ;;  %v2519_v11 = vmul.f32 %v3327_v28, %v2517_v54  ;;  %vm2524_vm8 = vweird.f32 %v3327_v28 }
 0xf7e   :  { %v2486_v14 = vsel %vm2485_vm4, %v3325_v42, %v2482_v38  ;;  %v2583_v52 = vmul.f32 %v2582_v20, %v4640_v19  ;;  %vm2525_vm6 = vmor %vm2523_vm12, %vm2524_vm8  ;;  %v2569_v4 = vand.u32 2147483648, %v4656_v62  ;;  %v2567_v58 = vand.u32 2147483647, %v4656_v62 }
 0xf7f   :  { %v2595_v47 = vadd.f32 0.4994258, %v2594_v21  ;;  %v2491_v13 = vsel %vm2488_vm5, %v2490_v24, %v2486_v14  ;;  %v2520_v15 = vsub.f32 1.0, %v2519_v11  ;;  %vm2563_vm10 = vweird.f32 %v4656_v62 }
 0xf80   :  { %v2492_v34 = vmul.f32 %v2491_v13, %v2467_v36  ;;  %v2584_v44 = vadd.f32 0.18741608, %v2583_v52  ;;  %v2570_v46 = vor.u32 1.1754944e-38, %v2569_v4  ;;  %vm2568_vm13 = vcmp.eq.f32.partialorder %v2567_v58, 8.507059e+37 }
 0xf81   :  { %v2596_v12 = vmul.f32 %v2595_v47, %v4640_v19  ;;  %v2521_v23 = vmul.f32 %v3327_v28, %v2520_v15  ;;  %v2547_v29 = vmul.f32 %v2546_v27, %v4615_v37 }
 0xf82   :  { %v3035_v5 = vclamps-f32 %v2492_v34, 1.0  ;;  %v2585_v51 = vmul.f32 %v2584_v44, %v4640_v19 }
 0xf83   :  { %v3329_v1 = vpop.eup %3328  ;;  %v2597_v57 = vadd.f32 1.0, %v2596_v12  ;;  %v2522_v49 = vadd.f32 %v3327_v28, %v2521_v23  ;;  %v2367_v12 = vmul.f32 0.5, %v4610_v59 }
 0xf84   :  { %v2559_v42 = vmul.f32 %v3329_v1, %v4656_v62  ;;  %vm2564_vm9 = vweird.f32 %v3329_v1  ;;  %v2617_v45 = vadd.f32 1.0, %v3035_v5  ;;  %v2586_v21 = vadd.f32 1.1283791, %v2585_v51 }
 0xf85   :  { %3330 = vrcp.f32 %v2597_v57  ;;  %v2526_v33 = vsel %vm2525_vm6, %v3327_v28, %v2522_v49  ;;  %vm2565_vm11 = vmor %vm2563_vm10, %vm2564_vm9  ;;  %v2607_v14 = vand.u32 2147483647, %v2597_v57  ;;  %v2609_v24 = vand.u32 2147483648, %v2597_v57 }
 0xf86   :  { %v2560_v43 = vsub.f32 1.0, %v2559_v42  ;;  %v2531_v31 = vsel %vm2528_vm7, %v2530_v50, %v2526_v33  ;;  %v2623_v28 = vmul.f32 %v2617_v45, %v2365_v41  ;;  %vm2603_vm15 = vweird.f32 %v2597_v57  ;;  %v3147_v42 = vld [vmem:[%s4784_s1 + $0x13] ss:$0 sm:$0xff] }
 0xf87   :  { %v2532_v39 = vmul.f32 %v2531_v31, %v2507_v3  ;;  %v2610_v56 = vor.u32 1.1754944e-38, %v2609_v24  ;;  %v2587_v13 = vmul.f32 %v2586_v21, %v4633_v8  ;;  %vm2608_vm2 = vcmp.eq.f32.partialorder %v2607_v14, 8.507059e+37 }
 0xf88   :  { %v2561_v22 = vmul.f32 %v3329_v1, %v2560_v43 }
 0xf89   :  { %v3036_v54 = vclamps-f32 %v2532_v39, 1.0 }
 0xf8a   :  { %v2562_v60 = vadd.f32 %v3329_v1, %v2561_v22 }
 0xf8b   :  { %v3331_v32 = vpop.eup %3330  ;;  %v2618_v38 = vadd.f32 1.0, %v3036_v54 }
 0xf8c   :  { %v2566_v10 = vsel %vm2565_vm11, %v3329_v1, %v2562_v60  ;;  %v2599_v55 = vmul.f32 %v3331_v32, %v2597_v57  ;;  %vm2604_vm14 = vweird.f32 %v3331_v32 }
 0xf8d   :  { %v2571_v0 = vsel %vm2568_vm13, %v2570_v46, %v2566_v10  ;;  %v2624_v35 = vmul.f32 %v2618_v38, %v2366_v17  ;;  %vm2605_vm1 = vmor %vm2603_vm15, %vm2604_vm14 }
 0xf8e   :  { %v2600_v62 = vsub.f32 1.0, %v2599_v55  ;;  %v2572_v11 = vmul.f32 %v2571_v0, %v2547_v29 }
 0xf8f   :  { %v2628_v20 = vpack.c.bf16 %v2624_v35, %v2623_v28 }
 0xf90   :  { %v2601_v63 = vmul.f32 %v3331_v32, %v2600_v62  ;;  %v3037_v19 = vclamps-f32 %v2572_v11, 1.0 }
 0xf91   :  { %2710 = vmatmul.bf16.gmra.mxu2 %v2628_v20 }
 0xf92   :  { %v2602_v47 = vadd.f32 %v3331_v32, %v2601_v63  ;;  %v2619_v15 = vadd.f32 1.0, %v3037_v19 }
 0xf94   :  { %v2606_v36 = vsel %vm2605_vm1, %v3331_v32, %v2602_v47  ;;  %v2625_v34 = vmul.f32 %v2619_v15, %v2367_v12 }
 0xf95   :  { %v2611_v37 = vsel %vm2608_vm2, %v2610_v56, %v2606_v36 }
 0xf96   :  { %v2612_v7 = vmul.f32 %v2611_v37, %v2587_v13 }
 0xf98   :  { %v3038_v26 = vclamps-f32 %v2612_v7, 1.0 }
 0xf9a   :  { %v2620_v1 = vadd.f32 1.0, %v3038_v26 }
 0xf9c   :  { %v2626_v23 = vmul.f32 %v2620_v1, %v2368_v30 }
 0xf9e   :  { %v2629_v25 = vpack.c.bf16 %v2626_v23, %v2625_v34 }
 0xfa1   :  { %2715 = vmatmul.bf16.gmra.mxu2 %v2629_v25 }
 0xfe8   :  { %v2706_v8 = vpop.f32.mrf.mxu2 }
 0xfe9   :  { %v2707_v52 = vadd.f32 %v3147_v42, %v2706_v8 }
 0xfeb   :  { %v2721_v57 = vadd.f32 %v2707_v52, %v4421_v48 }
 0xfed   :  { %v2727_v3 = vsel %vm117_vm0, %v2721_v57, 0.0 }
 0xfee   :  { %2728 = vadd.xlane.f32.xlu0 %v2727_v3 }
 0xff0   :  { %v2708_v49 = vpop.f32.mrf.mxu2 }
 0xff1   :  { %v2709_v59 = vadd.f32 %v3147_v42, %v2708_v49 }
 0xff3   :  { %v2722_v9 = vadd.f32 %v2709_v59, %v4426_v6  ;;  %v4731_v59 = vld [vmem:[%s4784_s1 + $0x2] ss:$0 sm:$0xff] }
 0xff5   :  { %v2730_v61 = vsel %vm117_vm0, %v2722_v9, 0.0 }
 0xff6   :  { %2731 = vadd.xlane.f32.xlu1 %v2730_v61 }
0x1014   :  { %v2711_v43 = vpop.f32.mrf.mxu2 }
0x1015   :  { %v2712_v50 = vadd.f32 %v3147_v42, %v2711_v43  ;;  %v4736_v43 = vld [vmem:[%s4784_s1 + $0x3] ss:$0 sm:$0xff] }
0x1017   :  { %v2723_v4 = vadd.f32 %v2712_v50, %v4431_v40 }
0x1019   :  { %v2733_v5 = vsel %vm117_vm0, %v2723_v4, 0.0 }
0x101a   :  { %2734 = vadd.xlane.f32.xlu2 %v2733_v5 }
0x101c   :  { %v2713_v33 = vpop.f32.mrf.mxu2 }
0x101d   :  { %v2714_v22 = vadd.f32 %v3147_v42, %v2713_v33 }
0x101f   :  { %v2724_v48 = vadd.f32 %v2714_v22, %v4436_v16 }
0x1021   :  { %v2736_v44 = vsel %vm117_vm0, %v2724_v48, 0.0 }
0x1022   :  { %2737 = vadd.xlane.f32.xlu0 %v2736_v44 }
0x1024   :  { %v2716_v31 = vpop.f32.mrf.mxu2 }
0x1025   :  { %v2717_v58 = vadd.f32 %v3147_v42, %v2716_v31 }
0x1027   :  { %v2725_v6 = vadd.f32 %v2717_v58, %v4441_v2 }
0x1029   :  { %v2739_v39 = vsel %vm117_vm0, %v2725_v6, 0.0 }
0x102a   :  { %2740 = vadd.xlane.f32.xlu1 %v2739_v39 }
0x102c   :  { %v2718_v60 = vpop.f32.mrf.mxu2 }
0x102d   :  { %v2719_v27 = vadd.f32 %v3147_v42, %v2718_v60 }
0x102f   :  { %v2726_v40 = vadd.f32 %v2719_v27, %v4446_v53 }
0x1031   :  { %v2742_v54 = vsel %vm117_vm0, %v2726_v40, 0.0 }
0x1032   :  { %2743 = vadd.xlane.f32.xlu2 %v2742_v54 }
0x1061   :  { %v2729_v45 = vpop.xlane.xlu0 %2728 }
0x1062   :  { %v2745_v16 = vmul.f32 %v2729_v45, %v3410_v18 }
0x1064   :  { %v2751_v32 = vsub.f32 %v2721_v57, %v2745_v16 }
0x1066   :  { %v2757_v41 = vmul.f32 %v2751_v32, %v2751_v32 }
0x1068   :  { %v2763_v10 = vsel %vm117_vm0, %v2757_v41, 0.0 }
0x1069   :  { %2764 = vadd.xlane.f32.xlu0 %v2763_v10  ;;  %v2732_v46 = vpop.xlane.xlu1 %2731 }
0x106a   :  { %v2746_v2 = vmul.f32 %v2732_v46, %v3410_v18 }
0x106c   :  { %v4697_v51 = vsub.f32 %v2722_v9, %v2746_v2 }
0x106e   :  { %v2758_v17 = vmul.f32 %v4697_v51, %v4697_v51 }
0x1070   :  { %v2766_v53 = vsel %vm117_vm0, %v2758_v17, 0.0 }
0x1071   :  { %2767 = vadd.xlane.f32.xlu1 %v2766_v53 }
0x108d   :  { %v2735_v55 = vpop.xlane.xlu2 %2734 }
0x108e   :  { %v2747_v38 = vmul.f32 %v2735_v55, %v3410_v18 }
0x1090   :  { %v4703_v0 = vsub.f32 %v2723_v4, %v2747_v38 }
0x1092   :  { %v2759_v29 = vmul.f32 %v4703_v0, %v4703_v0 }
0x1094   :  { %v2769_v62 = vsel %vm117_vm0, %v2759_v29, 0.0 }
0x1095   :  { %v2738_v28 = vpop.xlane.xlu0 %2737  ;;  %2770 = vadd.xlane.f32.xlu2 %v2769_v62 }
0x1096   :  { %v2748_v35 = vmul.f32 %v2738_v28, %v3410_v18 }
0x1098   :  { %v4709_v21 = vsub.f32 %v2724_v48, %v2748_v35 }
0x109a   :  { %v2760_v14 = vmul.f32 %v4709_v21, %v4709_v21 }
0x109c   :  { %v2772_v24 = vsel %vm117_vm0, %v2760_v14, 0.0 }
0x109d   :  { %2773 = vadd.xlane.f32.xlu0 %v2772_v24  ;;  %v2741_v11 = vpop.xlane.xlu1 %2740 }
0x109e   :  { %v2749_v63 = vmul.f32 %v2741_v11, %v3410_v18 }
0x10a0   :  { %v4715_v20 = vsub.f32 %v2725_v6, %v2749_v63 }
0x10a2   :  { %v2761_v47 = vmul.f32 %v4715_v20, %v4715_v20 }
0x10a4   :  { %v2775_v56 = vsel %vm117_vm0, %v2761_v47, 0.0 }
0x10a5   :  { %v2744_v19 = vpop.xlane.xlu2 %2743  ;;  %2776 = vadd.xlane.f32.xlu1 %v2775_v56 }
0x10a6   :  { %v2750_v13 = vmul.f32 %v2744_v19, %v3410_v18 }
0x10a8   :  { %v4721_v36 = vsub.f32 %v2726_v40, %v2750_v13 }
0x10aa   :  { %v2762_v37 = vmul.f32 %v4721_v36, %v4721_v36 }
0x10ac   :  { %v2778_v7 = vsel %vm117_vm0, %v2762_v37, 0.0 }
0x10ad   :  { %2779 = vadd.xlane.f32.xlu2 %v2778_v7 }
0x10dc   :  { %v2765_v15 = vpop.xlane.xlu0 %2764 }
0x10dd   :  { %v2781_v26 = vmul.f32 %v2765_v15, %v3410_v18 }
0x10df   :  { %v2787_v12 = vadd.f32 1e-05, %v2781_v26 }
0x10e1   :  { %3332 = vrsqrt.f32 %v2787_v12  ;;  %vm2799_vm4 = vweird.f32 %v2787_v12 }
0x10e4   :  { %v2768_v30 = vpop.xlane.xlu1 %2767 }
0x10e5   :  { %v2782_v1 = vmul.f32 %v2768_v30, %v3410_v18 }
0x10e7   :  { %v3333_v34 = vpop.eup %3332  ;;  %v2788_v23 = vadd.f32 1e-05, %v2782_v1 }
0x10e8   :  { %v2794_v25 = vmul.f32 %v3333_v34, %v2787_v12  ;;  %vm2800_vm3 = vweird.f32 %v3333_v34 }
0x10e9   :  { %3334 = vrsqrt.f32 %v2788_v23  ;;  %vm2801_vm5 = vmor %vm2799_vm4, %vm2800_vm3  ;;  %vm2809_vm12 = vweird.f32 %v2788_v23 }
0x10ea   :  { %v2795_v42 = vmul.f32 %v3333_v34, %v2794_v25 }
0x10ec   :  { %v2796_v8 = vmul.f32 0.5, %v2795_v42 }
0x10ee   :  { %v2797_v52 = vsub.f32 1.5, %v2796_v8 }
0x10ef   :  { %v3335_v57 = vpop.eup %3334 }
0x10f0   :  { %v2798_v3 = vmul.f32 %v3333_v34, %v2797_v52  ;;  %v2804_v49 = vmul.f32 %v3335_v57, %v2788_v23  ;;  %vm2810_vm8 = vweird.f32 %v3335_v57 }
0x10f1   :  { %vm2811_vm6 = vmor %vm2809_vm12, %vm2810_vm8 }
0x10f2   :  { %v2802_v9 = vsel %vm2801_vm5, %v3333_v34, %v2798_v3  ;;  %v2805_v61 = vmul.f32 %v3335_v57, %v2804_v49 }
0x10f3   :  { %v2853_v50 = vmul.f32 %v2802_v9, %v2751_v32 }
0x10f4   :  { %v2806_v4 = vmul.f32 0.5, %v2805_v61 }
0x10f5   :  { %v2861_v5 = vmul.f32 %v4731_v59, %v2853_v50 }
0x10f6   :  { %v2807_v33 = vsub.f32 1.5, %v2806_v4 }
0x10f7   :  { %v2869_v22 = vadd.f32 %v4736_v43, %v2861_v5 }
0x10f8   :  { %v2808_v48 = vmul.f32 %v3335_v57, %v2807_v33 }
0x10f9   :  { %2875 = vst.msk [vmem:[%s4789_s6] sm:$0xff] %vm117_vm0, %v2869_v22 }
0x10fa   :  { %v2812_v44 = vsel %vm2811_vm6, %v3335_v57, %v2808_v48 }
0x10fb   :  { %v2854_v31 = vmul.f32 %v2812_v44, %v4697_v51 }
0x10fd   :  { %v2862_v58 = vmul.f32 %v4731_v59, %v2854_v31 }
0x10ff   :  { %v2870_v6 = vadd.f32 %v4736_v43, %v2862_v58 }
0x1101   :  { %2876 = vst.msk [vmem:[%s4789_s6 + $0x8] sm:$0xff] %vm117_vm0, %v2870_v6 }
0x1108   :  { %v2771_v39 = vpop.xlane.xlu2 %2770 }
0x1109   :  { %v2783_v60 = vmul.f32 %v2771_v39, %v3410_v18 }
0x110b   :  { %v2789_v27 = vadd.f32 1e-05, %v2783_v60 }
0x110d   :  { %3336 = vrsqrt.f32 %v2789_v27  ;;  %vm2819_vm9 = vweird.f32 %v2789_v27 }
0x1110   :  { %v2774_v40 = vpop.xlane.xlu0 %2773 }
0x1111   :  { %v2784_v54 = vmul.f32 %v2774_v40, %v3410_v18 }
0x1113   :  { %v3337_v45 = vpop.eup %3336  ;;  %v2790_v16 = vadd.f32 1e-05, %v2784_v54 }
0x1114   :  { %v2814_v32 = vmul.f32 %v3337_v45, %v2789_v27  ;;  %vm2820_vm7 = vweird.f32 %v3337_v45 }
0x1115   :  { %3338 = vrsqrt.f32 %v2790_v16  ;;  %vm2821_vm10 = vmor %vm2819_vm9, %vm2820_vm7  ;;  %vm2829_vm13 = vweird.f32 %v2790_v16 }
0x1116   :  { %v2815_v41 = vmul.f32 %v3337_v45, %v2814_v32 }
0x1118   :  { %v2816_v10 = vmul.f32 0.5, %v2815_v41  ;;  %v2777_v46 = vpop.xlane.xlu1 %2776 }
0x1119   :  { %v2785_v2 = vmul.f32 %v2777_v46, %v3410_v18 }
0x111a   :  { %v2817_v51 = vsub.f32 1.5, %v2816_v10 }
0x111b   :  { %v3339_v17 = vpop.eup %3338  ;;  %v2791_v53 = vadd.f32 1e-05, %v2785_v2 }
0x111c   :  { %v2818_v55 = vmul.f32 %v3337_v45, %v2817_v51  ;;  %v2824_v38 = vmul.f32 %v3339_v17, %v2790_v16  ;;  %vm2830_vm11 = vweird.f32 %v3339_v17 }
0x111d   :  { %3340 = vrsqrt.f32 %v2791_v53  ;;  %vm2831_vm14 = vmor %vm2829_vm13, %vm2830_vm11  ;;  %vm2839_vm1 = vweird.f32 %v2791_v53 }
0x111e   :  { %v2822_v29 = vsel %vm2821_vm10, %v3337_v45, %v2818_v55  ;;  %v2825_v62 = vmul.f32 %v3339_v17, %v2824_v38 }
0x111f   :  { %v2855_v28 = vmul.f32 %v2822_v29, %v4703_v0 }
0x1120   :  { %v2826_v35 = vmul.f32 0.5, %v2825_v62  ;;  %v2780_v14 = vpop.xlane.xlu2 %2779 }
0x1121   :  { %v2863_v24 = vmul.f32 %v4731_v59, %v2855_v28  ;;  %v2786_v11 = vmul.f32 %v2780_v14, %v3410_v18 }
0x1122   :  { %v2827_v63 = vsub.f32 1.5, %v2826_v35 }
0x1123   :  { %v3341_v47 = vpop.eup %3340  ;;  %v2871_v56 = vadd.f32 %v4736_v43, %v2863_v24  ;;  %v2792_v19 = vadd.f32 1e-05, %v2786_v11 }
0x1124   :  { %v2828_v13 = vmul.f32 %v3339_v17, %v2827_v63  ;;  %v2834_v37 = vmul.f32 %v3341_v47, %v2791_v53  ;;  %vm2840_vm15 = vweird.f32 %v3341_v47 }
0x1125   :  { %2877 = vst.msk [vmem:[%s4789_s6 + $0x10] sm:$0xff] %vm117_vm0, %v2871_v56  ;;  %3342 = vrsqrt.f32 %v2792_v19  ;;  %vm2841_vm2 = vmor %vm2839_vm1, %vm2840_vm15  ;;  %vm2849_vm4 = vweird.f32 %v2792_v19 }
0x1126   :  { %v2832_v0 = vsel %vm2831_vm14, %v3339_v17, %v2828_v13  ;;  %v2835_v7 = vmul.f32 %v3341_v47, %v2834_v37 }
0x1127   :  { %v2856_v18 = vmul.f32 %v2832_v0, %v4709_v21 }
0x1128   :  { %v2836_v15 = vmul.f32 0.5, %v2835_v7 }
0x1129   :  { %v2864_v26 = vmul.f32 %v4731_v59, %v2856_v18 }
0x112a   :  { %v2837_v12 = vsub.f32 1.5, %v2836_v15 }
0x112b   :  { %v3343_v30 = vpop.eup %3342  ;;  %v2872_v1 = vadd.f32 %v4736_v43, %v2864_v26 }
0x112c   :  { %v2838_v34 = vmul.f32 %v3341_v47, %v2837_v12  ;;  %v2844_v23 = vmul.f32 %v3343_v30, %v2792_v19  ;;  %vm2850_vm3 = vweird.f32 %v3343_v30 }
0x112d   :  { %2878 = vst.msk [vmem:[%s4789_s6 + $0x18] sm:$0xff] %vm117_vm0, %v2872_v1  ;;  %vm2851_vm5 = vmor %vm2849_vm4, %vm2850_vm3 }
0x112e   :  { %v2842_v25 = vsel %vm2841_vm2, %v3341_v47, %v2838_v34  ;;  %v2845_v42 = vmul.f32 %v3343_v30, %v2844_v23 }
0x112f   :  { %v2857_v21 = vmul.f32 %v2842_v25, %v4715_v20 }
0x1130   :  { %v2846_v8 = vmul.f32 0.5, %v2845_v42 }
0x1131   :  { %v2865_v52 = vmul.f32 %v4731_v59, %v2857_v21 }
0x1132   :  { %v2847_v57 = vsub.f32 1.5, %v2846_v8 }
0x1133   :  { %v2873_v3 = vadd.f32 %v4736_v43, %v2865_v52 }
0x1134   :  { %v2848_v49 = vmul.f32 %v3343_v30, %v2847_v57 }
0x1135   :  { %2879 = vst.msk [vmem:[%s4789_s6 + $0x20] sm:$0xff] %vm117_vm0, %v2873_v3 }
0x1136   :  { %v2852_v9 = vsel %vm2851_vm5, %v3343_v30, %v2848_v49 }
0x1137   :  { %v2858_v61 = vmul.f32 %v2852_v9, %v4721_v36 }
0x1139   :  { %v2866_v20 = vmul.f32 %v4731_v59, %v2858_v61 }
0x113b   :  { %v2874_v50 = vadd.f32 %v4736_v43, %v2866_v20 }
0x113d   :  { %2880 = vst.msk [vmem:[%s4789_s6 + $0x28] sm:$0xff] %vm117_vm0, %v2874_v50 }

</bundles_post_ra>
